<compile_context>
chip_gen: v5e
topology: v5e:2x2
jax: 0.10.0
libtpu: 0.0.40
codegen_flags: <defaults>
</compile_context>

<pallas_src>
import functools

import jax
import jax.numpy as jnp
from jax.experimental import pallas as pl
from jax.experimental.pallas import tpu as pltpu


def _round_up(n, m):
    return ((n + m - 1) // m) * m


# ----------------------------------------------------------------------------
# Fused kernel: one grid step processes a (Bt, ...) batch block of BOTH towers
# and writes the final prediction (lane-broadcast into a (Bt, 128) block).
# ----------------------------------------------------------------------------
def _fused_kernel(c_local, c_global, clp, cgp,
                  xu3_ref, xu2_ref, xi3_ref, xi2_ref,
                  # user tower
                  wu_big_ref, gu_ref, bu_la_ref, bu_ga_ref, bu_lc_ref,
                  bu_g2_ref, bu_g3_ref, bu_g4_ref,
                  # item tower
                  wi_big_ref, gi_ref, bi_la_ref, bi_ga_ref, bi_lc_ref,
                  bi_g2_ref, bi_g3_ref, bi_g4_ref,
                  # shared FC head
                  w1t_ref, b1_ref, w2t_ref, b2_ref,
                  out_ref):
    Bt, L, E = xu3_ref.shape
    k_sizes = (2, 3, 4)

    def tower(x3_ref, x2_ref, w_big_ref, g_ref, b_la, b_ga, b_lc_ref, b_g_refs):
        x3 = x3_ref[...]                              # (Bt, L, E)   bf16
        x2 = x2_ref[...]                              # (Bt, L*E)    bf16

        # ---- Gates: one lane-dense matmul (K = L*E).
        #   cols 0..L-1 : band-summed local-attention logits (zero-pad baked in)
        #   col  L      : global-attention logit (w_ga folded in)
        PG = jnp.dot(x2, g_ref[...], preferred_element_type=jnp.float32)
        score_ln = jax.nn.sigmoid(PG[:, :L] + b_la)   # (Bt, L)
        g = jax.nn.sigmoid(PG[:, L:L + 1] + b_ga)     # (Bt, 1), in (0, 1)

        # ---- Conv taps: one packed, lane-aligned matmul over the embed axis.
        P = jnp.dot(x3.reshape(Bt * L, E), w_big_ref[...],
                    preferred_element_type=jnp.float32)
        P = P.reshape(Bt, L, -1)                      # (Bt, L, Npad)

        # ---- Local CNN; gate folded in: (x*score) @ W == score * (x @ W).
        score3 = score_ln[:, :, None]                 # (Bt, L, 1)
        y_l = jnp.tanh(score3 * P[:, :, :c_local] + b_lc_ref[...])
        feats = [jnp.max(y_l, axis=1)]                # (Bt, c_local)

        # ---- Global CNN branches k=2,3,4; since g > 0 and tanh is monotone,
        #      apply gate/bias/tanh after the position max.
        off = clp
        for k, b_ref in zip(k_sizes, b_g_refs):
            l_out = L - k + 1
            acc = P[:, 0:l_out, off:off + c_global]
            for j in range(1, k):
                c0 = off + j * cgp
                acc = acc + P[:, j:j + l_out, c0:c0 + c_global]
            m = jnp.max(acc, axis=1)                  # (Bt, c_global)
            feats.append(jnp.tanh(g * m + b_ref[...]))
            off += k * cgp
        return jnp.concatenate(feats, axis=1)         # (Bt, F)

    feat_u = tower(xu3_ref, xu2_ref, wu_big_ref, gu_ref,
                   bu_la_ref[0, 0], bu_ga_ref[0, 0], bu_lc_ref,
                   (bu_g2_ref, bu_g3_ref, bu_g4_ref))
    feat_i = tower(xi3_ref, xi2_ref, wi_big_ref, gi_ref,
                   bi_la_ref[0, 0], bi_ga_ref[0, 0], bi_lc_ref,
                   (bi_g2_ref, bi_g3_ref, bi_g4_ref))

    # ---- Shared FC head, run ONCE on both towers stacked along M.
    feats = jnp.concatenate([feat_u, feat_i], axis=0).astype(jnp.bfloat16)
    h = jnp.dot(feats, w1t_ref[...],
                preferred_element_type=jnp.float32) + b1_ref[...]
    # TODO(synk): nn.Dropout(0.5) implemented as eval-mode identity (no RNG).
    h = jnp.maximum(h, 0.0).astype(jnp.bfloat16)
    o = jnp.dot(h, w2t_ref[...],
                preferred_element_type=jnp.float32) + b2_ref[...]   # (2Bt, O)

    res = jnp.sum(o[:Bt] * o[Bt:], axis=1, keepdims=True)           # (Bt, 1)
    out_ref[...] = jnp.broadcast_to(res, out_ref.shape)             # lane-dense


# ----------------------------------------------------------------------------
# Wrapper: weight packing (hoisted transposes / alignment / bf16) + pallas_call.
# ----------------------------------------------------------------------------
def _full_spec(shape):
    n = len(shape)
    return pl.BlockSpec(shape, lambda *_: (0,) * n)


def _pack_conv_weights(p):
    """[w_lc | g2/g3/g4 taps], each group 8-lane aligned, padded to 128 lanes."""
    c_local, E = p["w_lc"].shape
    c_global = p["w_g2"].shape[0]
    clp = _round_up(c_local, 8)
    cgp = _round_up(c_global, 8)

    def padcols(w_t, width):
        c = w_t.shape[1]
        return jnp.pad(w_t, ((0, 0), (0, width - c))) if width > c else w_t

    cols = [padcols(p["w_lc"].T.astype(jnp.float32), clp)]
    for key, k in (("w_g2", 2), ("w_g3", 3), ("w_g4", 4)):
        w = p[key]
        for j in range(k):
            cols.append(padcols(w[:, j, :].T.astype(jnp.float32), cgp))
    w_big = jnp.concatenate(cols, axis=1)
    ncols = w_big.shape[1]
    n_pad = _round_up(ncols, 128) - ncols
    if n_pad:
        w_big = jnp.pad(w_big, ((0, 0), (0, n_pad)))
    return w_big.astype(jnp.bfloat16), clp, cgp


def _pack_gate_weights(p, L):
    """(L*E, GW): cols 0..L-1 = local-attention band matrix, col L = w_ga."""
    win, E = p["w_la"].shape
    pad = (win - 1) // 2
    zero = jnp.zeros((E,), jnp.float32)
    cols = []
    for i in range(L):
        segs = []
        for r in range(L):
            j = r - i + pad
            segs.append(p["w_la"][j].astype(jnp.float32)
                        if 0 <= j < win else zero)
        cols.append(jnp.concatenate(segs, axis=0))            # (L*E,)
    cols.append(p["w_ga"].astype(jnp.float32).reshape(L * E))  # w_ga column
    G = jnp.stack(cols, axis=1)                                # (L*E, L+1)
    gw = _round_up(L + 1, 8)
    if gw > L + 1:
        G = jnp.pad(G, ((0, 0), (0, gw - (L + 1))))
    return G.astype(jnp.bfloat16)


def cnndlga_forward(x_user, x_item, p_user, p_item, p_fc, *, batch_block=None):
    B, L, E = x_user.shape
    c_local = p_user["w_lc"].shape[0]
    c_global = p_user["w_g2"].shape[0]

    # Batch blocking: Bt multiple of 16 (bf16 sublane tiling), capped at 512
    # rows/step (VMEM-safe on v7x); even number of grid steps when >1 so both
    # v7x TensorCores get equal work; on v5e/v6e few big steps amortize the
    # per-step pipeline overhead.
    if batch_block is None:
        batch_block = min(512, max(16, -(-B // 2)))
    Bt = _round_up(max(batch_block, 16), 16)
    nb = -(-B // Bt)
    if nb > 1 and nb % 2 == 1:
        nb += 1
    Bp = nb * Bt

    xu = x_user.astype(jnp.bfloat16)
    xi = x_item.astype(jnp.bfloat16)
    if Bp != B:
        xu = jnp.pad(xu, ((0, Bp - B), (0, 0), (0, 0)))
        xi = jnp.pad(xi, ((0, Bp - B), (0, 0), (0, 0)))
    xu2 = xu.reshape(Bp, L * E)    # lane-dense view for the gate matmul (free)
    xi2 = xi.reshape(Bp, L * E)

    wu_big, clp, cgp = _pack_conv_weights(p_user)
    wi_big, _, _ = _pack_conv_weights(p_item)
    gu_w = _pack_gate_weights(p_user, L)
    gi_w = _pack_gate_weights(p_item, L)
    w1t = p_fc["w_fc1"].T.astype(jnp.bfloat16)    # (F, H)
    w2t = p_fc["w_fc2"].T.astype(jnp.bfloat16)    # (H, O)

    args = (xu, xu2, xi, xi2,
            wu_big, gu_w, p_user["b_la"], p_user["b_ga"], p_user["b_lc"],
            p_user["b_g2"], p_user["b_g3"], p_user["b_g4"],
            wi_big, gi_w, p_item["b_la"], p_item["b_ga"], p_item["b_lc"],
            p_item["b_g2"], p_item["b_g3"], p_item["b_g4"],
            w1t, p_fc["b_fc1"], w2t, p_fc["b_fc2"])

    smem_spec = pl.BlockSpec(memory_space=pltpu.MemorySpace.SMEM)
    x3_spec = pl.BlockSpec((Bt, L, E), lambda b: (b, 0, 0))
    x2_spec = pl.BlockSpec((Bt, L * E), lambda b: (b, 0))

    in_specs = [
        x3_spec, x2_spec, x3_spec, x2_spec,
        # user tower params
        _full_spec(wu_big.shape), _full_spec(gu_w.shape),
        smem_spec, smem_spec,
        _full_spec(p_user["b_lc"].shape),
        _full_spec(p_user["b_g2"].shape), _full_spec(p_user["b_g3"].shape),
        _full_spec(p_user["b_g4"].shape),
        # item tower params
        _full_spec(wi_big.shape), _full_spec(gi_w.shape),
        smem_spec, smem_spec,
        _full_spec(p_item["b_lc"].shape),
        _full_spec(p_item["b_g2"].shape), _full_spec(p_item["b_g3"].shape),
        _full_spec(p_item["b_g4"].shape),
        # shared FC head
        _full_spec(w1t.shape), _full_spec(p_fc["b_fc1"].shape),
        _full_spec(w2t.shape), _full_spec(p_fc["b_fc2"].shape),
    ]

    kernel = functools.partial(_fused_kernel, c_local, c_global, clp, cgp)
    out = pl.pallas_call(
        kernel,
        out_shape=jax.ShapeDtypeStruct((Bp, 128), jnp.float32),
        grid=(nb,),
        in_specs=in_specs,
        out_specs=pl.BlockSpec((Bt, 128), lambda b: (b, 0)),
        compiler_params=pltpu.CompilerParams(
            dimension_semantics=("parallel",)),
    )(*args)
    return out[:B, 0]


# ----------------------------------------------------------------------------
# Pure-JAX f32 reference (same math) for validation.
# ----------------------------------------------------------------------------
def _ref_features(x, p):
    B, L, E = x.shape
    win = p["w_la"].shape[0]
    pad = (win - 1) // 2
    xpad = jnp.pad(x, ((0, 0), (pad, pad), (0, 0)))
    score = jnp.zeros((B, L))
    for j in range(win):
        score = score + jnp.einsum("ble,e->bl", xpad[:, j:j + L, :], p["w_la"][j])
    score = jax.nn.sigmoid(score + p["b_la"][0, 0])[..., None]
    out_l = x * score
    y = jnp.tanh(jnp.einsum("ble,ce->blc", out_l, p["w_lc"]) + p["b_lc"][0])
    feat_l = jnp.max(y, axis=1)

    g = jax.nn.sigmoid(jnp.einsum("ble,le->b", x, p["w_ga"]) + p["b_ga"][0, 0])
    xg = x * g[:, None, None]

    def branch(w, b, k):
        l_out = L - k + 1
        acc = jnp.zeros((B, l_out, w.shape[0]))
        for j in range(k):
            acc = acc + jnp.einsum("ble,ce->blc", xg[:, j:j + l_out, :], w[:, j, :])
        return jnp.max(jnp.tanh(acc + b[0]), axis=1)

    f1 = branch(p["w_g2"], p["b_g2"], 2)
    f2 = branch(p["w_g3"], p["b_g3"], 3)
    f3 = branch(p["w_g4"], p["b_g4"], 4)
    return jnp.concatenate([feat_l, f1, f2, f3], axis=1)


def _ref_forward(x_user, x_item, p_user, p_item, p_fc):
    def fc(f):
        h = jax.nn.relu(f @ p_fc["w_fc1"].T + p_fc["b_fc1"][0])
        return h @ p_fc["w_fc2"].T + p_fc["b_fc2"][0]

    fu = _ref_features(x_user, p_user)
    fi = _ref_features(x_item, p_item)
    return jnp.sum(fc(fu) * fc(fi), axis=1)


# ----------------------------------------------------------------------------
if __name__ == "__main__":
    # Small shapes consistent with the module's forward.
    B, L, E = 4, 8, 32            # batch, input_size, embed_size
    WIN = 5                       # win_size
    C_LOCAL, C_GLOBAL = 16, 8     # channels_local, channels_global
    F = C_LOCAL + 3 * C_GLOBAL    # fc_input_size = 40
    H, O = 32, 16                 # hidden_size, output_size

    key = jax.random.PRNGKey(0)

    def make_attn_params(k):
        ks = jax.random.split(k, 12)
        s = 0.1
        return dict(
            w_la=s * jax.random.normal(ks[0], (WIN, E), jnp.float32),
            b_la=s * jax.random.normal(ks[1], (1, 1), jnp.float32),
            w_lc=s * jax.random.normal(ks[2], (C_LOCAL, E), jnp.float32),
            b_lc=s * jax.random.normal(ks[3], (1, C_LOCAL), jnp.float32),
            w_ga=s * jax.random.normal(ks[4], (L, E), jnp.float32),
            b_ga=s * jax.random.normal(ks[5], (1, 1), jnp.float32),
            w_g2=s * jax.random.normal(ks[6], (C_GLOBAL, 2, E), jnp.float32),
            b_g2=s * jax.random.normal(ks[7], (1, C_GLOBAL), jnp.float32),
            w_g3=s * jax.random.normal(ks[8], (C_GLOBAL, 3, E), jnp.float32),
            b_g3=s * jax.random.normal(ks[9], (1, C_GLOBAL), jnp.float32),
            w_g4=s * jax.random.normal(ks[10], (C_GLOBAL, 4, E), jnp.float32),
            b_g4=s * jax.random.normal(ks[11], (1, C_GLOBAL), jnp.float32),
        )

    k_user, k_item, k_fc, k_xu, k_xi = jax.random.split(key, 5)
    p_user = make_attn_params(k_user)
    p_item = make_attn_params(k_item)
    kf = jax.random.split(k_fc, 4)
    p_fc = dict(
        w_fc1=0.1 * jax.random.normal(kf[0], (H, F), jnp.float32),
        b_fc1=0.1 * jax.random.normal(kf[1], (1, H), jnp.float32),
        w_fc2=0.1 * jax.random.normal(kf[2], (O, H), jnp.float32),
        b_fc2=0.1 * jax.random.normal(kf[3], (1, O), jnp.float32),
    )

    x_user = jax.random.normal(k_xu, (B, L, E), jnp.float32)
    x_item = jax.random.normal(k_xi, (B, L, E), jnp.float32)

    out = cnndlga_forward(x_user, x_item, p_user, p_item, p_fc)
    out = jax.block_until_ready(out)

    ref = _ref_forward(x_user, x_item, p_user, p_item, p_fc)
    ref = jax.block_until_ready(ref)

    assert out.shape == (B,), out.shape
    # bf16 matmul inputs (per perf review) vs. f32 reference -> looser tolerance.
    assert jnp.allclose(out, ref, rtol=5e-2, atol=5e-2), (out, ref)
    print("KERNEL_OK")
</pallas_src>

<mosaic_0001>
module attributes {stable_mosaic.version = 11 : i64} {
  func.func @_fused_kernel(%arg0: i32, %arg1: memref<16x8x32xbf16, #tpu.memory_space<vmem>>, %arg2: memref<16x256xbf16, #tpu.memory_space<vmem>>, %arg3: memref<16x8x32xbf16, #tpu.memory_space<vmem>>, %arg4: memref<16x256xbf16, #tpu.memory_space<vmem>>, %arg5: memref<32x128xbf16, #tpu.memory_space<vmem>>, %arg6: memref<256x16xbf16, #tpu.memory_space<vmem>>, %arg7: memref<1x1xf32, #tpu.memory_space<smem>>, %arg8: memref<1x1xf32, #tpu.memory_space<smem>>, %arg9: memref<1x16xf32, #tpu.memory_space<vmem>>, %arg10: memref<1x8xf32, #tpu.memory_space<vmem>>, %arg11: memref<1x8xf32, #tpu.memory_space<vmem>>, %arg12: memref<1x8xf32, #tpu.memory_space<vmem>>, %arg13: memref<32x128xbf16, #tpu.memory_space<vmem>>, %arg14: memref<256x16xbf16, #tpu.memory_space<vmem>>, %arg15: memref<1x1xf32, #tpu.memory_space<smem>>, %arg16: memref<1x1xf32, #tpu.memory_space<smem>>, %arg17: memref<1x16xf32, #tpu.memory_space<vmem>>, %arg18: memref<1x8xf32, #tpu.memory_space<vmem>>, %arg19: memref<1x8xf32, #tpu.memory_space<vmem>>, %arg20: memref<1x8xf32, #tpu.memory_space<vmem>>, %arg21: memref<40x32xbf16, #tpu.memory_space<vmem>>, %arg22: memref<1x32xf32, #tpu.memory_space<vmem>>, %arg23: memref<32x16xbf16, #tpu.memory_space<vmem>>, %arg24: memref<1x16xf32, #tpu.memory_space<vmem>>, %arg25: memref<16x128xf32, #tpu.memory_space<vmem>>) attributes {dimension_semantics = [#tpu.dimension_semantics<parallel>], iteration_bounds = array<i64: 1>, scalar_prefetch = 0 : i64, scratch_operands = 0 : i64, tpu.core_type = #tpu.core_type<tc>, window_params = [{transform_indices = @transform_0, window_bounds = array<i64: 16, 8, 32>}, {transform_indices = @transform_1, window_bounds = array<i64: 16, 256>}, {transform_indices = @transform_2, window_bounds = array<i64: 16, 8, 32>}, {transform_indices = @transform_3, window_bounds = array<i64: 16, 256>}, {pipeline_mode = #tpu.pipeline_mode<synchronous>, transform_indices = @transform_4, window_bounds = array<i64: 32, 128>}, {pipeline_mode = #tpu.pipeline_mode<synchronous>, transform_indices = @transform_5, window_bounds = array<i64: 256, 16>}, {transform_indices = @transform_6, window_bounds = array<i64: 1, 1>}, {transform_indices = @transform_7, window_bounds = array<i64: 1, 1>}, {pipeline_mode = #tpu.pipeline_mode<synchronous>, transform_indices = @transform_8, window_bounds = array<i64: 1, 16>}, {pipeline_mode = #tpu.pipeline_mode<synchronous>, transform_indices = @transform_9, window_bounds = array<i64: 1, 8>}, {pipeline_mode = #tpu.pipeline_mode<synchronous>, transform_indices = @transform_10, window_bounds = array<i64: 1, 8>}, {pipeline_mode = #tpu.pipeline_mode<synchronous>, transform_indices = @transform_11, window_bounds = array<i64: 1, 8>}, {pipeline_mode = #tpu.pipeline_mode<synchronous>, transform_indices = @transform_12, window_bounds = array<i64: 32, 128>}, {pipeline_mode = #tpu.pipeline_mode<synchronous>, transform_indices = @transform_13, window_bounds = array<i64: 256, 16>}, {transform_indices = @transform_14, window_bounds = array<i64: 1, 1>}, {transform_indices = @transform_15, window_bounds = array<i64: 1, 1>}, {pipeline_mode = #tpu.pipeline_mode<synchronous>, transform_indices = @transform_16, window_bounds = array<i64: 1, 16>}, {pipeline_mode = #tpu.pipeline_mode<synchronous>, transform_indices = @transform_17, window_bounds = array<i64: 1, 8>}, {pipeline_mode = #tpu.pipeline_mode<synchronous>, transform_indices = @transform_18, window_bounds = array<i64: 1, 8>}, {pipeline_mode = #tpu.pipeline_mode<synchronous>, transform_indices = @transform_19, window_bounds = array<i64: 1, 8>}, {pipeline_mode = #tpu.pipeline_mode<synchronous>, transform_indices = @transform_20, window_bounds = array<i64: 40, 32>}, {pipeline_mode = #tpu.pipeline_mode<synchronous>, transform_indices = @transform_21, window_bounds = array<i64: 1, 32>}, {pipeline_mode = #tpu.pipeline_mode<synchronous>, transform_indices = @transform_22, window_bounds = array<i64: 32, 16>}, {pipeline_mode = #tpu.pipeline_mode<synchronous>, transform_indices = @transform_23, window_bounds = array<i64: 1, 16>}, {transform_indices = @transform_24, window_bounds = array<i64: 16, 128>}]} {
    %c0 = arith.constant 0 : index
    %c0_0 = arith.constant 0 : index
    %0 = memref.load %arg7[%c0, %c0_0] : memref<1x1xf32, #tpu.memory_space<smem>>
    %c0_1 = arith.constant 0 : index
    %c0_2 = arith.constant 0 : index
    %1 = memref.load %arg8[%c0_1, %c0_2] : memref<1x1xf32, #tpu.memory_space<smem>>
    %c0_3 = arith.constant 0 : index
    %c0_4 = arith.constant 0 : index
    %c0_5 = arith.constant 0 : index
    %2 = vector.load %arg1[%c0_3, %c0_4, %c0_5] : memref<16x8x32xbf16, #tpu.memory_space<vmem>>, vector<16x8x32xbf16>
    %c0_6 = arith.constant 0 : index
    %c0_7 = arith.constant 0 : index
    %3 = vector.load %arg2[%c0_6, %c0_7] : memref<16x256xbf16, #tpu.memory_space<vmem>>, vector<16x256xbf16>
    %c0_8 = arith.constant 0 : index
    %c0_9 = arith.constant 0 : index
    %4 = vector.load %arg6[%c0_8, %c0_9] : memref<256x16xbf16, #tpu.memory_space<vmem>>, vector<256x16xbf16>
    %cst = arith.constant dense<0.000000e+00> : vector<16x16xf32>
    %5 = tpu.matmul %3, %4, %cst {dimension_numbers = #tpu.dot_dimension_numbers<[1], [0], [0], [1], [0, 0, 1, 1], [], []>} : vector<16x256xbf16>, vector<256x16xbf16>, vector<16x16xf32> -> vector<16x16xf32>
    %6 = vector.extract_strided_slice %5 {offsets = [0, 0], sizes = [16, 8], strides = [1, 1]} : vector<16x16xf32> to vector<16x8xf32>
    %7 = vector.broadcast %0 : f32 to vector<16x8xf32>
    %8 = arith.addf %6, %7 : vector<16x8xf32>
    %9 = arith.negf %8 : vector<16x8xf32>
    %10 = math.exp %9 : vector<16x8xf32>
    %cst_10 = arith.constant 1.000000e+00 : f32
    %11 = vector.broadcast %cst_10 : f32 to vector<16x8xf32>
    %12 = arith.addf %11, %10 : vector<16x8xf32>
    %13 = arith.divf %11, %12 : vector<16x8xf32>
    %14 = vector.extract_strided_slice %5 {offsets = [0, 8], sizes = [16, 1], strides = [1, 1]} : vector<16x16xf32> to vector<16x1xf32>
    %15 = vector.broadcast %1 : f32 to vector<16x1xf32>
    %16 = arith.addf %14, %15 : vector<16x1xf32>
    %17 = arith.negf %16 : vector<16x1xf32>
    %18 = math.exp %17 : vector<16x1xf32>
    %cst_11 = arith.constant 1.000000e+00 : f32
    %19 = vector.broadcast %cst_11 : f32 to vector<16x1xf32>
    %20 = arith.addf %19, %18 : vector<16x1xf32>
    %21 = arith.divf %19, %20 : vector<16x1xf32>
    %22 = vector.shape_cast %2 : vector<16x8x32xbf16> to vector<128x32xbf16>
    %c0_12 = arith.constant 0 : index
    %c0_13 = arith.constant 0 : index
    %23 = vector.load %arg5[%c0_12, %c0_13] : memref<32x128xbf16, #tpu.memory_space<vmem>>, vector<32x128xbf16>
    %cst_14 = arith.constant dense<0.000000e+00> : vector<128x128xf32>
    %24 = tpu.matmul %22, %23, %cst_14 {dimension_numbers = #tpu.dot_dimension_numbers<[1], [0], [0], [1], [0, 0, 1, 1], [], []>} : vector<128x32xbf16>, vector<32x128xbf16>, vector<128x128xf32> -> vector<128x128xf32>
    %25 = vector.shape_cast %24 : vector<128x128xf32> to vector<16x8x128xf32>
    %26 = vector.shape_cast %13 : vector<16x8xf32> to vector<16x8x1xf32>
    %27 = vector.extract_strided_slice %25 {offsets = [0, 0, 0], sizes = [16, 8, 16], strides = [1, 1, 1]} : vector<16x8x128xf32> to vector<16x8x16xf32>
    %28 = vector.broadcast %26 : vector<16x8x1xf32> to vector<16x8x16xf32>
    %29 = arith.mulf %28, %27 : vector<16x8x16xf32>
    %c0_15 = arith.constant 0 : index
    %c0_16 = arith.constant 0 : index
    %30 = vector.load %arg9[%c0_15, %c0_16] : memref<1x16xf32, #tpu.memory_space<vmem>>, vector<1x16xf32>
    %31 = vector.shape_cast %30 : vector<1x16xf32> to vector<1x1x16xf32>
    %32 = vector.broadcast %31 : vector<1x1x16xf32> to vector<16x8x16xf32>
    %33 = arith.addf %29, %32 : vector<16x8x16xf32>
    %34 = math.tanh %33 : vector<16x8x16xf32>
    %cst_17 = arith.constant dense<0xFF800000> : vector<16x16xf32>
    %35 = vector.multi_reduction <maximumf>, %34, %cst_17 [1] : vector<16x8x16xf32> to vector<16x16xf32>
    %36 = vector.extract_strided_slice %25 {offsets = [0, 0, 16], sizes = [16, 7, 8], strides = [1, 1, 1]} : vector<16x8x128xf32> to vector<16x7x8xf32>
    %37 = vector.extract_strided_slice %25 {offsets = [0, 1, 24], sizes = [16, 7, 8], strides = [1, 1, 1]} : vector<16x8x128xf32> to vector<16x7x8xf32>
    %38 = arith.addf %36, %37 : vector<16x7x8xf32>
    %cst_18 = arith.constant dense<0xFF800000> : vector<16x8xf32>
    %39 = vector.multi_reduction <maximumf>, %38, %cst_18 [1] : vector<16x7x8xf32> to vector<16x8xf32>
    %40 = vector.broadcast %21 : vector<16x1xf32> to vector<16x8xf32>
    %41 = arith.mulf %40, %39 : vector<16x8xf32>
    %c0_19 = arith.constant 0 : index
    %c0_20 = arith.constant 0 : index
    %42 = vector.load %arg10[%c0_19, %c0_20] : memref<1x8xf32, #tpu.memory_space<vmem>>, vector<1x8xf32>
    %43 = vector.broadcast %42 : vector<1x8xf32> to vector<16x8xf32>
    %44 = arith.addf %41, %43 : vector<16x8xf32>
    %45 = math.tanh %44 : vector<16x8xf32>
    %46 = vector.extract_strided_slice %25 {offsets = [0, 0, 32], sizes = [16, 6, 8], strides = [1, 1, 1]} : vector<16x8x128xf32> to vector<16x6x8xf32>
    %47 = vector.extract_strided_slice %25 {offsets = [0, 1, 40], sizes = [16, 6, 8], strides = [1, 1, 1]} : vector<16x8x128xf32> to vector<16x6x8xf32>
    %48 = arith.addf %46, %47 : vector<16x6x8xf32>
    %49 = vector.extract_strided_slice %25 {offsets = [0, 2, 48], sizes = [16, 6, 8], strides = [1, 1, 1]} : vector<16x8x128xf32> to vector<16x6x8xf32>
    %50 = arith.addf %48, %49 : vector<16x6x8xf32>
    %cst_21 = arith.constant dense<0xFF800000> : vector<16x8xf32>
    %51 = vector.multi_reduction <maximumf>, %50, %cst_21 [1] : vector<16x6x8xf32> to vector<16x8xf32>
    %52 = vector.broadcast %21 : vector<16x1xf32> to vector<16x8xf32>
    %53 = arith.mulf %52, %51 : vector<16x8xf32>
    %c0_22 = arith.constant 0 : index
    %c0_23 = arith.constant 0 : index
    %54 = vector.load %arg11[%c0_22, %c0_23] : memref<1x8xf32, #tpu.memory_space<vmem>>, vector<1x8xf32>
    %55 = vector.broadcast %54 : vector<1x8xf32> to vector<16x8xf32>
    %56 = arith.addf %53, %55 : vector<16x8xf32>
    %57 = math.tanh %56 : vector<16x8xf32>
    %58 = vector.extract_strided_slice %25 {offsets = [0, 0, 56], sizes = [16, 5, 8], strides = [1, 1, 1]} : vector<16x8x128xf32> to vector<16x5x8xf32>
    %59 = vector.extract_strided_slice %25 {offsets = [0, 1, 64], sizes = [16, 5, 8], strides = [1, 1, 1]} : vector<16x8x128xf32> to vector<16x5x8xf32>
    %60 = arith.addf %58, %59 : vector<16x5x8xf32>
    %61 = vector.extract_strided_slice %25 {offsets = [0, 2, 72], sizes = [16, 5, 8], strides = [1, 1, 1]} : vector<16x8x128xf32> to vector<16x5x8xf32>
    %62 = arith.addf %60, %61 : vector<16x5x8xf32>
    %63 = vector.extract_strided_slice %25 {offsets = [0, 3, 80], sizes = [16, 5, 8], strides = [1, 1, 1]} : vector<16x8x128xf32> to vector<16x5x8xf32>
    %64 = arith.addf %62, %63 : vector<16x5x8xf32>
    %cst_24 = arith.constant dense<0xFF800000> : vector<16x8xf32>
    %65 = vector.multi_reduction <maximumf>, %64, %cst_24 [1] : vector<16x5x8xf32> to vector<16x8xf32>
    %66 = vector.broadcast %21 : vector<16x1xf32> to vector<16x8xf32>
    %67 = arith.mulf %66, %65 : vector<16x8xf32>
    %c0_25 = arith.constant 0 : index
    %c0_26 = arith.constant 0 : index
    %68 = vector.load %arg12[%c0_25, %c0_26] : memref<1x8xf32, #tpu.memory_space<vmem>>, vector<1x8xf32>
    %69 = vector.broadcast %68 : vector<1x8xf32> to vector<16x8xf32>
    %70 = arith.addf %67, %69 : vector<16x8xf32>
    %71 = math.tanh %70 : vector<16x8xf32>
    %72 = tpu.concatenate %35, %45, %57, %71 in 1 : vector<16x16xf32>, vector<16x8xf32>, vector<16x8xf32>, vector<16x8xf32> -> vector<16x40xf32>
    %c0_27 = arith.constant 0 : index
    %c0_28 = arith.constant 0 : index
    %73 = memref.load %arg15[%c0_27, %c0_28] : memref<1x1xf32, #tpu.memory_space<smem>>
    %c0_29 = arith.constant 0 : index
    %c0_30 = arith.constant 0 : index
    %74 = memref.load %arg16[%c0_29, %c0_30] : memref<1x1xf32, #tpu.memory_space<smem>>
    %c0_31 = arith.constant 0 : index
    %c0_32 = arith.constant 0 : index
    %c0_33 = arith.constant 0 : index
    %75 = vector.load %arg3[%c0_31, %c0_32, %c0_33] : memref<16x8x32xbf16, #tpu.memory_space<vmem>>, vector<16x8x32xbf16>
    %c0_34 = arith.constant 0 : index
    %c0_35 = arith.constant 0 : index
    %76 = vector.load %arg4[%c0_34, %c0_35] : memref<16x256xbf16, #tpu.memory_space<vmem>>, vector<16x256xbf16>
    %c0_36 = arith.constant 0 : index
    %c0_37 = arith.constant 0 : index
    %77 = vector.load %arg14[%c0_36, %c0_37] : memref<256x16xbf16, #tpu.memory_space<vmem>>, vector<256x16xbf16>
    %cst_38 = arith.constant dense<0.000000e+00> : vector<16x16xf32>
    %78 = tpu.matmul %76, %77, %cst_38 {dimension_numbers = #tpu.dot_dimension_numbers<[1], [0], [0], [1], [0, 0, 1, 1], [], []>} : vector<16x256xbf16>, vector<256x16xbf16>, vector<16x16xf32> -> vector<16x16xf32>
    %79 = vector.extract_strided_slice %78 {offsets = [0, 0], sizes = [16, 8], strides = [1, 1]} : vector<16x16xf32> to vector<16x8xf32>
    %80 = vector.broadcast %73 : f32 to vector<16x8xf32>
    %81 = arith.addf %79, %80 : vector<16x8xf32>
    %82 = arith.negf %81 : vector<16x8xf32>
    %83 = math.exp %82 : vector<16x8xf32>
    %cst_39 = arith.constant 1.000000e+00 : f32
    %84 = vector.broadcast %cst_39 : f32 to vector<16x8xf32>
    %85 = arith.addf %84, %83 : vector<16x8xf32>
    %86 = arith.divf %84, %85 : vector<16x8xf32>
    %87 = vector.extract_strided_slice %78 {offsets = [0, 8], sizes = [16, 1], strides = [1, 1]} : vector<16x16xf32> to vector<16x1xf32>
    %88 = vector.broadcast %74 : f32 to vector<16x1xf32>
    %89 = arith.addf %87, %88 : vector<16x1xf32>
    %90 = arith.negf %89 : vector<16x1xf32>
    %91 = math.exp %90 : vector<16x1xf32>
    %cst_40 = arith.constant 1.000000e+00 : f32
    %92 = vector.broadcast %cst_40 : f32 to vector<16x1xf32>
    %93 = arith.addf %92, %91 : vector<16x1xf32>
    %94 = arith.divf %92, %93 : vector<16x1xf32>
    %95 = vector.shape_cast %75 : vector<16x8x32xbf16> to vector<128x32xbf16>
    %c0_41 = arith.constant 0 : index
    %c0_42 = arith.constant 0 : index
    %96 = vector.load %arg13[%c0_41, %c0_42] : memref<32x128xbf16, #tpu.memory_space<vmem>>, vector<32x128xbf16>
    %cst_43 = arith.constant dense<0.000000e+00> : vector<128x128xf32>
    %97 = tpu.matmul %95, %96, %cst_43 {dimension_numbers = #tpu.dot_dimension_numbers<[1], [0], [0], [1], [0, 0, 1, 1], [], []>} : vector<128x32xbf16>, vector<32x128xbf16>, vector<128x128xf32> -> vector<128x128xf32>
    %98 = vector.shape_cast %97 : vector<128x128xf32> to vector<16x8x128xf32>
    %99 = vector.shape_cast %86 : vector<16x8xf32> to vector<16x8x1xf32>
    %100 = vector.extract_strided_slice %98 {offsets = [0, 0, 0], sizes = [16, 8, 16], strides = [1, 1, 1]} : vector<16x8x128xf32> to vector<16x8x16xf32>
    %101 = vector.broadcast %99 : vector<16x8x1xf32> to vector<16x8x16xf32>
    %102 = arith.mulf %101, %100 : vector<16x8x16xf32>
    %c0_44 = arith.constant 0 : index
    %c0_45 = arith.constant 0 : index
    %103 = vector.load %arg17[%c0_44, %c0_45] : memref<1x16xf32, #tpu.memory_space<vmem>>, vector<1x16xf32>
    %104 = vector.shape_cast %103 : vector<1x16xf32> to vector<1x1x16xf32>
    %105 = vector.broadcast %104 : vector<1x1x16xf32> to vector<16x8x16xf32>
    %106 = arith.addf %102, %105 : vector<16x8x16xf32>
    %107 = math.tanh %106 : vector<16x8x16xf32>
    %cst_46 = arith.constant dense<0xFF800000> : vector<16x16xf32>
    %108 = vector.multi_reduction <maximumf>, %107, %cst_46 [1] : vector<16x8x16xf32> to vector<16x16xf32>
    %109 = vector.extract_strided_slice %98 {offsets = [0, 0, 16], sizes = [16, 7, 8], strides = [1, 1, 1]} : vector<16x8x128xf32> to vector<16x7x8xf32>
    %110 = vector.extract_strided_slice %98 {offsets = [0, 1, 24], sizes = [16, 7, 8], strides = [1, 1, 1]} : vector<16x8x128xf32> to vector<16x7x8xf32>
    %111 = arith.addf %109, %110 : vector<16x7x8xf32>
    %cst_47 = arith.constant dense<0xFF800000> : vector<16x8xf32>
    %112 = vector.multi_reduction <maximumf>, %111, %cst_47 [1] : vector<16x7x8xf32> to vector<16x8xf32>
    %113 = vector.broadcast %94 : vector<16x1xf32> to vector<16x8xf32>
    %114 = arith.mulf %113, %112 : vector<16x8xf32>
    %c0_48 = arith.constant 0 : index
    %c0_49 = arith.constant 0 : index
    %115 = vector.load %arg18[%c0_48, %c0_49] : memref<1x8xf32, #tpu.memory_space<vmem>>, vector<1x8xf32>
    %116 = vector.broadcast %115 : vector<1x8xf32> to vector<16x8xf32>
    %117 = arith.addf %114, %116 : vector<16x8xf32>
    %118 = math.tanh %117 : vector<16x8xf32>
    %119 = vector.extract_strided_slice %98 {offsets = [0, 0, 32], sizes = [16, 6, 8], strides = [1, 1, 1]} : vector<16x8x128xf32> to vector<16x6x8xf32>
    %120 = vector.extract_strided_slice %98 {offsets = [0, 1, 40], sizes = [16, 6, 8], strides = [1, 1, 1]} : vector<16x8x128xf32> to vector<16x6x8xf32>
    %121 = arith.addf %119, %120 : vector<16x6x8xf32>
    %122 = vector.extract_strided_slice %98 {offsets = [0, 2, 48], sizes = [16, 6, 8], strides = [1, 1, 1]} : vector<16x8x128xf32> to vector<16x6x8xf32>
    %123 = arith.addf %121, %122 : vector<16x6x8xf32>
    %cst_50 = arith.constant dense<0xFF800000> : vector<16x8xf32>
    %124 = vector.multi_reduction <maximumf>, %123, %cst_50 [1] : vector<16x6x8xf32> to vector<16x8xf32>
    %125 = vector.broadcast %94 : vector<16x1xf32> to vector<16x8xf32>
    %126 = arith.mulf %125, %124 : vector<16x8xf32>
    %c0_51 = arith.constant 0 : index
    %c0_52 = arith.constant 0 : index
    %127 = vector.load %arg19[%c0_51, %c0_52] : memref<1x8xf32, #tpu.memory_space<vmem>>, vector<1x8xf32>
    %128 = vector.broadcast %127 : vector<1x8xf32> to vector<16x8xf32>
    %129 = arith.addf %126, %128 : vector<16x8xf32>
    %130 = math.tanh %129 : vector<16x8xf32>
    %131 = vector.extract_strided_slice %98 {offsets = [0, 0, 56], sizes = [16, 5, 8], strides = [1, 1, 1]} : vector<16x8x128xf32> to vector<16x5x8xf32>
    %132 = vector.extract_strided_slice %98 {offsets = [0, 1, 64], sizes = [16, 5, 8], strides = [1, 1, 1]} : vector<16x8x128xf32> to vector<16x5x8xf32>
    %133 = arith.addf %131, %132 : vector<16x5x8xf32>
    %134 = vector.extract_strided_slice %98 {offsets = [0, 2, 72], sizes = [16, 5, 8], strides = [1, 1, 1]} : vector<16x8x128xf32> to vector<16x5x8xf32>
    %135 = arith.addf %133, %134 : vector<16x5x8xf32>
    %136 = vector.extract_strided_slice %98 {offsets = [0, 3, 80], sizes = [16, 5, 8], strides = [1, 1, 1]} : vector<16x8x128xf32> to vector<16x5x8xf32>
    %137 = arith.addf %135, %136 : vector<16x5x8xf32>
    %cst_53 = arith.constant dense<0xFF800000> : vector<16x8xf32>
    %138 = vector.multi_reduction <maximumf>, %137, %cst_53 [1] : vector<16x5x8xf32> to vector<16x8xf32>
    %139 = vector.broadcast %94 : vector<16x1xf32> to vector<16x8xf32>
    %140 = arith.mulf %139, %138 : vector<16x8xf32>
    %c0_54 = arith.constant 0 : index
    %c0_55 = arith.constant 0 : index
    %141 = vector.load %arg20[%c0_54, %c0_55] : memref<1x8xf32, #tpu.memory_space<vmem>>, vector<1x8xf32>
    %142 = vector.broadcast %141 : vector<1x8xf32> to vector<16x8xf32>
    %143 = arith.addf %140, %142 : vector<16x8xf32>
    %144 = math.tanh %143 : vector<16x8xf32>
    %145 = tpu.concatenate %108, %118, %130, %144 in 1 : vector<16x16xf32>, vector<16x8xf32>, vector<16x8xf32>, vector<16x8xf32> -> vector<16x40xf32>
    %146 = tpu.concatenate %72, %145 in 0 : vector<16x40xf32>, vector<16x40xf32> -> vector<32x40xf32>
    %147 = arith.truncf %146 : vector<32x40xf32> to vector<32x40xbf16>
    %c0_56 = arith.constant 0 : index
    %c0_57 = arith.constant 0 : index
    %148 = vector.load %arg21[%c0_56, %c0_57] : memref<40x32xbf16, #tpu.memory_space<vmem>>, vector<40x32xbf16>
    %cst_58 = arith.constant dense<0.000000e+00> : vector<32x32xf32>
    %149 = tpu.matmul %147, %148, %cst_58 {dimension_numbers = #tpu.dot_dimension_numbers<[1], [0], [0], [1], [0, 0, 1, 1], [], []>} : vector<32x40xbf16>, vector<40x32xbf16>, vector<32x32xf32> -> vector<32x32xf32>
    %c0_59 = arith.constant 0 : index
    %c0_60 = arith.constant 0 : index
    %150 = vector.load %arg22[%c0_59, %c0_60] : memref<1x32xf32, #tpu.memory_space<vmem>>, vector<1x32xf32>
    %151 = vector.broadcast %150 : vector<1x32xf32> to vector<32x32xf32>
    %152 = arith.addf %149, %151 : vector<32x32xf32>
    %cst_61 = arith.constant 0.000000e+00 : f32
    %153 = vector.broadcast %cst_61 : f32 to vector<32x32xf32>
    %154 = arith.maximumf %152, %153 : vector<32x32xf32>
    %155 = arith.truncf %154 : vector<32x32xf32> to vector<32x32xbf16>
    %c0_62 = arith.constant 0 : index
    %c0_63 = arith.constant 0 : index
    %156 = vector.load %arg23[%c0_62, %c0_63] : memref<32x16xbf16, #tpu.memory_space<vmem>>, vector<32x16xbf16>
    %cst_64 = arith.constant dense<0.000000e+00> : vector<32x16xf32>
    %157 = tpu.matmul %155, %156, %cst_64 {dimension_numbers = #tpu.dot_dimension_numbers<[1], [0], [0], [1], [0, 0, 1, 1], [], []>} : vector<32x32xbf16>, vector<32x16xbf16>, vector<32x16xf32> -> vector<32x16xf32>
    %c0_65 = arith.constant 0 : index
    %c0_66 = arith.constant 0 : index
    %158 = vector.load %arg24[%c0_65, %c0_66] : memref<1x16xf32, #tpu.memory_space<vmem>>, vector<1x16xf32>
    %159 = vector.broadcast %158 : vector<1x16xf32> to vector<32x16xf32>
    %160 = arith.addf %157, %159 : vector<32x16xf32>
    %161 = vector.extract_strided_slice %160 {offsets = [0, 0], sizes = [16, 16], strides = [1, 1]} : vector<32x16xf32> to vector<16x16xf32>
    %162 = vector.extract_strided_slice %160 {offsets = [16, 0], sizes = [16, 16], strides = [1, 1]} : vector<32x16xf32> to vector<16x16xf32>
    %163 = arith.mulf %161, %162 : vector<16x16xf32>
    %cst_67 = arith.constant dense<0.000000e+00> : vector<16xf32>
    %164 = vector.multi_reduction <add>, %163, %cst_67 [1] : vector<16x16xf32> to vector<16xf32>
    %165 = vector.shape_cast %164 : vector<16xf32> to vector<16x1xf32>
    %166 = vector.shape_cast %165 : vector<16x1xf32> to vector<16x1xf32>
    %167 = vector.broadcast %166 : vector<16x1xf32> to vector<16x128xf32>
    %c0_68 = arith.constant 0 : index
    %c0_69 = arith.constant 0 : index
    %168 = vector.load %arg25[%c0_68, %c0_69] : memref<16x128xf32, #tpu.memory_space<vmem>>, vector<16x128xf32>
    tpu.vector_store %arg25[%c0_68, %c0_69], %167 {strides = array<i32>} : memref<16x128xf32, #tpu.memory_space<vmem>>, vector<16x128xf32>,
    return
  }
  func.func @transform_0(%arg0: i32) -> (i32, i32, i32) {
    %c0_i32 = arith.constant 0 : i32
    %c0_i32_0 = arith.constant 0 : i32
    %c0_i32_1 = arith.constant 0 : i32
    return %arg0, %c0_i32, %c0_i32_0 : i32, i32, i32
  }
  func.func @transform_1(%arg0: i32) -> (i32, i32) {
    %c0_i32 = arith.constant 0 : i32
    %c0_i32_0 = arith.constant 0 : i32
    return %arg0, %c0_i32 : i32, i32
  }
  func.func @transform_2(%arg0: i32) -> (i32, i32, i32) {
    %c0_i32 = arith.constant 0 : i32
    %c0_i32_0 = arith.constant 0 : i32
    %c0_i32_1 = arith.constant 0 : i32
    return %arg0, %c0_i32, %c0_i32_0 : i32, i32, i32
  }
  func.func @transform_3(%arg0: i32) -> (i32, i32) {
    %c0_i32 = arith.constant 0 : i32
    %c0_i32_0 = arith.constant 0 : i32
    return %arg0, %c0_i32 : i32, i32
  }
  func.func @transform_4(%arg0: i32) -> (i32, i32) {
    %c0_i32 = arith.constant 0 : i32
    %c0_i32_0 = arith.constant 0 : i32
    %c0_i32_1 = arith.constant 0 : i32
    return %c0_i32, %c0_i32_0 : i32, i32
  }
  func.func @transform_5(%arg0: i32) -> (i32, i32) {
    %c0_i32 = arith.constant 0 : i32
    %c0_i32_0 = arith.constant 0 : i32
    %c0_i32_1 = arith.constant 0 : i32
    return %c0_i32, %c0_i32_0 : i32, i32
  }
  func.func @transform_6(%arg0: i32) -> (i32, i32) {
    %c0_i32 = arith.constant 0 : i32
    %c0_i32_0 = arith.constant 0 : i32
    %c0_i32_1 = arith.constant 0 : i32
    return %c0_i32, %c0_i32_0 : i32, i32
  }
  func.func @transform_7(%arg0: i32) -> (i32, i32) {
    %c0_i32 = arith.constant 0 : i32
    %c0_i32_0 = arith.constant 0 : i32
    %c0_i32_1 = arith.constant 0 : i32
    return %c0_i32, %c0_i32_0 : i32, i32
  }
  func.func @transform_8(%arg0: i32) -> (i32, i32) {
    %c0_i32 = arith.constant 0 : i32
    %c0_i32_0 = arith.constant 0 : i32
    %c0_i32_1 = arith.constant 0 : i32
    return %c0_i32, %c0_i32_0 : i32, i32
  }
  func.func @transform_9(%arg0: i32) -> (i32, i32) {
    %c0_i32 = arith.constant 0 : i32
    %c0_i32_0 = arith.constant 0 : i32
    %c0_i32_1 = arith.constant 0 : i32
    return %c0_i32, %c0_i32_0 : i32, i32
  }
  func.func @transform_10(%arg0: i32) -> (i32, i32) {
    %c0_i32 = arith.constant 0 : i32
    %c0_i32_0 = arith.constant 0 : i32
    %c0_i32_1 = arith.constant 0 : i32
    return %c0_i32, %c0_i32_0 : i32, i32
  }
  func.func @transform_11(%arg0: i32) -> (i32, i32) {
    %c0_i32 = arith.constant 0 : i32
    %c0_i32_0 = arith.constant 0 : i32
    %c0_i32_1 = arith.constant 0 : i32
    return %c0_i32, %c0_i32_0 : i32, i32
  }
  func.func @transform_12(%arg0: i32) -> (i32, i32) {
    %c0_i32 = arith.constant 0 : i32
    %c0_i32_0 = arith.constant 0 : i32
    %c0_i32_1 = arith.constant 0 : i32
    return %c0_i32, %c0_i32_0 : i32, i32
  }
  func.func @transform_13(%arg0: i32) -> (i32, i32) {
    %c0_i32 = arith.constant 0 : i32
    %c0_i32_0 = arith.constant 0 : i32
    %c0_i32_1 = arith.constant 0 : i32
    return %c0_i32, %c0_i32_0 : i32, i32
  }
  func.func @transform_14(%arg0: i32) -> (i32, i32) {
    %c0_i32 = arith.constant 0 : i32
    %c0_i32_0 = arith.constant 0 : i32
    %c0_i32_1 = arith.constant 0 : i32
    return %c0_i32, %c0_i32_0 : i32, i32
  }
  func.func @transform_15(%arg0: i32) -> (i32, i32) {
    %c0_i32 = arith.constant 0 : i32
    %c0_i32_0 = arith.constant 0 : i32
    %c0_i32_1 = arith.constant 0 : i32
    return %c0_i32, %c0_i32_0 : i32, i32
  }
  func.func @transform_16(%arg0: i32) -> (i32, i32) {
    %c0_i32 = arith.constant 0 : i32
    %c0_i32_0 = arith.constant 0 : i32
    %c0_i32_1 = arith.constant 0 : i32
    return %c0_i32, %c0_i32_0 : i32, i32
  }
  func.func @transform_17(%arg0: i32) -> (i32, i32) {
    %c0_i32 = arith.constant 0 : i32
    %c0_i32_0 = arith.constant 0 : i32
    %c0_i32_1 = arith.constant 0 : i32
    return %c0_i32, %c0_i32_0 : i32, i32
  }
  func.func @transform_18(%arg0: i32) -> (i32, i32) {
    %c0_i32 = arith.constant 0 : i32
    %c0_i32_0 = arith.constant 0 : i32
    %c0_i32_1 = arith.constant 0 : i32
    return %c0_i32, %c0_i32_0 : i32, i32
  }
  func.func @transform_19(%arg0: i32) -> (i32, i32) {
    %c0_i32 = arith.constant 0 : i32
    %c0_i32_0 = arith.constant 0 : i32
    %c0_i32_1 = arith.constant 0 : i32
    return %c0_i32, %c0_i32_0 : i32, i32
  }
  func.func @transform_20(%arg0: i32) -> (i32, i32) {
    %c0_i32 = arith.constant 0 : i32
    %c0_i32_0 = arith.constant 0 : i32
    %c0_i32_1 = arith.constant 0 : i32
    return %c0_i32, %c0_i32_0 : i32, i32
  }
  func.func @transform_21(%arg0: i32) -> (i32, i32) {
    %c0_i32 = arith.constant 0 : i32
    %c0_i32_0 = arith.constant 0 : i32
    %c0_i32_1 = arith.constant 0 : i32
    return %c0_i32, %c0_i32_0 : i32, i32
  }
  func.func @transform_22(%arg0: i32) -> (i32, i32) {
    %c0_i32 = arith.constant 0 : i32
    %c0_i32_0 = arith.constant 0 : i32
    %c0_i32_1 = arith.constant 0 : i32
    return %c0_i32, %c0_i32_0 : i32, i32
  }
  func.func @transform_23(%arg0: i32) -> (i32, i32) {
    %c0_i32 = arith.constant 0 : i32
    %c0_i32_0 = arith.constant 0 : i32
    %c0_i32_1 = arith.constant 0 : i32
    return %c0_i32, %c0_i32_0 : i32, i32
  }
  func.func @transform_24(%arg0: i32) -> (i32, i32) {
    %c0_i32 = arith.constant 0 : i32
    %c0_i32_0 = arith.constant 0 : i32
    return %arg0, %c0_i32 : i32, i32
  }
}

</mosaic_0001>

<bundles_post_ra>
// kernel: tpu_custom_call.1
= control target key start
LH: loop header
LB: loop body
LE: loop exit
PB: predicated region body
PF: predicated region fallthrough
CT: control target
= control target key end

     0   :  { %s5598_s0 = inlined_call_operand.vmem [shape: bf16[16,8,32], index: 0, kind: input, shape index: {}]   ;;  %s5599_s1 = inlined_call_operand.vmem [shape: bf16[16,256], index: 1, kind: input, shape index: {}]   ;;  %s5600_s2 = inlined_call_operand.vmem [shape: bf16[16,8,32], index: 2, kind: input, shape index: {}]   ;;  %s5601_s3 = inlined_call_operand.vmem [shape: bf16[16,256], index: 3, kind: input, shape index: {}]   ;;  %s5602_s4 = inlined_call_operand.vmem [shape: bf16[32,128], index: 4, kind: input, shape index: {}]   ;;  %s5603_s5 = inlined_call_operand.vmem [shape: bf16[256,16], index: 5, kind: input, shape index: {}]   ;;  %s5604_s6 = inlined_call_operand.<no memory space> [shape: f32[1,1], index: 6, kind: input, shape index: {}]   ;;  %s5605_s7 = inlined_call_operand.<no memory space> [shape: f32[1,1], index: 7, kind: input, shape index: {}]   ;;  %s5606_s8 = inlined_call_operand.vmem [shape: f32[1,16], index: 8, kind: input, shape index: {}]   ;;  %s5607_s9 = inlined_call_operand.vmem [shape: f32[1,8], index: 9, kind: input, shape index: {}]   ;;  %s5608_s10 = inlined_call_operand.vmem [shape: f32[1,8], index: 10, kind: input, shape index: {}]   ;;  %s5609_s11 = inlined_call_operand.vmem [shape: f32[1,8], index: 11, kind: input, shape index: {}]   ;;  %s5610_s12 = inlined_call_operand.vmem [shape: bf16[32,128], index: 12, kind: input, shape index: {}]   ;;  %s5611_s13 = inlined_call_operand.vmem [shape: bf16[256,16], index: 13, kind: input, shape index: {}]   ;;  %s5612_s14 = inlined_call_operand.<no memory space> [shape: f32[1,1], index: 14, kind: input, shape index: {}]   ;;  %s5613_s15 = inlined_call_operand.<no memory space> [shape: f32[1,1], index: 15, kind: input, shape index: {}]   ;;  %s5614_s16 = inlined_call_operand.vmem [shape: f32[1,16], index: 16, kind: input, shape index: {}]   ;;  %s5615_s17 = inlined_call_operand.vmem [shape: f32[1,8], index: 17, kind: input, shape index: {}]   ;;  %s5616_s18 = inlined_call_operand.vmem [shape: f32[1,8], index: 18, kind: input, shape index: {}]   ;;  %s5617_s19 = inlined_call_operand.vmem [shape: f32[1,8], index: 19, kind: input, shape index: {}]   ;;  %s5618_s20 = inlined_call_operand.vmem [shape: bf16[40,32], index: 20, kind: input, shape index: {}]   ;;  %s5619_s21 = inlined_call_operand.vmem [shape: f32[1,32], index: 21, kind: input, shape index: {}]   ;;  %s5620_s22 = inlined_call_operand.vmem [shape: bf16[32,16], index: 22, kind: input, shape index: {}]   ;;  %s5621_s23 = inlined_call_operand.vmem [shape: f32[1,16], index: 23, kind: input, shape index: {}]   ;;  %s5622_s24 = inlined_call_operand.hbm [shape: f32[16,128], index: 24, kind: output, shape index: {}]  }
   0x1   :  { %5697 = sst [smem:[#allocation59_spill]] %s5598_s0 }
   0x2   :  { %5698 = sst [smem:[#allocation60_spill]] %s5599_s1 }
   0x3   :  { %5699 = sst [smem:[#allocation61_spill]] %s5600_s2 }
   0x4   :  { %5700 = sst [smem:[#allocation62_spill]] %s5601_s3 }
   0x5   :  { %5701 = sst [smem:[#allocation63_spill]] %s5602_s4 }
   0x6   :  { %5702 = sst [smem:[#allocation64_spill]] %s5603_s5 }
   0x7   :  { %5703 = sst [smem:[#allocation65_spill]] %s5604_s6 }
   0x8   :  { %5704 = sst [smem:[#allocation66_spill]] %s5605_s7 }
   0x9   :  { %5705 = sst [smem:[#allocation67_spill]] %s5606_s8 }
   0xa   :  { %s5706_s27 = sld [smem:[#allocation64_spill]]  ;;  %v3494_v6 = vld [vmem:[%s5611_s13 + $0x38] sm:$0xff]  ;;  %v3493_v7 = vld [vmem:[%s5611_s13 + $0x30] sm:$0xff]  ;;  %vm5668_vm0 = vcmask 261120   ;;  %v3492_v11 = vld [vmem:[%s5611_s13 + $0x28] sm:$0xff] }
   0xb   :  { %s5707_s0 = sld [smem:[#allocation63_spill]]  ;;  %1729 = vmatpush.bf16.msra.mxu3 %v3494_v6  ;;  %v3491_v15 = vld [vmem:[%s5611_s13 + $0x20] sm:$0xff]  ;;  %v3490_v17 = vld [vmem:[%s5611_s13 + $0x18] sm:$0xff] }
   0xc   :  { %s5708_s29 = sld [smem:[#allocation59_spill]] }
   0xf   :  { %1730 = vmatpush.bf16.msra.mxu3 %v3493_v7 }
  0x10   :  { %v3466_v0 = vld [vmem:[%s5706_s27 + $0x38] sm:$0xff]  ;;  %v3465_v3 = vld [vmem:[%s5706_s27 + $0x30] sm:$0xff]  ;;  %v3464_v9 = vld [vmem:[%s5706_s27 + $0x28] sm:$0xff] }
  0x11   :  { %v3474_v1 = vld [vmem:[%s5706_s27 + $0x78] sm:$0xff]  ;;  %v3476_v2 = vld [vmem:[%s5707_s0 + $0x8] sm:$0xff]  ;;  %241 = vmatpush.bf16.msra.mxu0 %v3466_v0  ;;  %v3473_v4 = vld [vmem:[%s5706_s27 + $0x70] sm:$0xff] }
  0x12   :  { %255 = vmatpush.bf16.msra.mxu1 %v3474_v1  ;;  %438 = vmatpush.bf16.msra.mxu2 %v3476_v2  ;;  %v3475_v5 = vld [vmem:[%s5707_s0] sm:$0xff]  ;;  %v3472_v10 = vld [vmem:[%s5706_s27 + $0x68] sm:$0xff]  ;;  %v3462_v14 = vld [vmem:[%s5706_s27 + $0x18] sm:$0xff] }
  0x13   :  { %v3449_v8 = vld [vmem:[%s5708_s29] sm:$0xff]  ;;  %1731 = vmatpush.bf16.msra.mxu3 %v3492_v11  ;;  %v3470_v16 = vld [vmem:[%s5706_s27 + $0x58] sm:$0xff] }
  0x14   :  { %v3463_v12 = vld [vmem:[%s5706_s27 + $0x20] sm:$0xff] }
  0x15   :  { %242 = vmatpush.bf16.msra.mxu0 %v3465_v3  ;;  %v3471_v13 = vld [vmem:[%s5706_s27 + $0x60] sm:$0xff] }
  0x16   :  { %256 = vmatpush.bf16.msra.mxu1 %v3473_v4  ;;  %439 = vmatpush.bf16.msra.mxu2 %v3475_v5 }
  0x17   :  { %1732 = vmatpush.bf16.msra.mxu3 %v3491_v15 }
  0x19   :  { %3297 = vmatmul.msk.bf16.vlgmr.msra.gmra.mxu2 %vm5668_vm0, %v3449_v8  ;;  %243 = vmatpush.bf16.msra.mxu0 %v3464_v9 }
  0x1a   :  { %257 = vmatpush.bf16.msra.mxu1 %v3472_v10 }
  0x1d   :  { %244 = vmatpush.bf16.msra.mxu0 %v3463_v12 }
  0x1e   :  { %258 = vmatpush.bf16.msra.mxu1 %v3471_v13 }
  0x1f   :  { %33 = vsyncpa [#allocation7], 0  ;;  %v3461_v18 = vld [vmem:[%s5706_s27 + $0x10] sm:$0xff]  ;;  %1733 = vmatpush.bf16.msra.mxu3 %v3490_v17  ;;  %v3450_v21 = vld [vmem:[%s5708_s29 + $0x8] sm:$0xff]  ;;  %s5709_s2 = sld [smem:[#allocation60_spill]]  ;;  %s3720_s7 = smov 120  }
  0x20   :  { %v3469_v19 = vld [vmem:[%s5706_s27 + $0x50] sm:$0xff]  ;;  %v3460_v22 = vld [vmem:[%s5706_s27 + $0x8] sm:$0xff]  ;;  %v3459_v24 = vld [vmem:[%s5706_s27] sm:$0xff]  ;;  %s5710_s30 = sld [smem:[#allocation62_spill]]  ;;  %s3721_s0 = smov 104   ;;  %vm1349_vm8 = vcmask 520640  }
  0x21   :  { %245 = vmatpush.bf16.msra.mxu0 %v3462_v14  ;;  %v3489_v20 = vld [vmem:[%s5611_s13 + $0x10] sm:$0xff]  ;;  %v3468_v23 = vld [vmem:[%s5706_s27 + $0x48] sm:$0xff]  ;;  %v3467_v26 = vld [vmem:[%s5706_s27 + $0x40] sm:$0xff]  ;;  %vm854_vm10 = vcmask 194688   ;;  %vm1110_vm11 = vcmask 324864   ;;  %vm993_vm12 = vcmask 1041409  }
  0x22   :  { %259 = vmatpush.bf16.msra.mxu1 %v3470_v16  ;;  %v3488_v25 = vld [vmem:[%s5611_s13 + $0x8] sm:$0xff]  ;;  %v3502_v29 = vld [vmem:[%s5611_s13 + $0x78] sm:$0xff]  ;;  %v3487_v34 = vld [vmem:[%s5611_s13] sm:$0xff]  ;;  %vm995_vm13 = vcmask 1042434   ;;  %vm997_vm14 = vcmask 1043459   ;;  %vm999_vm15 = vcmask 1044484  }
  0x23   :  { %1734 = vmatpush.bf16.msra.mxu3 %v3489_v20  ;;  %v3504_v32 = vld [vmem:[%s5610_s12 + $0x8] sm:$0xff]  ;;  %v3501_v38 = vld [vmem:[%s5611_s13 + $0x70] sm:$0xff]  ;;  %v3503_v40 = vld [vmem:[%s5610_s12] sm:$0xff]  ;;  %s3719_s12 = smov 112   ;;  %s5751_s27 = sld [smem:[#allocation66_spill]] }
  0x24   :  { %v3500_v41 = vld [vmem:[%s5611_s13 + $0x68] sm:$0xff]  ;;  %v3451_v42 = vld [vmem:[%s5708_s29 + $0x10] sm:$0xff]  ;;  %v3499_v43 = vld [vmem:[%s5611_s13 + $0x60] sm:$0xff]  ;;  %s5770_s25 = sld [smem:[#allocation67_spill]]  ;;  %s3728_s1 = smov [#allocation6]  }
  0x25   :  { %246 = vmatpush.bf16.msra.mxu0 %v3461_v18  ;;  %v3183_v27 = vld [vmem:[%s5709_s2] sm:$0xf]  ;;  %v3458_v28 = vld [vmem:[%s5709_s2 + $0x4] sm:$0xf0]  ;;  %v3457_v30 = vld [vmem:[%s5709_s2 + $0x4] sm:$0xf] }
  0x26   :  { %260 = vmatpush.bf16.msra.mxu1 %v3469_v19  ;;  %v3185_v31 = vld [vmem:[%s5709_s2 + $0x8] sm:$0xf0]  ;;  %v3184_v33 = vor.u32 %v3458_v28, %v3183_v27  ;;  %v3307_v35 = vld [vmem:[%s5710_s30] sm:$0xf]  ;;  %v3486_v36 = vld [vmem:[%s5710_s30 + $0x4] sm:$0xf0]  ;;  %v482_v28 = vlaneseq }
  0x27   :  { %1735 = vmatpush.bf16.msra.mxu3 %v3488_v25  ;;  %v3188_v37 = vor.u32 %v3457_v30, %v3185_v31  ;;  %v3308_v39 = vor.u32 %v3486_v36, %v3307_v35  ;;  %v3498_v44 = vld [vmem:[%s5611_s13 + $0x58] sm:$0xff]  ;;  %s5711_s2 = sld [smem:[#allocation61_spill]]  ;;  %v3497_v46 = vld [vmem:[%s5611_s13 + $0x50] sm:$0xff]  ;;  %v3496_v48 = vld [vmem:[%s5611_s13 + $0x48] sm:$0xff]  ;;  %s3169_s5 = sshll.u32 %s5622_s24, 4  ;;  %s3170_s5 = int_to_ptr.hbm [resolvable:$true] %s3169_s5 }
  0x28   :  { %v3452_v49 = vld [vmem:[%s5708_s29 + $0x18] sm:$0xff]  ;;  %v3495_v50 = vld [vmem:[%s5611_s13 + $0x40] sm:$0xff]  ;;  %v3309_v52 = vld [vmem:[%s5710_s30 + $0x8] sm:$0xf0]  ;;  %s5715_s13 = sld [smem:[#allocation65_spill]] }
  0x29   :  { %3298 = vmatmul.msk.bf16.gmra.mxu2 %vm5668_vm0, %v3450_v21  ;;  %247 = vmatpush.bf16.msra.mxu0 %v3460_v22  ;;  %v3485_v51 = vld [vmem:[%s5710_s30 + $0x4] sm:$0xf]  ;;  %v3454_v58 = vld [vmem:[%s5708_s29 + $0x28] sm:$0xff]  ;;  %v3455_v13 = vld [vmem:[%s5708_s29 + $0x30] sm:$0xff]  ;;  %s3726_s30 = smov 32  }
  0x2a   :  { %261 = vmatpush.bf16.msra.mxu1 %v3468_v23  ;;  %v3312_v53 = vor.u32 %v3485_v51, %v3309_v52  ;;  %v3453_v56 = vld [vmem:[%s5708_s29 + $0x20] sm:$0xff] }
  0x2b   :  { %1736 = vmatpush.bf16.msra.mxu3 %v3487_v34 }
  0x2d   :  { %248 = vmatpush.bf16.msra.mxu0 %v3459_v24  ;;  %v3477_v45 = vld [vmem:[%s5711_s2] sm:$0xff]  ;;  %v3482_v47 = vld [vmem:[%s5711_s2 + $0x28] sm:$0xff]  ;;  %v3483_v55 = vld [vmem:[%s5711_s2 + $0x30] sm:$0xff] }
  0x2e   :  { %262 = vmatpush.bf16.msra.mxu1 %v3467_v26  ;;  %1737 = vmatmul.bf16.vlgmr.msra.gmra.mxu3 %v3308_v39  ;;  %v3478_v54 = vld [vmem:[%s5711_s2 + $0x8] sm:$0xff]  ;;  %v3479_v57 = vld [vmem:[%s5711_s2 + $0x10] sm:$0xff]  ;;  %v3480_v2 = vld [vmem:[%s5711_s2 + $0x18] sm:$0xff]  ;;  %v269_v11 = vstv %s5715_s13 }
  0x2f   :  { %3509 = vmatpush.bf16.msrb.mxu3 %v3504_v32  ;;  %v3484_v3 = vld [vmem:[%s5711_s2 + $0x38] sm:$0xff]  ;;  %v3481_v20 = vld [vmem:[%s5711_s2 + $0x20] sm:$0xff] }
  0x30   :  { %249 = vmatmul.bf16.vlgmr.msra.gmra.mxu0 %v3184_v33 }
  0x31   :  { %1743 = vmatpush.bf16.msrb.mxu0 %v3502_v29  ;;  %263 = vmatmul.bf16.vlgmr.msra.gmra.mxu1 %v3188_v37 }
  0x32   :  { %1925 = vmatpush.bf16.msrb.mxu1 %v3504_v32  ;;  %v4104_v32 = vshrl.u32 %v482_v28, 7 }
  0x33   :  { %3510 = vmatpush.bf16.msrb.mxu3 %v3503_v40 }
  0x34   :  { %5720 = vst [vmem:[#allocation16_spill] sm:$0xff] %v4104_v32  ;;  %3524 = vset.pattern.permute.xlu2 %v4104_v32  ;;  %3523 = vset.pattern.permute.xlu1 %v4104_v32 }
  0x35   :  { %1744 = vmatpush.bf16.msrb.mxu0 %v3501_v38 }
  0x36   :  { %1926 = vmatpush.bf16.msrb.mxu1 %v3503_v40 }
  0x39   :  { %1745 = vmatpush.bf16.msrb.mxu0 %v3500_v41  ;;  %3299 = vmatmul.msk.bf16.gmra.mxu2 %vm5668_vm0, %v3451_v42 }
  0x3d   :  { %1746 = vmatpush.bf16.msrb.mxu0 %v3499_v43 }
  0x3e   :  { %3426 = vmatmul.msk.bf16.vlgmr.msrb.gmra.mxu3 %vm5668_vm0, %v3482_v47 }
  0x41   :  { %1747 = vmatpush.bf16.msrb.mxu0 %v3498_v44  ;;  %3421 = vmatmul.msk.bf16.vlgmr.msrb.gmra.mxu1 %vm5668_vm0, %v3477_v45 }
  0x45   :  { %1748 = vmatpush.bf16.msrb.mxu0 %v3497_v46 }
  0x49   :  { %1749 = vmatpush.bf16.msrb.mxu0 %v3496_v48  ;;  %3300 = vmatmul.msk.bf16.gmra.mxu2 %vm5668_vm0, %v3452_v49 }
  0x4d   :  { %1750 = vmatpush.bf16.msrb.mxu0 %v3495_v50 }
  0x4e   :  { %3427 = vmatmul.msk.bf16.gmra.mxu3 %vm5668_vm0, %v3483_v55 }
  0x50   :  { %1751 = vmatmul.bf16.vlgmr.msrb.gmra.mxu0 %v3312_v53 }
  0x51   :  { %3422 = vmatmul.msk.bf16.gmra.mxu1 %vm5668_vm0, %v3478_v54 }
  0x59   :  { %3301 = vmatmul.msk.bf16.gmra.mxu2 %vm5668_vm0, %v3453_v56 }
  0x5e   :  { %3428 = vmatmul.msk.bf16.gmra.mxu3 %vm5668_vm0, %v3484_v3 }
  0x61   :  { %3423 = vmatmul.msk.bf16.gmra.mxu1 %vm5668_vm0, %v3479_v57 }
  0x69   :  { %3302 = vmatmul.msk.bf16.gmra.mxu2 %vm5668_vm0, %v3454_v58 }
  0x71   :  { %3424 = vmatmul.msk.bf16.gmra.mxu1 %vm5668_vm0, %v3480_v2 }
  0x79   :  { %3303 = vmatmul.msk.bf16.gmra.mxu2 %vm5668_vm0, %v3455_v13 }
  0x81   :  { %3425 = vmatmul.msk.bf16.gmra.mxu1 %vm5668_vm0, %v3481_v20 }
  0x9c   :  { %v4031_v59 = vpop.f32.mrf.mxu2 }
  0x9d   :  { %5712 = vst [vmem:[#allocation9_spill] sm:$0xff] %v4031_v59  ;;  %v1030_v60 = vrot.slane %v4031_v59, 2  ;;  %v774_v61 = vrot.slane %v4031_v59, 1  ;;  %v1269_v63 = vrot.slane %v4031_v59, 3 }
  0x9f   :  { %1046 = vrot.lane.b32.xlu0 %v1030_v60, %s3719_s12  ;;  %790 = vrot.lane.b32.xlu1 %v774_v61, %s3720_s7 }
  0xa4   :  { %v4038_v62 = vpop.f32.mrf.mxu2 }
  0xa5   :  { %5713 = vst [vmem:[#allocation10_spill] sm:$0xff] %v4038_v62  ;;  %v1031_v0 = vrot.slane %v4038_v62, 2  ;;  %v775_v1 = vrot.slane %v4038_v62, 1  ;;  %v1270_v6 = vrot.slane %v4038_v62, 3 }
  0xa7   :  { %1285 = vrot.lane.b32.xlu0 %v1269_v63, %s3721_s0  ;;  %1048 = vrot.lane.b32.xlu1 %v1031_v0, %s3719_s12  ;;  %v3456_v0 = vld [vmem:[%s5708_s29 + $0x38] sm:$0xff] }
  0xa8   :  { %792 = vrot.lane.b32.xlu2 %v775_v1, %s3720_s7  ;;  %3304 = vmatmul.msk.bf16.gmra.mxu2 %vm5668_vm0, %v3456_v0 }
  0xac   :  { %v4053_v4 = vpop.f32.mrf.mxu2 }
  0xad   :  { %5714 = vst [vmem:[#allocation11_spill] sm:$0xff] %v4053_v4  ;;  %v250_v5 = vpop.f32.mrf.mxu0  ;;  %v1032_v7 = vrot.slane %v4053_v4, 2  ;;  %v776_v8 = vrot.slane %v4053_v4, 1  ;;  %v1271_v17 = vrot.slane %v4053_v4, 3 }
  0xae   :  { %v264_v9 = vpop.f32.mrf.mxu1 }
  0xaf   :  { %v4059_v10 = vadd.f32 %v264_v9, %v250_v5  ;;  %1287 = vrot.lane.b32.xlu1 %v1270_v6, %s3721_s0  ;;  %1050 = vrot.lane.b32.xlu0 %v1032_v7, %s3719_s12 }
  0xb0   :  { %794 = vrot.lane.b32.xlu2 %v776_v8, %s3720_s7 }
  0xb1   :  { %v270_v12 = vadd.f32 %v269_v11, %v4059_v10  ;;  %v4080_v18 = vpop.f32.mrf.mxu3 }
  0xb3   :  { %v3253_v16 = vmul.f32 -1.442695, %v270_v12 }
  0xb4   :  { %v4075_v14 = vpop.f32.mrf.mxu2 }
  0xb5   :  { %5716 = vst [vmem:[#allocation12_spill] sm:$0xff] %v4075_v14  ;;  %v777_v15 = vrot.slane %v4075_v14, 1  ;;  %3572 = vpow2.f32 %v3253_v16  ;;  %v1033_v22 = vrot.slane %v4075_v14, 2  ;;  %v1272_v24 = vrot.slane %v4075_v14, 3  ;;  %v252_v56 = vpop.f32.mrf.mxu0 }
  0xb6   :  { %v4082_v19 = vpop.f32.mrf.mxu1 }
  0xb7   :  { %796 = vrot.lane.b32.xlu1 %v777_v15, %s3720_s7  ;;  %v4143_v61 = vadd.f32 %v4082_v19, %v252_v56 }
  0xb8   :  { %1289 = vrot.lane.b32.xlu2 %v1271_v17, %s3721_s0 }
  0xb9   :  { %v4095_v25 = vpop.f32.mrf.mxu3  ;;  %v271_v1 = vadd.f32 %v269_v11, %v4143_v61 }
  0xba   :  { %5718 = vst [vmem:[#allocation14_spill] sm:$0xff] %v4095_v25 }
  0xbb   :  { %v3573_v27 = vpop.eup %3572  ;;  %v3254_v5 = vmul.f32 -1.442695, %v271_v1 }
  0xbc   :  { %v4090_v21 = vpop.f32.mrf.mxu2  ;;  %v278_v29 = vadd.f32 1.0, %v3573_v27 }
  0xbd   :  { %5717 = vst [vmem:[#allocation13_spill] sm:$0xff] %v4090_v21  ;;  %v1034_v23 = vrot.slane %v4090_v21, 2  ;;  %v1273_v30 = vrot.slane %v4090_v21, 3  ;;  %v778_v31 = vrot.slane %v4090_v21, 1 }
  0xbe   :  { %v4099_v26 = vpop.f32.mrf.mxu1  ;;  %3574 = vrcp.f32 %v278_v29  ;;  %vm285_vm1 = vweird.f32 %v278_v29  ;;  %v291_v48 = vand.u32 2147483648, %v278_v29  ;;  %v289_v50 = vand.u32 2147483647, %v278_v29 }
  0xbf   :  { %1052 = vrot.lane.b32.xlu1 %v1033_v22, %s3719_s12  ;;  %1054 = vrot.lane.b32.xlu0 %v1034_v23, %s3719_s12  ;;  %5719 = vst [vmem:[#allocation15_spill] sm:$0xff] %v4099_v26  ;;  %v2508_v37 = vrot.slane %v4099_v26, 2  ;;  %v2260_v38 = vrot.slane %v4099_v26, 1  ;;  %v2746_v45 = vrot.slane %v4099_v26, 3  ;;  %3576 = vpow2.f32 %v3254_v5 }
  0xc0   :  { %1291 = vrot.lane.b32.xlu2 %v1272_v24, %s3721_s0  ;;  %v292_v54 = vor.u32 1.1754944e-38, %v291_v48  ;;  %vm290_vm4 = vcmp.eq.f32.partialorder %v289_v50, 8.507059e+37 }
  0xc1   :  { %v4113_v35 = vpop.f32.mrf.mxu3 }
  0xc2   :  { %5722 = vst [vmem:[#allocation18_spill] sm:$0xff] %v4113_v35  ;;  %v2518_v51 = vrot.slane %v4113_v35, 2  ;;  %v2270_v60 = vrot.slane %v4113_v35, 1  ;;  %v2756_v3 = vrot.slane %v4113_v35, 3 }
  0xc4   :  { %v4106_v33 = vpop.f32.mrf.mxu2  ;;  %v3575_v40 = vpop.eup %3574 }
  0xc5   :  { %5721 = vst [vmem:[#allocation17_spill] sm:$0xff] %v4106_v33  ;;  %v779_v34 = vrot.slane %v4106_v33, 1  ;;  %v281_v41 = vmul.f32 %v3575_v40, %v278_v29  ;;  %v1274_v46 = vrot.slane %v4106_v33, 3  ;;  %vm286_vm2 = vweird.f32 %v3575_v40  ;;  %v3577_v13 = vpop.eup %3576 }
  0xc6   :  { %v4116_v36 = vpop.f32.mrf.mxu1  ;;  %vm287_vm3 = vmor %vm285_vm1, %vm286_vm2  ;;  %v1035_v52 = vrot.slane %v4106_v33, 2  ;;  %v279_v15 = vadd.f32 1.0, %v3577_v13  ;;  %vm5677_vm1 = vcmask 1045509   ;;  %vm5669_vm2 = vcmask 1046534  }
  0xc7   :  { %1293 = vrot.lane.b32.xlu0 %v1273_v30, %s3721_s0  ;;  %798 = vrot.lane.b32.xlu1 %v778_v31, %s3720_s7  ;;  %5723 = vst [vmem:[#allocation19_spill] sm:$0xff] %v4116_v36  ;;  %v2261_v39 = vrot.slane %v4116_v36, 1  ;;  %v282_v43 = vsub.f32 1.0, %v281_v41  ;;  %v2509_v58 = vrot.slane %v4116_v36, 2  ;;  %v2747_v2 = vrot.slane %v4116_v36, 3 }
  0xc8   :  { %800 = vrot.lane.b32.xlu2 %v779_v34, %s3720_s7  ;;  %3578 = vrcp.f32 %v279_v15  ;;  %vm300_vm5 = vweird.f32 %v279_v15 }
  0xc9   :  { %v4124_v42 = vpop.f32.mrf.mxu3  ;;  %v283_v47 = vmul.f32 %v3575_v40, %v282_v43 }
  0xca   :  { %5724 = vst [vmem:[#allocation20_spill] sm:$0xff] %v4124_v42  ;;  %v2271_v44 = vrot.slane %v4124_v42, 1  ;;  %v2519_v53 = vrot.slane %v4124_v42, 2  ;;  %v2757_v17 = vrot.slane %v4124_v42, 3 }
  0xcb   :  { %v284_v49 = vadd.f32 %v3575_v40, %v283_v47 }
  0xcc   :  { %v4164_v8 = vpop.f32.mrf.mxu2 }
  0xcd   :  { %v288_v55 = vsel %vm287_vm3, %v3575_v40, %v284_v49  ;;  %5727 = vst [vmem:[#allocation23_spill] sm:$0xff] %v4164_v8  ;;  %v1275_v9 = vrot.slane %v4164_v8, 3  ;;  %v780_v11 = vrot.slane %v4164_v8, 1  ;;  %v1036_v19 = vrot.slane %v4164_v8, 2 }
  0xce   :  { %v4138_v57 = vsel %vm290_vm4, %v292_v54, %v288_v55  ;;  %v4162_v7 = vpop.f32.mrf.mxu1  ;;  %v3579_v23 = vpop.eup %3578  ;;  %v304_v54 = vand.u32 2147483647, %v279_v15 }
  0xcf   :  { %2524 = vrot.lane.b32.xlu0 %v2508_v37, %s3719_s12  ;;  %2276 = vrot.lane.b32.xlu1 %v2260_v38, %s3720_s7  ;;  %5725 = vst [vmem:[#allocation21_spill] sm:$0xff] %v4138_v57  ;;  %v509_v63 = vperm.slane %v4138_v57, 4  ;;  %v516_v6 = vperm.slane %v4138_v57, 5  ;;  %v2262_v12 = vrot.slane %v4162_v7, 1  ;;  %v2748_v16 = vrot.slane %v4162_v7, 3 }
  0xd0   :  { %2278 = vrot.lane.b32.xlu2 %v2261_v39, %s3720_s7  ;;  %5726 = vst [vmem:[#allocation22_spill] sm:$0xff] %v4162_v7  ;;  %v2510_v24 = vrot.slane %v4162_v7, 2  ;;  %v495_v27 = vperm.slane %v4138_v57, 2  ;;  %v296_v30 = vmul.f32 %v3579_v23, %v279_v15  ;;  %v502_v39 = vperm.slane %v4138_v57, 3 }
  0xd1   :  { %v4183_v29 = vpop.f32.mrf.mxu3  ;;  %vm301_vm6 = vweird.f32 %v3579_v23  ;;  %vm305_vm9 = vcmp.eq.f32.partialorder %v304_v54, 8.507059e+37 }
  0xd2   :  { %5729 = vst [vmem:[#allocation25_spill] sm:$0xff] %v4183_v29  ;;  %v297_v38 = vsub.f32 1.0, %v296_v30  ;;  %vm4202_vm7 = vmor %vm300_vm5, %vm301_vm6 }
  0xd4   :  { %v4177_v20 = vpop.f32.mrf.mxu2  ;;  %v298_v41 = vmul.f32 %v3579_v23, %v297_v38 }
  0xd5   :  { %5728 = vst [vmem:[#allocation24_spill] sm:$0xff] %v4177_v20  ;;  %v1037_v28 = vrot.slane %v4177_v20, 2  ;;  %v1276_v40 = vrot.slane %v4177_v20, 3  ;;  %v781_v13 = vrot.slane %v4177_v20, 1 }
  0xd6   :  { %v4193_v43 = vpop.f32.mrf.mxu1  ;;  %v299_v49 = vadd.f32 %v3579_v23, %v298_v41 }
  0xd7   :  { %2762 = vrot.lane.b32.xlu0 %v2746_v45, %s3721_s0  ;;  %1295 = vrot.lane.b32.xlu1 %v1274_v46, %s3721_s0  ;;  %5730 = vst [vmem:[#allocation26_spill] sm:$0xff] %v4193_v43 }
  0xd8   :  { %2298 = vrot.lane.b32.xlu2 %v2271_v44, %s3720_s7  ;;  %v303_v56 = vsel %vm4202_vm7, %v3579_v23, %v299_v49 }
  0xd9   :  { %v4196_v44 = vpop.f32.mrf.mxu3 }
  0xda   :  { %5731 = vst [vmem:[#allocation27_spill] sm:$0xff] %v4196_v44  ;;  %v2273_v48 = vrot.slane %v4196_v44, 1 }
  0xdc   :  { %v4187_v31 = vpop.f32.mrf.mxu2 }
  0xdd   :  { %v782_v37 = vrot.slane %v4187_v31, 1 }
  0xdf   :  { %2544 = vrot.lane.b32.xlu1 %v2518_v51, %s3719_s12  ;;  %1056 = vrot.lane.b32.xlu0 %v1035_v52, %s3719_s12  ;;  %v2272_v51 = vrot.slane %v4183_v29, 1  ;;  %v306_v52 = vand.u32 2147483648, %v279_v15 }
  0xe0   :  { %2546 = vrot.lane.b32.xlu2 %v2519_v53, %s3719_s12  ;;  %v530_v53 = vperm.slane %v4138_v57, 7 }
  0xe4   :  { %v4225_v23 = vpop.f32.mrf.mxu2 }
  0xe5   :  { %5736 = vst [vmem:[#allocation30_spill] sm:$0xff] %v4225_v23 }
  0xe7   :  { %2526 = vrot.lane.b32.xlu1 %v2509_v58, %s3719_s12  ;;  %2296 = vrot.lane.b32.xlu0 %v2270_v60, %s3720_s7  ;;  %v4210_v60 = vpop.f32.mrf.mxu1 }
  0xe8   :  { %514 = vperm.xlu2 %3524, %v509_v63   ;;  %5734 = vst [vmem:[#allocation28_spill] sm:$0xff] %v4210_v60  ;;  %v307_v63 = vor.u32 1.1754944e-38, %v306_v52 }
  0xef   :  { %2764 = vrot.lane.b32.xlu1 %v2747_v2, %s3721_s0  ;;  %2782 = vrot.lane.b32.xlu0 %v2756_v3, %s3721_s0 }
  0xf0   :  { %521 = vperm.xlu2 %3524, %v516_v6   ;;  %v4215_v6 = vsel %vm305_vm9, %v307_v63, %v303_v56 }
  0xf1   :  { %5735 = vst [vmem:[#allocation29_spill] sm:$0xff] %v4215_v6  ;;  %v537_v15 = vperm.slane %v4215_v6, 0 }
  0xf7   :  { %1297 = vrot.lane.b32.xlu0 %v1275_v9, %s3721_s0  ;;  %802 = vrot.lane.b32.xlu1 %v780_v11, %s3720_s7  ;;  %v2512_v9 = vrot.slane %v4210_v60, 2 }
  0xf8   :  { %2280 = vrot.lane.b32.xlu2 %v2262_v12, %s3720_s7 }
  0xff   :  { %2784 = vrot.lane.b32.xlu0 %v2757_v17, %s3721_s0  ;;  %1058 = vrot.lane.b32.xlu1 %v1036_v19, %s3719_s12 }
 0x100   :  { %2766 = vrot.lane.b32.xlu2 %v2748_v16, %s3721_s0 }
 0x102   :  { %v793_v22 = vpop.permute.xlu2 %792 }
 0x103   :  { %v839_v5 = vadd.f32 %v793_v22, %v4038_v62 }
 0x105   :  { %v862_v16 = vsel %vm854_vm10, %v839_v5, -inf }
 0x107   :  { %2528 = vrot.lane.b32.xlu0 %v2510_v24, %s3719_s12  ;;  %500 = vperm.xlu1 %3523, %v495_v27  }
 0x108   :  { %1060 = vrot.lane.b32.xlu2 %v1037_v28, %s3719_s12  ;;  %v863_v28 = vrot.slane %v862_v16, 4 }
 0x10a   :  { %v795_v34 = vpop.permute.xlu2 %794 }
 0x10b   :  { %v840_v19 = vadd.f32 %v795_v34, %v4053_v4 }
 0x10d   :  { %v869_v54 = vsel %vm854_vm10, %v840_v19, -inf }
 0x10f   :  { %507 = vperm.xlu1 %3523, %v502_v39   ;;  %806 = vrot.lane.b32.xlu0 %v782_v37, %s3720_s7 }
 0x110   :  { %1299 = vrot.lane.b32.xlu2 %v1276_v40, %s3721_s0 }
 0x111   :  { %v1047_v45 = vpop.permute.xlu0 %1046  ;;  %v791_v46 = vpop.permute.xlu1 %790 }
 0x112   :  { %v1290_v47 = vpop.permute.xlu2 %1289  ;;  %v838_v50 = vadd.f32 %v791_v46, %v4031_v59  ;;  %v2520_v46 = vrot.slane %v4183_v29, 2 }
 0x114   :  { %v1094_v58 = vadd.f32 %v1047_v45, %v838_v50  ;;  %v1039_v45 = vrot.slane %v4225_v23, 2 }
 0x117   :  { %535 = vperm.xlu1 %3523, %v530_v53   ;;  %2302 = vrot.lane.b32.xlu0 %v2273_v48, %s3720_s7  ;;  %v864_v48 = vmax.f32 %v862_v16, %v863_v28 }
 0x118   :  { %2300 = vrot.lane.b32.xlu2 %v2272_v51, %s3720_s7  ;;  %v558_v51 = vperm.slane %v4215_v6, 3 }
 0x119   :  { %v1286_v0 = vpop.permute.xlu0 %1285  ;;  %v1049_v1 = vpop.permute.xlu1 %1048  ;;  %v865_v63 = vrot.slane %v864_v48, 2 }
 0x11a   :  { %v1333_v2 = vadd.f32 %v1286_v0, %v1094_v58  ;;  %v4212_v3 = vpop.permute.xlu2 %1291  ;;  %v1095_v22 = vadd.f32 %v1049_v1, %v839_v5  ;;  %v855_v0 = vsel %vm854_vm10, %v838_v50, -inf  ;;  %v870_v5 = vrot.slane %v869_v54, 4 }
 0x11b   :  { %v856_v16 = vrot.slane %v855_v0, 4 }
 0x11c   :  { %v1350_v11 = vsel %vm1349_vm8, %v1333_v2, -inf  ;;  %v1118_v28 = vsel %vm1110_vm11, %v1095_v22, -inf }
 0x11d   :  { %v1351_v12 = vrot.slane %v1350_v11, 4 }
 0x11f   :  { %v1352_v17 = vmax.f32 %v1350_v11, %v1351_v12  ;;  %804 = vrot.lane.b32.xlu1 %v781_v13, %s3720_s7  ;;  %2532 = vrot.lane.b32.xlu0 %v2512_v9, %s3719_s12  ;;  %v1111_v9 = vsel %vm1110_vm11, %v1094_v58, -inf }
 0x120   :  { %542 = vperm.xlu2 %3524, %v537_v15   ;;  %v579_v15 = vperm.slane %v4215_v6, 6 }
 0x121   :  { %v1288_v24 = vpop.permute.xlu1 %1287  ;;  %v1051_v27 = vpop.permute.xlu0 %1050  ;;  %v1353_v39 = vrot.slane %v1352_v17, 2 }
 0x122   :  { %v1334_v30 = vadd.f32 %v1288_v24, %v1095_v22  ;;  %v4227_v37 = vadd.f32 %v1051_v27, %v840_v19  ;;  %v4229_v38 = vpop.permute.xlu2 %800  ;;  %v551_v19 = vperm.slane %v4215_v6, 2  ;;  %v572_v24 = vperm.slane %v4215_v6, 5 }
 0x123   :  { %v1354_v52 = vmax.f32 %v1352_v17, %v1353_v39  ;;  %v1112_v27 = vrot.slane %v1111_v9, 4  ;;  %v866_v39 = vmax.f32 %v864_v48, %v865_v63  ;;  %v857_v22 = vmax.f32 %v855_v0, %v856_v16 }
 0x124   :  { %v1357_v40 = vsel %vm1349_vm8, %v1334_v30, -inf  ;;  %v1335_v41 = vadd.f32 %v1290_v47, %v4227_v37  ;;  %v1278_v30 = vrot.slane %v4225_v23, 3  ;;  %v4259_v0 = vadd.f32 %v4229_v38, %v4106_v33 }
 0x125   :  { %v1358_v34 = vrot.slane %v1357_v40, 4  ;;  %v1355_v11 = vrot.slane %v1354_v52, 1  ;;  %v858_v16 = vrot.slane %v857_v22, 2 }
 0x126   :  { %v1364_v49 = vsel %vm1349_vm8, %v1335_v41, -inf }
 0x127   :  { %v1359_v53 = vmax.f32 %v1357_v40, %v1358_v34  ;;  %2548 = vrot.lane.b32.xlu1 %v2520_v46, %s3719_s12  ;;  %v1365_v55 = vrot.slane %v1364_v49, 4  ;;  %1064 = vrot.lane.b32.xlu0 %v1039_v45, %s3719_s12  ;;  %v871_v40 = vmax.f32 %v869_v54, %v870_v5  ;;  %v1356_v58 = vmax.f32 %v1354_v52, %v1355_v11  ;;  %v4249_v46 = vpop.f32.mrf.mxu1 }
 0x128   :  { %563 = vperm.xlu2 %3524, %v558_v51   ;;  %5737 = vst [vmem:[#allocation31_spill] sm:$0xff] %v4249_v46  ;;  %v1119_v51 = vrot.slane %v1118_v28, 4  ;;  %v867_v5 = vrot.slane %v866_v39, 1 }
 0x129   :  { %v1360_v47 = vrot.slane %v1359_v53, 2  ;;  %v797_v56 = vpop.permute.xlu1 %796  ;;  %v1366_v1 = vmax.f32 %v1364_v49, %v1365_v55  ;;  %v2749_v49 = vrot.slane %v4193_v43, 3  ;;  %v1113_v55 = vmax.f32 %v1111_v9, %v1112_v27 }
 0x12a   :  { %v2279_v2 = vpop.permute.xlu2 %2278  ;;  %v841_v34 = vadd.f32 %v797_v56, %v4075_v14  ;;  %v872_v11 = vrot.slane %v871_v40, 2 }
 0x12b   :  { %v1361_v12 = vmax.f32 %v1359_v53, %v1360_v47  ;;  %v1367_v13 = vrot.slane %v1366_v1, 2 }
 0x12d   :  { %v1362_v17 = vrot.slane %v1361_v12, 1  ;;  %v1368_v50 = vmax.f32 %v1366_v1, %v1367_v13  ;;  %v4262_v13 = vadd.f32 %v2279_v2, %v4116_v36 }
 0x12f   :  { %v1363_v41 = vmax.f32 %v1361_v12, %v1362_v17  ;;  %556 = vperm.xlu1 %3523, %v551_v19   ;;  %v1369_v45 = vrot.slane %v1368_v50, 1  ;;  %1303 = vrot.lane.b32.xlu0 %v1278_v30, %s3721_s0  ;;  %v1125_v12 = vsel %vm1110_vm11, %v4227_v37, -inf  ;;  %v1120_v17 = vmax.f32 %v1118_v28, %v1119_v51  ;;  %v4298_v59 = vpop.f32.mrf.mxu1 }
 0x130   :  { %584 = vperm.xlu2 %3524, %v579_v15   ;;  %v2513_v15 = vrot.slane %v4249_v46, 2  ;;  %v1126_v37 = vrot.slane %v1125_v12, 4  ;;  %v876_v30 = vsel %vm854_vm10, %v841_v34, -inf  ;;  %5740 = vst [vmem:[#allocation34_spill] sm:$0xff] %v4298_v59 }
 0x131   :  { %v1478_v53 = vsel %vm993_vm12, %v1363_v41, %v1356_v58  ;;  %v1053_v48 = vpop.permute.xlu1 %1052  ;;  %v1055_v54 = vpop.permute.xlu0 %1054  ;;  %v1370_v47 = vmax.f32 %v1368_v50, %v1369_v45  ;;  %v1114_v50 = vrot.slane %v1113_v55, 2  ;;  %v4272_v58 = vmax.f32 %v866_v39, %v867_v5 }
 0x132   :  { %v1097_v63 = vadd.f32 %v1053_v48, %v841_v34  ;;  %v2299_v1 = vpop.permute.xlu2 %2298  ;;  %v890_v41 = vsel %vm854_vm10, %v4259_v0, -inf  ;;  %v2347_v45 = vsel %vm854_vm10, %v4262_v13, -inf  ;;  %v4283_v39 = vpop.f32.mrf.mxu2  ;;  %v1121_v34 = vrot.slane %v1120_v17, 2 }
 0x133   :  { %v4268_v27 = vsel %vm995_vm13, %v1370_v47, %v1478_v53  ;;  %5738 = vst [vmem:[#allocation32_spill] sm:$0xff] %v4283_v39  ;;  %v877_v48 = vrot.slane %v876_v30, 4  ;;  %v4288_v47 = vadd.f32 %v2299_v1, %v4124_v42  ;;  %v4290_v28 = vmax.f32 %v1113_v55, %v1114_v50 }
 0x134   :  { %v1336_v9 = vadd.f32 %v4212_v3, %v1097_v63  ;;  %v1132_v19 = vsel %vm1110_vm11, %v1097_v63, -inf  ;;  %v1038_v3 = vrot.slane %v4187_v31, 2  ;;  %v1127_v2 = vmax.f32 %v1125_v12, %v1126_v37 }
 0x135   :  { %v1133_v51 = vrot.slane %v1132_v19, 4  ;;  %5739 = vst [vmem:[#allocation33_spill] sm:$0xff] %v4288_v47  ;;  %v891_v52 = vrot.slane %v890_v41, 4  ;;  %v1122_v55 = vmax.f32 %v1120_v17, %v1121_v34  ;;  %v878_v12 = vmax.f32 %v876_v30, %v877_v48 }
 0x136   :  { %v1371_v38 = vsel %vm1349_vm8, %v1336_v9, -inf  ;;  %v859_v9 = vmax.f32 %v857_v22, %v858_v16  ;;  %v1128_v37 = vrot.slane %v1127_v2, 2 }
 0x137   :  { %577 = vperm.xlu1 %3523, %v572_v24   ;;  %v1372_v53 = vrot.slane %v1371_v38, 4  ;;  %2534 = vrot.lane.b32.xlu0 %v2513_v15, %s3719_s12  ;;  %v4285_v24 = vmax.f32 %v871_v40, %v872_v11  ;;  %v2348_v15 = vrot.slane %v2347_v45, 4  ;;  %v784_v40 = vrot.slane %v4283_v39, 1 }
 0x138   :  { %2768 = vrot.lane.b32.xlu2 %v2749_v49, %s3721_s0  ;;  %v1134_v11 = vmax.f32 %v1132_v19, %v1133_v51  ;;  %v860_v50 = vrot.slane %v859_v9, 1  ;;  %v892_v14 = vmax.f32 %v890_v41, %v891_v52  ;;  %v1123_v30 = vrot.slane %v1122_v55, 1 }
 0x139   :  { %v1294_v63 = vpop.permute.xlu0 %1293  ;;  %v799_v5 = vpop.permute.xlu1 %798  ;;  %v1373_v62 = vmax.f32 %v1371_v38, %v1372_v53  ;;  %v874_v22 = vrot.slane %v4285_v24, 1  ;;  %v2349_v32 = vmax.f32 %v2347_v45, %v2348_v15  ;;  %v5741_v38 = vrot.slane %v4193_v43, 1 }
 0x13a   :  { %v842_v56 = vadd.f32 %v799_v5, %v4090_v21  ;;  %v2547_v49 = vpop.permute.xlu2 %2546  ;;  %v1129_v34 = vmax.f32 %v1127_v2, %v1128_v37  ;;  %v4316_v21 = vpop.f32.mrf.mxu1 }
 0x13b   :  { %v4294_v36 = vadd.f32 %v2547_v49, %v4288_v47  ;;  %v1374_v51 = vrot.slane %v1373_v62, 2  ;;  %5744 = vst [vmem:[#allocation37_spill] sm:$0xff] %v4316_v21 }
 0x13c   :  { %v883_v1 = vsel %vm854_vm10, %v842_v56, -inf  ;;  %v1098_v42 = vadd.f32 %v1055_v54, %v842_v56  ;;  %v1116_v54 = vrot.slane %v4290_v28, 1  ;;  %v1135_v56 = vrot.slane %v1134_v11, 2 }
 0x13d   :  { %v884_v16 = vrot.slane %v883_v1, 4  ;;  %v1130_v33 = vrot.slane %v1129_v34, 1 }
 0x13e   :  { %v1139_v5 = vsel %vm1110_vm11, %v1098_v42, -inf  ;;  %v1337_v49 = vadd.f32 %v1294_v63, %v1098_v42  ;;  %v879_v42 = vrot.slane %v878_v12, 2  ;;  %v1136_v47 = vmax.f32 %v1134_v11, %v1135_v56 }
 0x13f   :  { %v885_v4 = vmax.f32 %v883_v1, %v884_v16  ;;  %v1140_v19 = vrot.slane %v1139_v5, 4  ;;  %2282 = vrot.lane.b32.xlu1 %v5741_v38, %s3720_s7  ;;  %810 = vrot.lane.b32.xlu0 %v784_v40, %s3720_s7  ;;  %v1279_v1 = vrot.slane %v4283_v39, 3  ;;  %v893_v16 = vrot.slane %v892_v14, 2 }
 0x140   :  { %v1378_v17 = vsel %vm1349_vm8, %v1337_v49, -inf  ;;  %1062 = vrot.lane.b32.xlu2 %v1038_v3, %s3719_s12  ;;  %v2350_v49 = vrot.slane %v2349_v32, 2  ;;  %v1375_v40 = vmax.f32 %v1373_v62, %v1374_v51  ;;  %v880_v20 = vmax.f32 %v878_v12, %v879_v42 }
 0x141   :  { %v1141_v52 = vmax.f32 %v1139_v5, %v1140_v19  ;;  %v1379_v41 = vrot.slane %v1378_v17, 4  ;;  %v2525_v45 = vpop.permute.xlu0 %2524  ;;  %v2277_v53 = vpop.permute.xlu1 %2276  ;;  %v886_v48 = vrot.slane %v885_v4, 2  ;;  %v894_v57 = vmax.f32 %v892_v14, %v893_v16 }
 0x142   :  { %v2324_v63 = vadd.f32 %v2277_v53, %v4099_v26  ;;  %v4310_v15 = vpop.permute.xlu2 %514  ;;  %v4314_v19 = vpop.f32.mrf.mxu2  ;;  %v861_v53 = vmax.f32 %v859_v9, %v860_v50  ;;  %v1124_v26 = vmax.f32 %v1122_v55, %v1123_v30  ;;  %v2351_v25 = vmax.f32 %v2349_v32, %v2350_v49 }
 0x143   :  { %5742 = vst [vmem:[#allocation35_spill] sm:$0xff] %v4310_v15  ;;  %v1142_v38 = vrot.slane %v1141_v52, 2  ;;  %v1380_v3 = vmax.f32 %v1378_v17, %v1379_v41  ;;  %v887_v15 = vmax.f32 %v885_v4, %v886_v48  ;;  %v5745_v62 = vrot.slane %v4193_v43, 2  ;;  %v4327_v4 = vpop.f32.mrf.mxu3 }
 0x144   :  { %v2340_v29 = vsel %vm854_vm10, %v2324_v63, -inf  ;;  %v2572_v5 = vadd.f32 %v2525_v45, %v2324_v63  ;;  %5743 = vst [vmem:[#allocation36_spill] sm:$0xff] %v4314_v19  ;;  %v875_v56 = vmax.f32 %v4285_v24, %v874_v22  ;;  %v1117_v12 = vmax.f32 %v4290_v28, %v1116_v54 }
 0x145   :  { %v1143_v2 = vmax.f32 %v1141_v52, %v1142_v38  ;;  %v1381_v37 = vrot.slane %v1380_v3, 2  ;;  %v2341_v6 = vrot.slane %v2340_v29, 4  ;;  %v1137_v51 = vrot.slane %v1136_v47, 1  ;;  %5747 = vst [vmem:[#allocation38_spill] sm:$0xff] %v4327_v4 }
 0x146   :  { %v1376_v42 = vrot.slane %v1375_v40, 1  ;;  %v5746_v9 = vrot.slane %v4187_v31, 3  ;;  %v881_v14 = vrot.slane %v880_v20, 1  ;;  %v994_v24 = vsel %vm993_vm12, %v4272_v58, %v861_v53 }
 0x147   :  { %v1382_v17 = vmax.f32 %v1380_v3, %v1381_v37  ;;  %v2342_v11 = vmax.f32 %v2340_v29, %v2341_v6  ;;  %2530 = vrot.lane.b32.xlu1 %v5745_v62, %s3719_s12  ;;  %1305 = vrot.lane.b32.xlu0 %v1279_v1, %s3721_s0  ;;  %v1144_v32 = vrot.slane %v1143_v2, 1  ;;  %v1131_v28 = vmax.f32 %v1129_v34, %v1130_v33 }
 0x148   :  { %1301 = vrot.lane.b32.xlu2 %v5746_v9, %s3721_s0  ;;  %v888_v22 = vrot.slane %v887_v15, 1  ;;  %v1239_v52 = vsel %vm993_vm12, %v1124_v26, %v1117_v12  ;;  %v895_v41 = vrot.slane %v894_v57, 1  ;;  %v2352_v45 = vrot.slane %v2351_v25, 1 }
 0x149   :  { %v1383_v29 = vrot.slane %v1382_v17, 1  ;;  %v2343_v6 = vrot.slane %v2342_v11, 2  ;;  %v2763_v55 = vpop.permute.xlu0 %2762  ;;  %v1296_v50 = vpop.permute.xlu1 %1295  ;;  %v1138_v63 = vmax.f32 %v1136_v47, %v1137_v51  ;;  %v1377_v1 = vmax.f32 %v1375_v40, %v1376_v42 }
 0x14a   :  { %v2810_v54 = vadd.f32 %v2763_v55, %v2572_v5  ;;  %v4331_v30 = vpop.permute.xlu2 %521  ;;  %v2274_v16 = vrot.slane %v4327_v4, 1  ;;  %v1280_v49 = vrot.slane %v4314_v19, 3  ;;  %v882_v38 = vmax.f32 %v880_v20, %v881_v14  ;;  %v4337_v53 = vpop.f32.mrf.mxu2 }
 0x14b   :  { %v2344_v48 = vmax.f32 %v2342_v11, %v2343_v6  ;;  %v1145_v3 = vmax.f32 %v1143_v2, %v1144_v32  ;;  %v1384_v37 = vmax.f32 %v1382_v17, %v1383_v29  ;;  %v1240_v33 = vsel %vm995_vm13, %v1131_v28, %v1239_v52  ;;  %5748 = vst [vmem:[#allocation39_spill] sm:$0xff] %v4337_v53 }
 0x14c   :  { %v889_v34 = vmax.f32 %v887_v15, %v888_v22  ;;  %v996_v26 = vsel %vm995_vm13, %v875_v56, %v994_v24  ;;  %v2353_v62 = vmax.f32 %v2351_v25, %v2352_v45  ;;  %v2588_v47 = vsel %vm1110_vm11, %v2572_v5, -inf  ;;  %v4346_v15 = vpop.f32.mrf.mxu1 }
 0x14d   :  { %v2345_v58 = vrot.slane %v2344_v48, 1  ;;  %v5749_v40 = vrot.slane %v4196_v44, 2  ;;  %v896_v20 = vmax.f32 %v894_v57, %v895_v41  ;;  %5750 = vst [vmem:[#allocation40_spill] sm:$0xff] %v4346_v15  ;;  %v1480_v2 = vsel %vm997_vm14, %v1377_v1, %v4268_v27 }
 0x14e   :  { %v1241_v25 = vsel %vm997_vm14, %v1138_v63, %v1240_v33  ;;  %v4355_v12 = vsel %vm999_vm15, %v1384_v37, %v1480_v2  ;;  %v998_v51 = vsel %vm997_vm14, %v882_v38, %v996_v26  ;;  %v2589_v42 = vrot.slane %v2588_v47, 4 }
 0x14f   :  { %v2346_v11 = vmax.f32 %v2344_v48, %v2345_v58  ;;  %2550 = vrot.lane.b32.xlu1 %v5749_v40, %s3719_s12  ;;  %1307 = vrot.lane.b32.xlu0 %v1280_v49, %s3721_s0  ;;  %v4358_v57 = vsel %vm999_vm15, %v1145_v3, %v1241_v25  ;;  %v1000_v27 = vsel %vm999_vm15, %v889_v34, %v998_v51  ;;  %v2268_v24 = vrot.slane %v4346_v15, 1  ;;  %v4392_v25 = vpop.f32.mrf.mxu3 }
 0x150   :  { %2304 = vrot.lane.b32.xlu2 %v2274_v16, %s3720_s7  ;;  %v4367_v29 = vsel %vm5677_vm1, %v896_v20, %v1000_v27  ;;  %v2590_v52 = vmax.f32 %v2588_v47, %v2589_v42  ;;  %v2265_v48 = vrot.slane %v4249_v46, 1  ;;  %v2826_v16 = vsel %vm1349_vm8, %v2810_v54, -inf  ;;  %5753 = vst [vmem:[#allocation42_spill] sm:$0xff] %v4392_v25 }
 0x151   :  { %v4352_v5 = vsel %vm993_vm12, %v2353_v62, %v2346_v11  ;;  %v2545_v17 = vpop.permute.xlu1 %2544  ;;  %v1057_v56 = vpop.permute.xlu0 %1056  ;;  %v2827_v40 = vrot.slane %v2826_v16, 4 }
 0x152   :  { %v1099_v9 = vadd.f32 %v1057_v56, %v4259_v0  ;;  %v2281_v14 = vpop.permute.xlu2 %2280  ;;  %v2264_v0 = vrot.slane %v4210_v60, 1  ;;  %v4383_v38 = vpop.f32.mrf.mxu2  ;;  %v2591_v34 = vrot.slane %v2590_v52, 2 }
 0x153   :  { %v4364_v32 = vadd.f32 %v2281_v14, %v4162_v7  ;;  %5752 = vst [vmem:[#allocation41_spill] sm:$0xff] %v4383_v38  ;;  %v787_v42 = vrot.slane %v4383_v38, 1 }
 0x154   :  { %v1146_v6 = vsel %vm1110_vm11, %v1099_v9, -inf  ;;  %v1338_v55 = vadd.f32 %v1296_v50, %v1099_v9  ;;  %v310_v50 = vstv %s5751_s27  ;;  %s3167_s27 = sshll.u32 %s3728_s1, 4  ;;  %s3168_s27 = int_to_ptr.vmem [resolvable:$true] %s3167_s27 }
 0x155   :  { %v1147_v28 = vrot.slane %v1146_v6, 4  ;;  %v2354_v22 = vsel %vm854_vm10, %v4364_v32, -inf  ;;  %v311_v54 = vadd.f32 %v310_v50, %v4059_v10 }
 0x156   :  { %v1385_v41 = vsel %vm1349_vm8, %v1338_v55, -inf  ;;  %v2355_v45 = vrot.slane %v2354_v22, 4  ;;  %v2592_v55 = vmax.f32 %v2590_v52, %v2591_v34 }
 0x157   :  { %v1148_v63 = vmax.f32 %v1146_v6, %v1147_v28  ;;  %v1386_v1 = vrot.slane %v1385_v41, 4  ;;  %2284 = vrot.lane.b32.xlu1 %v2264_v0, %s3720_s7  ;;  %2292 = vrot.lane.b32.xlu0 %v2268_v24, %s3720_s7  ;;  %v783_v6 = vrot.slane %v4225_v23, 1  ;;  %v2275_v24 = vrot.slane %v4392_v25, 1 }
 0x158   :  { %v2356_v49 = vmax.f32 %v2354_v22, %v2355_v45  ;;  %2286 = vrot.lane.b32.xlu2 %v2265_v48, %s3720_s7  ;;  %v2828_v28 = vmax.f32 %v2826_v16, %v2827_v40  ;;  %v3255_v48 = vmul.f32 -1.442695, %v311_v54  ;;  %v2593_v16 = vrot.slane %v2592_v55, 1 }
 0x159   :  { %v1149_v3 = vrot.slane %v1148_v63, 2  ;;  %v1387_v37 = vmax.f32 %v1385_v41, %v1386_v1  ;;  %v2527_v58 = vpop.permute.xlu1 %2526  ;;  %v2297_v33 = vpop.permute.xlu0 %2296 }
 0x15a   :  { %v2357_v26 = vrot.slane %v2356_v49, 2  ;;  %v2573_v62 = vadd.f32 %v2527_v58, %v4262_v13  ;;  %v4387_v11 = vadd.f32 %v2297_v33, %v4113_v35  ;;  %v4389_v47 = vpop.permute.xlu2 %2766  ;;  %v2829_v34 = vrot.slane %v2828_v28, 2 }
 0x15b   :  { %v1150_v20 = vmax.f32 %v1148_v63, %v1149_v3  ;;  %v1388_v2 = vrot.slane %v1387_v37, 2  ;;  %v312_v3 = vadd.f32 %v310_v50, %v4143_v61  ;;  %3580 = vpow2.f32 %v3255_v48 }
 0x15c   :  { %v2358_v56 = vmax.f32 %v2356_v49, %v2357_v26  ;;  %v2595_v51 = vsel %vm1110_vm11, %v2573_v62, -inf  ;;  %v4397_v9 = vadd.f32 %v2545_v17, %v4387_v11  ;;  %v4404_v17 = vpop.f32.mrf.mxu1 }
 0x15d   :  { %v1151_v13 = vrot.slane %v1150_v20, 1  ;;  %v1389_v14 = vmax.f32 %v1387_v37, %v1388_v2  ;;  %v2596_v27 = vrot.slane %v2595_v51, 4  ;;  %5754 = vst [vmem:[#allocation43_spill] sm:$0xff] %v4404_v17  ;;  %v2517_v61 = vrot.slane %v4404_v17, 2 }
 0x15e   :  { %v2359_v10 = vrot.slane %v2358_v56, 1  ;;  %v1040_v2 = vrot.slane %v4283_v39, 2 }
 0x15f   :  { %v1390_v22 = vrot.slane %v1389_v14, 1  ;;  %v2597_v0 = vmax.f32 %v2595_v51, %v2596_v27  ;;  %808 = vrot.lane.b32.xlu1 %v783_v6, %s3720_s7  ;;  %v1152_v41 = vmax.f32 %v1150_v20, %v1151_v13  ;;  %816 = vrot.lane.b32.xlu0 %v787_v42, %s3720_s7  ;;  %v1752_v51 = vpop.f32.mrf.mxu0  ;;  %v785_v42 = vrot.slane %v4314_v19, 1 }
 0x160   :  { %v2360_v45 = vmax.f32 %v2358_v56, %v2359_v10  ;;  %2306 = vrot.lane.b32.xlu2 %v2275_v24, %s3720_s7  ;;  %v3256_v56 = vmul.f32 -1.442695, %v312_v3  ;;  %v2594_v13 = vmax.f32 %v2592_v55, %v2593_v16  ;;  %v1757_v55 = vstv %s5612_s14 }
 0x161   :  { %v1391_v63 = vmax.f32 %v1389_v14, %v1390_v22  ;;  %v2598_v1 = vrot.slane %v2597_v0, 2  ;;  %v2765_v52 = vpop.permute.xlu1 %2764  ;;  %v2783_v49 = vpop.permute.xlu0 %2782  ;;  %v2266_v16 = vrot.slane %v4298_v59, 1 }
 0x162   :  { %v4409_v37 = vsel %vm995_vm13, %v2360_v45, %v4352_v5  ;;  %v2811_v58 = vadd.f32 %v2765_v52, %v2573_v62  ;;  %v4411_v33 = vpop.permute.xlu2 %1060  ;;  %v4414_v40 = vadd.f32 %v2783_v49, %v4397_v9  ;;  %v4424_v5 = vsel %vm5677_vm1, %v1152_v41, %v4358_v57  ;;  %v3581_v41 = vpop.eup %3580 }
 0x163   :  { %5755 = vst [vmem:[#allocation44_spill] sm:$0xff] %v4409_v37  ;;  %v2599_v26 = vmax.f32 %v2597_v0, %v2598_v1  ;;  %v4418_v54 = vsel %vm5677_vm1, %v1391_v63, %v4355_v12  ;;  %v2830_v12 = vmax.f32 %v2828_v28, %v2829_v34  ;;  %v1753_v57 = vadd.f32 %v1752_v51, %v4080_v18 }
 0x164   :  { %v2833_v20 = vsel %vm1349_vm8, %v2811_v58, -inf  ;;  %3582 = vpow2.f32 %v3256_v56  ;;  %v1798_v18 = vstv %s5613_s15  ;;  %v2755_v1 = vrot.slane %v4404_v17, 3 }
 0x165   :  { %v2600_v50 = vrot.slane %v2599_v26, 1  ;;  %v2834_v62 = vrot.slane %v2833_v20, 4  ;;  %v2831_v45 = vrot.slane %v2830_v12, 1  ;;  %v1758_v52 = vadd.f32 %v1757_v55, %v1753_v57 }
 0x166   :  { %v4447_v58 = vadd.f32 1.0, %v3581_v41  ;;  %v1041_v34 = vrot.slane %v4314_v19, 2 }
 0x167   :  { %v2601_v14 = vmax.f32 %v2599_v26, %v2600_v50  ;;  %v2835_v27 = vmax.f32 %v2833_v20, %v2834_v62  ;;  %1066 = vrot.lane.b32.xlu1 %v1040_v2, %s3719_s12  ;;  %2542 = vrot.lane.b32.xlu0 %v2517_v61, %s3719_s12  ;;  %v1799_v26 = vadd.f32 %v1798_v18, %v1753_v57  ;;  %v1754_v62 = vpop.f32.mrf.mxu0  ;;  %v3377_v56 = vmul.f32 -1.442695, %v1758_v52 }
 0x168   :  { %812 = vrot.lane.b32.xlu2 %v785_v42, %s3720_s7  ;;  %v2832_v20 = vmax.f32 %v2830_v12, %v2831_v45  ;;  %3584 = vrcp.f32 %v4447_v58  ;;  %v5756_v45 = vld [vmem:[#allocation14_spill] sm:$0xff]  ;;  %vm326_vm3 = vweird.f32 %v4447_v58 }
 0x169   :  { %v4433_v6 = vsel %vm993_vm12, %v2601_v14, %v2594_v13  ;;  %v2836_v10 = vrot.slane %v2835_v27, 2  ;;  %v1298_v24 = vpop.permute.xlu0 %1297  ;;  %v803_v22 = vpop.permute.xlu1 %802  ;;  %3586 = vpow2.f32 %v3377_v56 }
 0x16a   :  { %v844_v28 = vadd.f32 %v803_v22, %v4164_v8  ;;  %v4439_v0 = vpop.permute.xlu2 %1299  ;;  %v3583_v2 = vpop.eup %3582  ;;  %v5658_v8 = vmov 8  }
 0x16b   :  { %v2837_v48 = vmax.f32 %v2835_v27, %v2836_v10  ;;  %v3379_v10 = vmul.f32 -1.442695, %v1799_v26  ;;  %v4466_v41 = vadd.f32 1.0, %v3583_v2  ;;  %3527 = vset.pattern.permute.xlu0 %v5658_v8  ;;  %3525 = vset.pattern.permute.xlu1 %v5658_v8 }
 0x16c   :  { %v897_v63 = vsel %vm854_vm10, %v844_v28, -inf  ;;  %3526 = vset.pattern.permute.xlu2 %v5658_v8 }
 0x16d   :  { %v2838_v49 = vrot.slane %v2837_v48, 1  ;;  %v898_v3 = vrot.slane %v897_v63, 4  ;;  %3588 = vpow2.f32 %v3379_v10  ;;  %vm341_vm7 = vweird.f32 %v4466_v41 }
 0x16e   :  { %3590 = vrcp.f32 %v4466_v41 }
 0x16f   :  { %v2839_v61 = vmax.f32 %v2837_v48, %v2838_v49  ;;  %v899_v50 = vmax.f32 %v897_v63, %v898_v3  ;;  %2288 = vrot.lane.b32.xlu1 %v2266_v16, %s3720_s7  ;;  %2780 = vrot.lane.b32.xlu0 %v2755_v1, %s3721_s0  ;;  %v1755_v48 = vadd.f32 %v1754_v62, %v5756_v45  ;;  %v2267_v3 = vrot.slane %v4316_v21, 1 }
 0x170   :  { %1068 = vrot.lane.b32.xlu2 %v1041_v34, %s3719_s12  ;;  %v2750_v34 = vrot.slane %v4210_v60, 3 }
 0x171   :  { %v4458_v51 = vsel %vm993_vm12, %v2839_v61, %v2832_v20  ;;  %v900_v42 = vrot.slane %v899_v50, 2  ;;  %v2785_v13 = vpop.permute.xlu0 %2784  ;;  %v1059_v14 = vpop.permute.xlu1 %1058 }
 0x172   :  { %v4462_v12 = vadd.f32 %v2785_v13, %v4294_v36  ;;  %v1100_v27 = vadd.f32 %v1059_v14, %v844_v28  ;;  %v4464_v57 = vpop.permute.xlu2 %2300  ;;  %v786_v28 = vrot.slane %v4337_v53, 1 }
 0x173   :  { %v901_v22 = vmax.f32 %v899_v50, %v900_v42  ;;  %v4475_v50 = vpop.eup %3584 }
 0x174   :  { %v1153_v63 = vsel %vm1110_vm11, %v1100_v27, -inf  ;;  %v1339_v1 = vadd.f32 %v1298_v24, %v1100_v27  ;;  %v1759_v24 = vadd.f32 %v1757_v55, %v1755_v48  ;;  %v3587_v10 = vpop.eup %3586  ;;  %v322_v45 = vmul.f32 %v4475_v50, %v4447_v58 }
 0x175   :  { %v902_v52 = vrot.slane %v901_v22, 1  ;;  %v1154_v49 = vrot.slane %v1153_v63, 4  ;;  %vm327_vm4 = vweird.f32 %v4475_v50 }
 0x176   :  { %v1392_v16 = vsel %vm1349_vm8, %v1339_v1, -inf  ;;  %v1800_v1 = vadd.f32 %v1798_v18, %v1755_v48  ;;  %vm4566_vm6 = vmor %vm326_vm3, %vm327_vm4 }
 0x177   :  { %v903_v26 = vmax.f32 %v901_v22, %v902_v52  ;;  %v1155_v20 = vmax.f32 %v1153_v63, %v1154_v49  ;;  %v1393_v61 = vrot.slane %v1392_v16, 4  ;;  %2290 = vrot.lane.b32.xlu1 %v2267_v3, %s3720_s7  ;;  %2770 = vrot.lane.b32.xlu0 %v2750_v34, %s3721_s0  ;;  %v3378_v63 = vmul.f32 -1.442695, %v1759_v24  ;;  %v3589_v52 = vpop.eup %3588 }
 0x178   :  { %814 = vrot.lane.b32.xlu2 %v786_v28, %s3720_s7  ;;  %v1042_v28 = vrot.slane %v4337_v53, 2  ;;  %v4498_v34 = vadd.f32 1.0, %v3587_v10  ;;  %v4504_v48 = vadd.f32 1.0, %v3589_v52 }
 0x179   :  { %v1156_v62 = vrot.slane %v1155_v20, 2  ;;  %v1394_v2 = vmax.f32 %v1392_v16, %v1393_v61  ;;  %v2529_v56 = vpop.permute.xlu0 %2528  ;;  %v4479_v42 = vpop.permute.xlu1 %500  ;;  %v4483_v13 = vsel %vm5669_vm2, %v903_v26, %v4367_v29  ;;  %v2523_v61 = vrot.slane %v4392_v25, 2 }
 0x17a   :  { %5757 = vst [vmem:[#allocation14_spill] sm:$0xff] %v4483_v13  ;;  %v2574_v14 = vadd.f32 %v2529_v56, %v4364_v32  ;;  %v4486_v27 = vpop.permute.xlu2 %542  ;;  %3592 = vpow2.f32 %v3378_v63  ;;  %v1779_v7 = vand.u32 2147483648, %v4498_v34  ;;  %vm1773_vm3 = vweird.f32 %v4498_v34  ;;  %v5786_v13 = vld [vmem:[#allocation33_spill] sm:$0xff] }
 0x17b   :  { %v1157_v55 = vmax.f32 %v1155_v20, %v1156_v62  ;;  %v1395_v22 = vrot.slane %v1394_v2, 2  ;;  %v2516_v20 = vrot.slane %v4346_v15, 2  ;;  %3594 = vrcp.f32 %v4498_v34 }
 0x17c   :  { %v2602_v29 = vsel %vm1110_vm11, %v2574_v14, -inf  ;;  %v2812_v32 = vadd.f32 %v4389_v47, %v2574_v14  ;;  %3596 = vrcp.f32 %v4504_v48  ;;  %v5796_v19 = vand.u32 2147483647, %v4498_v34 }
 0x17d   :  { %v1158_v49 = vrot.slane %v1157_v55, 1  ;;  %v1396_v3 = vmax.f32 %v1394_v2, %v1395_v22  ;;  %v2603_v16 = vrot.slane %v2602_v29, 4  ;;  %v4508_v2 = vpop.eup %3590 }
 0x17e   :  { %v2840_v26 = vsel %vm1349_vm8, %v2812_v32, -inf  ;;  %vm342_vm9 = vweird.f32 %v4508_v2 }
 0x17f   :  { %v1159_v24 = vmax.f32 %v1157_v55, %v1158_v49  ;;  %v2604_v18 = vmax.f32 %v2602_v29, %v2603_v16  ;;  %1070 = vrot.lane.b32.xlu1 %v1042_v28, %s3719_s12  ;;  %v1397_v47 = vrot.slane %v1396_v3, 1  ;;  %v2841_v62 = vrot.slane %v2840_v26, 4  ;;  %2554 = vrot.lane.b32.xlu0 %v2523_v61, %s3719_s12 }
 0x180   :  { %2540 = vrot.lane.b32.xlu2 %v2516_v20, %s3719_s12  ;;  %v323_v55 = vsub.f32 1.0, %v322_v45  ;;  %v3380_v29 = vmul.f32 -1.442695, %v1800_v1  ;;  %v330_v16 = vand.u32 2147483647, %v4447_v58  ;;  %v1281_v45 = vrot.slane %v4337_v53, 3 }
 0x181   :  { %v2605_v56 = vrot.slane %v2604_v18, 2  ;;  %v4510_v14 = vpop.permute.xlu1 %507  ;;  %v4512_v10 = vpop.permute.xlu0 %806  ;;  %v4516_v22 = vsel %vm5669_vm2, %v1159_v24, %v4424_v5  ;;  %v2842_v32 = vmax.f32 %v2840_v26, %v2841_v62  ;;  %v1398_v28 = vmax.f32 %v1396_v3, %v1397_v47 }
 0x182   :  { %v4519_v52 = vpop.permute.xlu2 %563  ;;  %v324_v61 = vmul.f32 %v4475_v50, %v323_v55  ;;  %v332_v5 = vand.u32 2147483648, %v4447_v58  ;;  %3598 = vpow2.f32 %v3380_v29  ;;  %v2754_v1 = vrot.slane %v4346_v15, 3  ;;  %v4537_v55 = vpop.f32.mrf.mxu2 }
 0x183   :  { %5758 = vst [vmem:[#allocation45_spill] sm:$0xff] %v4519_v52  ;;  %v2606_v49 = vmax.f32 %v2604_v18, %v2605_v56  ;;  %v2843_v63 = vrot.slane %v2842_v32, 2  ;;  %v2752_v26 = vrot.slane %v4298_v59, 3  ;;  %v3593_v18 = vpop.eup %3592  ;;  %v337_v3 = vmul.f32 %v4508_v2, %v4466_v41 }
 0x184   :  { %v4533_v47 = vpop.eup %3594  ;;  %5759 = vst [vmem:[#allocation46_spill] sm:$0xff] %v4537_v55  ;;  %v4541_v29 = vsel %vm5669_vm2, %v1398_v28, %v4418_v54  ;;  %vm4552_vm5 = vcmp.eq.f32.partialorder %v330_v16, 8.507059e+37  ;;  %v4558_v35 = vadd.f32 1.0, %v3593_v18  ;;  %v5768_v18 = vld [vmem:[#allocation21_spill] sm:$0xff]  ;;  %v1282_v16 = vrot.slane %v4383_v38, 3  ;;  %vm4675_vm2 = vmor %vm341_vm7, %vm342_vm9 }
 0x185   :  { %v2607_v20 = vrot.slane %v2606_v49, 1  ;;  %v2844_v24 = vmax.f32 %v2842_v32, %v2843_v63  ;;  %vm1774_vm4 = vweird.f32 %v4533_v47  ;;  %vm645_vm7 = vcmask 130048  }
 0x186   :  { %3600 = vrcp.f32 %v4558_v35 }
 0x187   :  { %v2608_v62 = vmax.f32 %v2606_v49, %v2607_v20  ;;  %1309 = vrot.lane.b32.xlu1 %v1281_v45, %s3721_s0  ;;  %v2845_v56 = vrot.slane %v2844_v24, 1  ;;  %2774 = vrot.lane.b32.xlu0 %v2752_v26, %s3721_s0  ;;  %v325_v20 = vadd.f32 %v4475_v50, %v324_v61  ;;  %v4556_v26 = vpop.eup %3596  ;;  %v347_v61 = vand.u32 2147483648, %v4466_v41 }
 0x188   :  { %2778 = vrot.lane.b32.xlu2 %v2754_v1, %s3721_s0  ;;  %v333_v1 = vor.u32 1.1754944e-38, %v332_v5  ;;  %v1769_v5 = vmul.f32 %v4533_v47, %v4498_v34  ;;  %v788_v45 = vrot.slane %v4537_v55, 1  ;;  %vm1815_vm0 = vweird.f32 %v4556_v26 }
 0x189   :  { %v4545_v32 = vsel %vm995_vm13, %v2608_v62, %v4433_v6  ;;  %v4547_v49 = vpop.permute.xlu1 %535  ;;  %v4549_v63 = vpop.permute.xlu0 %2302  ;;  %v2846_v54 = vmax.f32 %v2844_v24, %v2845_v56  ;;  %v338_v24 = vsub.f32 1.0, %v337_v3  ;;  %v1043_v3 = vrot.slane %v4383_v38, 2  ;;  %v4603_v6 = vld [vmem:[%s5770_s25] ss:$0 sm:$0xff] }
 0x18a   :  { %5760 = vst [vmem:[#allocation47_spill] sm:$0xff] %v4545_v32  ;;  %v4560_v28 = vpop.permute.xlu2 %584  ;;  %v3599_v56 = vpop.eup %3598  ;;  %v1810_v62 = vmul.f32 %v4556_v26, %v4504_v48  ;;  %v329_v37 = vsel %vm4566_vm6, %v4475_v50, %v325_v20  ;;  %v1770_v58 = vsub.f32 1.0, %v1769_v5  ;;  %v5771_v50 = vld [vmem:[#allocation13_spill] sm:$0xff]  ;;  %v5772_v20 = vld [vmem:[#allocation35_spill] sm:$0xff]  ;;  %v1820_v38 = vand.u32 2147483648, %v4504_v48 }
 0x18b   :  { %5761 = vst [vmem:[#allocation48_spill] sm:$0xff] %v4547_v49  ;;  %v4583_v53 = vsel %vm995_vm13, %v2846_v54, %v4458_v51  ;;  %v2761_v51 = vrot.slane %v4392_v25, 3  ;;  %v4596_v54 = vor.u32 1.1754944e-38, %v347_v61  ;;  %v4598_v15 = vadd.f32 1.0, %v3599_v56  ;;  %v5773_v61 = vld [vmem:[#allocation17_spill] sm:$0xff]  ;;  %v4616_v56 = vpop.f32.mrf.mxu2 }
 0x18c   :  { %5762 = vst [vmem:[#allocation49_spill] sm:$0xff] %v4549_v63  ;;  %v597_v8 = vmul.f32 %v5772_v20, %v5771_v50  ;;  %v339_v23 = vmul.f32 %v4508_v2, %v338_v24  ;;  %v4610_v25 = vor.u32 1.1754944e-38, %v1779_v7  ;;  %v598_v5 = vmul.f32 %v4331_v30, %v5773_v61  ;;  %v4641_v30 = vpop.eup %3600 }
 0x18d   :  { %5765 = vst [vmem:[#allocation50_spill] sm:$0xff] %v4560_v28  ;;  %v4620_v50 = vsel %vm4552_vm5, %v333_v1, %v329_v37  ;;  %v1811_v24 = vsub.f32 1.0, %v1810_v62  ;;  %v1771_v1 = vmul.f32 %v4533_v47, %v1770_v58  ;;  %3602 = vrcp.f32 %v4598_v15 }
 0x18e   :  { %5769 = vst [vmem:[#allocation21_spill] sm:$0xff] %v4583_v53  ;;  %v617_v62 = vadd.f32 %v4603_v6, %v597_v8  ;;  %v4639_v7 = vadd.f32 %v4508_v2, %v339_v23  ;;  %v1045_v58 = vrot.slane %v4616_v56, 2  ;;  %v2269_v8 = vrot.slane %v4404_v17, 1 }
 0x18f   :  { %1072 = vrot.lane.b32.xlu1 %v1043_v3, %s3719_s12  ;;  %2792 = vrot.lane.b32.xlu0 %v2761_v51, %s3721_s0  ;;  %5774 = vst [vmem:[#allocation13_spill] sm:$0xff] %v4616_v56  ;;  %v5779_v51 = vld [vmem:[#allocation24_spill] sm:$0xff]  ;;  %v1812_v23 = vmul.f32 %v4556_v26, %v1811_v24  ;;  %vm1814_vm5 = vweird.f32 %v4504_v48  ;;  %v5780_v32 = vand.u32 2147483647, %v4466_v41  ;;  %v1784_v24 = vmul.f32 %v4641_v30, %v4558_v35  ;;  %v5785_v41 = vld [vmem:[#allocation25_spill] sm:$0xff] }
 0x190   :  { %1311 = vrot.lane.b32.xlu2 %v1282_v16, %s3721_s0  ;;  %5775 = vst [vmem:[#allocation35_spill] sm:$0xff] %v4620_v50  ;;  %v1794_v16 = vand.u32 2147483648, %v4558_v35  ;;  %3604 = vtanh.f32 %v617_v62  ;;  %vm1789_vm1 = vweird.f32 %v4641_v30 }
 0x191   :  { %v805_v3 = vpop.permute.xlu1 %804  ;;  %v4622_v20 = vpop.permute.xlu0 %2532  ;;  %vm4662_vm6 = vcmp.eq.f32.partialorder %v5780_v32, 8.507059e+37  ;;  %v4680_v32 = vadd.f32 %v4533_v47, %v1771_v1  ;;  %v4696_v1 = vadd.f32 %v4512_v10, %v4187_v31  ;;  %v1785_v28 = vsub.f32 1.0, %v1784_v24 }
 0x192   :  { %5776 = vst [vmem:[#allocation17_spill] sm:$0xff] %v4622_v20  ;;  %v4628_v61 = vpop.permute.xlu2 %2768  ;;  %v4631_v60 = vadd.f32 %v805_v3, %v5779_v51  ;;  %v618_v3 = vadd.f32 %v4603_v6, %v598_v5  ;;  %v4653_v20 = vor.u32 1.1754944e-38, %v1820_v38  ;;  %v4656_v5 = vor.u32 1.1754944e-38, %v1794_v16 }
 0x193   :  { %5778 = vst [vmem:[#allocation51_spill] sm:$0xff] %v4628_v61  ;;  %v1835_v38 = vand.u32 2147483648, %v4598_v15  ;;  %v4688_v62 = vpop.eup %3602  ;;  %v1833_v61 = vand.u32 2147483647, %v4598_v15  ;;  %v789_v51 = vrot.slane %v4616_v56, 1 }
 0x194   :  { %v1101_v37 = vadd.f32 %v4411_v33, %v4631_v60  ;;  %3606 = vtanh.f32 %v618_v3 }
 0x196   :  { %v1160_v33 = vsel %vm1110_vm11, %v1101_v37, -inf  ;;  %v1340_v53 = vadd.f32 %v4439_v0, %v1101_v37  ;;  %v344_v37 = vsel %vm4675_vm2, %v4508_v2, %v4639_v7  ;;  %v2417_v0 = vsel %vm854_vm10, %v5786_v13, -inf  ;;  %vm4721_vm2 = vmor %vm1773_vm3, %vm1774_vm4 }
 0x197   :  { %2294 = vrot.lane.b32.xlu1 %v2269_v8, %s3720_s7  ;;  %v1161_v16 = vrot.slane %v1160_v33, 4  ;;  %1076 = vrot.lane.b32.xlu0 %v1045_v58, %s3719_s12  ;;  %v4692_v8 = vadd.f32 %v4464_v57, %v5785_v41  ;;  %v4700_v58 = vadd.f32 %v4556_v26, %v1812_v23  ;;  %v2665_v2 = vsel %vm1110_vm11, %v4294_v36, -inf  ;;  %vm4737_vm3 = vmor %vm1814_vm5, %vm1815_vm0 }
 0x198   :  { %818 = vrot.lane.b32.xlu2 %v788_v45, %s3720_s7  ;;  %v1399_v3 = vsel %vm1349_vm8, %v1340_v53, -inf  ;;  %v1283_v23 = vrot.slane %v4537_v55, 3  ;;  %v1044_v13 = vrot.slane %v4537_v55, 2  ;;  %v1284_v36 = vrot.slane %v4616_v56, 3 }
 0x199   :  { %v2549_v45 = vpop.permute.xlu1 %2548  ;;  %v1162_v7 = vmax.f32 %v1160_v33, %v1161_v16  ;;  %v1400_v17 = vrot.slane %v1399_v3, 4  ;;  %v4706_v39 = vpop.permute.xlu0 %1064  ;;  %v2418_v16 = vrot.slane %v2417_v0, 4  ;;  %vm1788_vm4 = vweird.f32 %v4558_v35 }
 0x19a   :  { %v1063_v57 = vpop.permute.xlu2 %1062  ;;  %5787 = vst [vmem:[#allocation33_spill] sm:$0xff] %v4706_v39  ;;  %v4709_v10 = vadd.f32 %v2549_v45, %v4692_v8  ;;  %v3605_v33 = vpop.eup %3604  ;;  %v2666_v45 = vrot.slane %v2665_v2, 4  ;;  %vm4766_vm0 = vcmp.eq.f32.partialorder %v5796_v19, 8.507059e+37 }
 0x19b   :  { %v4712_v53 = vadd.f32 %v1063_v57, %v4696_v1  ;;  %v1163_v63 = vrot.slane %v1162_v7, 2  ;;  %v1401_v49 = vmax.f32 %v1399_v3, %v1400_v17  ;;  %v5791_v57 = vand.u32 2147483647, %v4504_v48  ;;  %v3607_v39 = vpop.eup %3606 }
 0x19c   :  { %5788 = vst [vmem:[#allocation52_spill] sm:$0xff] %v4709_v10  ;;  %v1825_v3 = vmul.f32 %v4688_v62, %v4598_v15  ;;  %v1817_v48 = vsel %vm4737_vm3, %v4556_v26, %v4700_v58  ;;  %v2419_v26 = vmax.f32 %v2417_v0, %v2418_v16  ;;  %v2667_v50 = vmax.f32 %v2665_v2, %v2666_v45  ;;  %v5803_v2 = vld [vmem:[#allocation11_spill] sm:$0xff] }
 0x19d   :  { %vm4727_vm9 = vcmp.eq.f32.partialorder %v5791_v57, 8.507059e+37  ;;  %v1164_v10 = vmax.f32 %v1162_v7, %v1163_v63  ;;  %v1402_v55 = vrot.slane %v1401_v49, 2  ;;  %v4742_v57 = vor.u32 1.1754944e-38, %v1835_v38 }
 0x19e   :  { %v4758_v63 = vsel %vm4662_vm6, %v4596_v54, %v344_v37  ;;  %v1786_v38 = vmul.f32 %v4641_v30, %v1785_v28  ;;  %v674_v7 = vsel %vm645_vm7, %v3605_v33, -inf  ;;  %v681_v54 = vsel %vm645_vm7, %v3607_v39, -inf }
 0x19f   :  { %1313 = vrot.lane.b32.xlu1 %v1283_v23, %s3721_s0  ;;  %1315 = vrot.lane.b32.xlu0 %v1284_v36, %s3721_s0  ;;  %v1403_v52 = vmax.f32 %v1401_v49, %v1402_v55  ;;  %v1165_v23 = vrot.slane %v1164_v10, 1  ;;  %v1826_v28 = vsub.f32 1.0, %v1825_v3  ;;  %v2410_v58 = vsel %vm854_vm10, %v4387_v11, -inf }
 0x1a0   :  { %1074 = vrot.lane.b32.xlu2 %v1044_v13, %s3719_s12  ;;  %v2658_v55 = vsel %vm1110_vm11, %v4397_v9, -inf  ;;  %v5800_v36 = vand.u32 2147483647, %v4558_v35  ;;  %v675_v39 = vrot.slane %v674_v7, 4  ;;  %v595_v33 = vmul.f32 %v4479_v42, %v5803_v2 }
 0x1a1   :  { %v4771_v37 = vpop.permute.xlu1 %556  ;;  %v4777_v13 = vpop.permute.xlu0 %1303  ;;  %v1404_v19 = vrot.slane %v1403_v52, 1  ;;  %v1166_v34 = vmax.f32 %v1164_v10, %v1165_v23  ;;  %vm1005_vm6 = vcmask 1047559   ;;  %v682_v9 = vrot.slane %v681_v54, 4 }
 0x1a2   :  { %5799 = vst [vmem:[#allocation53_spill] sm:$0xff] %v4771_v37  ;;  %v1302_v49 = vpop.permute.xlu2 %1301  ;;  %vm4781_vm5 = vcmp.eq.f32.partialorder %v5800_v36, 8.507059e+37  ;;  %v2896_v16 = vsel %vm1349_vm8, %v4414_v40, -inf  ;;  %v1787_v3 = vadd.f32 %v4641_v30, %v1786_v38  ;;  %v2411_v23 = vrot.slane %v2410_v58, 4 }
 0x1a3   :  { %v4788_v11 = vadd.f32 %v1302_v49, %v4712_v53  ;;  %v1405_v45 = vmax.f32 %v1403_v52, %v1404_v19  ;;  %v4794_v10 = vsel %vm1005_vm6, %v1166_v34, %v4516_v22  ;;  %v2659_v36 = vrot.slane %v2658_v55, 4 }
 0x1a4   :  { %v2514_v37 = vrot.slane %v4298_v59, 2  ;;  %vm1829_vm3 = vweird.f32 %v4598_v15  ;;  %v2522_v42 = vrot.slane %v4327_v4, 2  ;;  %v1822_v49 = vsel %vm4727_vm9, %v4653_v20, %v1817_v48  ;;  %vm4816_vm9 = vmor %vm1788_vm4, %vm1789_vm1 }
 0x1a5   :  { %v1827_v40 = vmul.f32 %v4688_v62, %v1826_v28  ;;  %v4806_v22 = vsel %vm1005_vm6, %v1405_v45, %v4541_v29  ;;  %v2420_v52 = vrot.slane %v2419_v26, 2  ;;  %v2897_v38 = vrot.slane %v2896_v16, 4 }
 0x1a6   :  { %v2903_v19 = vsel %vm1349_vm8, %v4462_v12, -inf  ;;  %v615_v34 = vadd.f32 %v4603_v6, %v595_v33  ;;  %v2668_v17 = vrot.slane %v2667_v50, 2  ;;  %v676_v29 = vmax.f32 %v674_v7, %v675_v39 }
 0x1a7   :  { %2536 = vrot.lane.b32.xlu1 %v2514_v37, %s3719_s12  ;;  %v683_v48 = vmax.f32 %v681_v54, %v682_v9  ;;  %v2424_v28 = vsel %vm854_vm10, %v4692_v8, -inf  ;;  %2454 = vperm.xlu0 %3527, %v1822_v49   ;;  %v1791_v12 = vsel %vm4816_vm9, %v4641_v30, %v1787_v3  ;;  %v2412_v37 = vmax.f32 %v2410_v58, %v2411_v23 }
 0x1a8   :  { %2552 = vrot.lane.b32.xlu2 %v2522_v42, %s3719_s12  ;;  %v2660_v2 = vmax.f32 %v2658_v55, %v2659_v36  ;;  %v601_v35 = vmul.f32 %v4486_v27, %v4187_v31  ;;  %vm4830_vm1 = vcmp.eq.f32.partialorder %v1833_v61, 8.507059e+37  ;;  %v2904_v54 = vrot.slane %v2903_v19, 4 }
 0x1a9   :  { %v4828_v33 = vpop.permute.xlu1 %577  ;;  %v4836_v39 = vpop.permute.xlu0 %2534  ;;  %v1828_v9 = vadd.f32 %v4688_v62, %v1827_v40  ;;  %vm1830_vm4 = vweird.f32 %v4688_v62  ;;  %v5808_v31 = vsel %vm4721_vm2, %v4533_v47, %v4680_v32  ;;  %v2421_v30 = vmax.f32 %v2419_v26, %v2420_v52 }
 0x1aa   :  { %v4834_v8 = vpop.permute.xlu2 %2304  ;;  %v4848_v27 = vsel %vm4766_vm0, %v4610_v25, %v5808_v31  ;;  %v2898_v61 = vmax.f32 %v2896_v16, %v2897_v38  ;;  %v2425_v58 = vrot.slane %v2424_v28, 4  ;;  %3608 = vtanh.f32 %v615_v34  ;;  %vm4862_vm2 = vmor %vm1829_vm3, %vm1830_vm4  ;;  %v5813_v38 = vld [vmem:[#allocation16_spill] sm:$0xff] }
 0x1ab   :  { %5809 = vst [vmem:[#allocation11_spill] sm:$0xff] %v4848_v27  ;;  %v2669_v55 = vmax.f32 %v2667_v50, %v2668_v17  ;;  %v677_v45 = vrot.slane %v676_v29, 2  ;;  %v684_v3 = vrot.slane %v683_v48, 2  ;;  %v4853_v23 = vsel %vm4781_vm5, %v4656_v5, %v1791_v12 }
 0x1ac   :  { %5810 = vst [vmem:[#allocation54_spill] sm:$0xff] %v4853_v23  ;;  %v2413_v24 = vrot.slane %v2412_v37, 2  ;;  %v2661_v36 = vrot.slane %v2660_v2, 2  ;;  %v621_v47 = vadd.f32 %v4603_v6, %v601_v35  ;;  %v2758_v32 = vrot.slane %v5785_v41, 3 }
 0x1ad   :  { %v2905_v25 = vmax.f32 %v2903_v19, %v2904_v54  ;;  %v2422_v0 = vrot.slane %v2421_v30, 1  ;;  %v2899_v16 = vrot.slane %v2898_v61, 2  ;;  %v2426_v42 = vmax.f32 %v2424_v28, %v2425_v58 }
 0x1ae   :  { %v1832_v49 = vsel %vm4862_vm2, %v4688_v62, %v1828_v9  ;;  %v2670_v40 = vrot.slane %v2669_v55, 1  ;;  %v678_v52 = vmax.f32 %v676_v29, %v677_v45  ;;  %v685_v15 = vmax.f32 %v683_v48, %v684_v3 }
 0x1af   :  { %2786 = vrot.lane.b32.xlu1 %v2758_v32, %s3721_s0  ;;  %3528 = vset.pattern.permute.xlu0 %v5813_v38  ;;  %v2414_v20 = vmax.f32 %v2412_v37, %v2413_v24  ;;  %v2662_v17 = vmax.f32 %v2660_v2, %v2661_v36  ;;  %3610 = vtanh.f32 %v621_v47  ;;  %v2906_v35 = vrot.slane %v2905_v25, 2 }
 0x1b0   :  { %820 = vrot.lane.b32.xlu2 %v789_v51, %s3720_s7  ;;  %v3609_v34 = vpop.eup %3608  ;;  %v2751_v29 = vrot.slane %v4249_v46, 3  ;;  %v4885_v9 = vsel %vm4830_vm1, %v4742_v57, %v1832_v49  ;;  %v4887_v37 = vmax.f32 %v2421_v30, %v2422_v0  ;;  %v2900_v2 = vmax.f32 %v2898_v61, %v2899_v16  ;;  %v5816_v51 = vld [vmem:[#allocation12_spill] sm:$0xff]  ;;  %s3723_s7 = smov 72  }
 0x1b1   :  { %v2283_v28 = vpop.permute.xlu1 %2282  ;;  %v4878_v62 = vpop.permute.xlu0 %810  ;;  %v2427_v31 = vrot.slane %v2426_v42, 2  ;;  %v911_v58 = vsel %vm854_vm10, %v4696_v1, -inf  ;;  %v4891_v45 = vmax.f32 %v2669_v55, %v2670_v40  ;;  %v679_v3 = vrot.slane %v678_v52, 1 }
 0x1b2   :  { %v4876_v54 = vpop.permute.xlu2 %2286  ;;  %5814 = vst [vmem:[#allocation16_spill] sm:$0xff] %v4887_v37  ;;  %v686_v24 = vrot.slane %v685_v15, 1  ;;  %v660_v36 = vsel %vm645_vm7, %v3609_v34, -inf  ;;  %v2415_v47 = vrot.slane %v2414_v20, 1  ;;  %v2663_v32 = vrot.slane %v2662_v17, 1 }
 0x1b3   :  { %5815 = vst [vmem:[#allocation55_spill] sm:$0xff] %v4891_v45  ;;  %v596_v7 = vmul.f32 %v4510_v14, %v5816_v51  ;;  %v904_v57 = vsel %vm854_vm10, %v4631_v60, -inf  ;;  %v2907_v30 = vmax.f32 %v2905_v25, %v2906_v35  ;;  %v912_v61 = vrot.slane %v911_v58, 4 }
 0x1b4   :  { %v2515_v26 = vrot.slane %v4316_v21, 2  ;;  %v2760_v1 = vrot.slane %v4327_v4, 3  ;;  %v2901_v0 = vrot.slane %v2900_v2, 1  ;;  %v2428_v16 = vmax.f32 %v2426_v42, %v2427_v31  ;;  %v5822_v31 = vld [vmem:[#allocation36_spill] sm:$0xff] }
 0x1b5   :  { %v3611_v55 = vpop.eup %3610  ;;  %v661_v49 = vrot.slane %v660_v36, 4  ;;  %v4902_v34 = vmax.f32 %v678_v52, %v679_v3  ;;  %v4904_v14 = vmax.f32 %v685_v15, %v686_v24  ;;  %v905_v51 = vrot.slane %v904_v57, 4 }
 0x1b6   :  { %v2327_v60 = vadd.f32 %v2283_v28, %v4193_v43  ;;  %v5819_v25 = vperm.slane %v5768_v18, 0  ;;  %v4909_v35 = vmax.f32 %v2414_v20, %v2415_v47  ;;  %v4911_v12 = vmax.f32 %v2662_v17, %v2663_v32 }
 0x1b7   :  { %2772 = vrot.lane.b32.xlu1 %v2751_v29, %s3721_s0  ;;  %5817 = vst [vmem:[#allocation12_spill] sm:$0xff] %v4902_v34  ;;  %v616_v42 = vadd.f32 %v4603_v6, %v596_v7  ;;  %v5823_v29 = vld [vmem:[#allocation45_spill] sm:$0xff]  ;;  %v2908_v15 = vrot.slane %v2907_v30, 1  ;;  %v702_v3 = vsel %vm645_vm7, %v3611_v55, -inf  ;;  %v913_v24 = vmax.f32 %v911_v58, %v912_v61  ;;  %v5825_v55 = vld [vmem:[#allocation51_spill] sm:$0xff] }
 0x1b8   :  { %5818 = vst [vmem:[#allocation56_spill] sm:$0xff] %v4904_v14  ;;  %486 = vperm.xlu0 %3528, %v5819_v25   ;;  %v604_v50 = vmul.f32 %v5823_v29, %v5822_v31  ;;  %2538 = vrot.lane.b32.xlu2 %v2515_v26, %s3719_s12  ;;  %v4922_v20 = vmax.f32 %v2900_v2, %v2901_v0  ;;  %v2429_v17 = vrot.slane %v2428_v16, 1  ;;  %v1167_v32 = vsel %vm1110_vm11, %v4712_v53, -inf }
 0x1b9   :  { %5820 = vst [vmem:[#allocation57_spill] sm:$0xff] %v4909_v35  ;;  %v2531_v52 = vpop.permute.xlu1 %2530  ;;  %v4920_v25 = vpop.permute.xlu0 %1305  ;;  %v662_v47 = vmax.f32 %v660_v36, %v661_v49  ;;  %v906_v7 = vmax.f32 %v904_v57, %v905_v51  ;;  %v1406_v26 = vsel %vm1349_vm8, %v4788_v11, -inf  ;;  %v703_v61 = vrot.slane %v702_v3, 4 }
 0x1ba   :  { %5821 = vst [vmem:[#allocation58_spill] sm:$0xff] %v4911_v12  ;;  %v2575_v28 = vadd.f32 %v2531_v52, %v2327_v60  ;;  %v4918_v19 = vpop.permute.xlu2 %2306  ;;  %3612 = vtanh.f32 %v616_v42  ;;  %v624_v52 = vadd.f32 %v4603_v6, %v604_v50  ;;  %v4931_v2 = vmax.f32 %v2907_v30, %v2908_v15  ;;  %v5830_v50 = vld [vmem:[#allocation49_spill] sm:$0xff] }
 0x1bb   :  { %5824 = vst [vmem:[#allocation36_spill] sm:$0xff] %v4922_v20  ;;  %v914_v0 = vrot.slane %v913_v24, 2  ;;  %v1168_v36 = vrot.slane %v1167_v32, 4  ;;  %v663_v53 = vrot.slane %v662_v47, 2  ;;  %v1407_v57 = vrot.slane %v1406_v26, 4 }
 0x1bc   :  { %v2609_v29 = vsel %vm1110_vm11, %v2575_v28, -inf  ;;  %v2813_v58 = vadd.f32 %v5825_v55, %v2575_v28  ;;  %5826 = vst [vmem:[#allocation45_spill] sm:$0xff] %v4931_v2  ;;  %v4935_v11 = vmax.f32 %v2428_v16, %v2429_v17  ;;  %v5828_v28 = vld [vmem:[#allocation24_spill] sm:$0xff]  ;;  %v2337_v48 = vadd.f32 %v5830_v50, %v4196_v44 }
 0x1bd   :  { %v2610_v5 = vrot.slane %v2609_v29, 4  ;;  %v5829_v55 = vld [vmem:[#allocation48_spill] sm:$0xff]  ;;  %v907_v30 = vrot.slane %v906_v7, 2  ;;  %v5831_v15 = vperm.slane %v5768_v18, 1  ;;  %v4943_v41 = vmax.f32 %v702_v3, %v703_v61 }
 0x1be   :  { %v2847_v49 = vsel %vm1349_vm8, %v2813_v58, -inf  ;;  %5827 = vst [vmem:[#allocation51_spill] sm:$0xff] %v4935_v11  ;;  %v600_v42 = vmul.f32 %v5829_v55, %v5828_v28  ;;  %3614 = vtanh.f32 %v624_v52  ;;  %v915_v17 = vmax.f32 %v913_v24, %v914_v0  ;;  %v5835_v28 = vld [vmem:[#allocation50_spill] sm:$0xff]  ;;  %v5843_v11 = vld [vmem:[#allocation21_spill] sm:$0xff] }
 0x1bf   :  { %v2611_v51 = vmax.f32 %v2609_v29, %v2610_v5  ;;  %v2848_v40 = vrot.slane %v2847_v49, 4  ;;  %2790 = vrot.lane.b32.xlu1 %v2760_v1, %s3721_s0  ;;  %5832 = vst [vmem:[#allocation24_spill] sm:$0xff] %v4943_v41  ;;  %v5833_v1 = vrot.slane %v4196_v44, 3  ;;  %v5834_v29 = vld [vmem:[#allocation46_spill] sm:$0xff]  ;;  %v1169_v43 = vmax.f32 %v1167_v32, %v1168_v36  ;;  %v5836_v32 = vld [vmem:[#allocation32_spill] sm:$0xff] }
 0x1c0   :  { %493 = vperm.xlu0 %3528, %v5831_v15   ;;  %v607_v55 = vmul.f32 %v5835_v28, %v5834_v29  ;;  %v3613_v15 = vpop.eup %3612  ;;  %v664_v3 = vmax.f32 %v662_v47, %v663_v53  ;;  %v1408_v61 = vmax.f32 %v1406_v26, %v1407_v57  ;;  %v2329_v24 = vadd.f32 %v4876_v54, %v4249_v46 }
 0x1c1   :  { %v2612_v58 = vrot.slane %v2611_v51, 2  ;;  %v2849_v5 = vmax.f32 %v2847_v49, %v2848_v40  ;;  %2788 = vrot.lane.b32.xlu2 %v5833_v1, %s3721_s0  ;;  %v2551_v16 = vpop.permute.xlu1 %2550  ;;  %v1308_v14 = vpop.permute.xlu0 %1307  ;;  %v620_v40 = vadd.f32 %v4603_v6, %v600_v42  ;;  %v2431_v49 = vsel %vm854_vm10, %v2337_v48, -inf }
 0x1c2   :  { %v4950_v50 = vadd.f32 %v2551_v16, %v2337_v48  ;;  %v813_v34 = vpop.permute.xlu2 %812  ;;  %v908_v1 = vmax.f32 %v906_v7, %v907_v30  ;;  %v2361_v0 = vsel %vm854_vm10, %v2327_v60, -inf  ;;  %v4959_v36 = vadd.f32 %v4878_v62, %v5836_v32  ;;  %v5837_v30 = vld [vmem:[#allocation35_spill] sm:$0xff] }
 0x1c3   :  { %v2613_v52 = vmax.f32 %v2611_v51, %v2612_v58  ;;  %v2850_v41 = vrot.slane %v2849_v5, 2  ;;  %v667_v47 = vsel %vm645_vm7, %v3613_v15, -inf  ;;  %v916_v26 = vrot.slane %v915_v17, 1  ;;  %v5838_v58 = vld [vmem:[#allocation52_spill] sm:$0xff] }
 0x1c4   :  { %v4963_v53 = vadd.f32 %v4603_v6, %v607_v55  ;;  %v1170_v57 = vrot.slane %v1169_v43, 2  ;;  %v3615_v48 = vpop.eup %3614  ;;  %v2432_v7 = vrot.slane %v2431_v49, 4  ;;  %v1409_v51 = vrot.slane %v1408_v61, 2 }
 0x1c5   :  { %v2614_v16 = vrot.slane %v2613_v52, 1  ;;  %v2851_v28 = vmax.f32 %v2849_v5, %v2850_v41  ;;  %v909_v60 = vrot.slane %v908_v1, 1  ;;  %v2672_v62 = vsel %vm1110_vm11, %v5838_v58, -inf }
 0x1c6   :  { %v2362_v46 = vrot.slane %v2361_v0, 4  ;;  %v2375_v41 = vsel %vm854_vm10, %v2329_v24, -inf  ;;  %v5839_v5 = vperm.slane %v5768_v18, 6  ;;  %v925_v6 = vsel %vm854_vm10, %v4959_v36, -inf }
 0x1c7   :  { %v2615_v42 = vmax.f32 %v2613_v52, %v2614_v16  ;;  %v2852_v54 = vrot.slane %v2851_v28, 1  ;;  %969 = vperm.xlu1 %3525, %v5837_v30   ;;  %v849_v15 = vadd.f32 %v813_v34, %v5822_v31  ;;  %v5840_v52 = vrot.slane %v4316_v21, 3  ;;  %v5841_v30 = vld [vmem:[#allocation47_spill] sm:$0xff] }
 0x1c8   :  { %528 = vperm.xlu0 %3528, %v5839_v5   ;;  %v665_v23 = vrot.slane %v664_v3, 1  ;;  %v4982_v27 = vsel %vm645_vm7, %v3615_v48, -inf  ;;  %v1171_v18 = vmax.f32 %v1169_v43, %v1170_v57  ;;  %v4986_v5 = vadd.f32 %v4834_v8, %v4327_v4 }
 0x1c9   :  { %v2853_v55 = vmax.f32 %v2851_v28, %v2852_v54  ;;  %2776 = vrot.lane.b32.xlu2 %v5840_v52, %s3721_s0  ;;  %v2285_v16 = vpop.permute.xlu1 %2284  ;;  %v4979_v44 = vsel %vm997_vm14, %v2615_v42, %v5841_v30  ;;  %5842 = vst [vmem:[#allocation48_spill] sm:$0xff] %v4982_v27  ;;  %v4988_v28 = vpop.permute.xlu0 %2292  ;;  %v1410_v31 = vmax.f32 %v1408_v61, %v1409_v51  ;;  %v2376_v54 = vrot.slane %v2375_v41, 4  ;;  %v5853_v27 = vld [vmem:[#allocation42_spill] sm:$0xff]  ;;  %s3724_s0 = smov 96  }
 0x1ca   :  { %v1069_v34 = vpop.permute.xlu2 %1068  ;;  %v668_v42 = vrot.slane %v667_v47, 4  ;;  %v4994_v30 = vmax.f32 %v2431_v49, %v2432_v7  ;;  %v2673_v48 = vrot.slane %v2672_v62, 4  ;;  %v926_v37 = vrot.slane %v925_v6, 4 }
 0x1cb   :  { %v1105_v52 = vadd.f32 %v1069_v34, %v849_v15  ;;  %v4992_v2 = vsel %vm997_vm14, %v2853_v55, %v5843_v11  ;;  %v4997_v57 = vmax.f32 %v915_v17, %v916_v26  ;;  %v2363_v8 = vmax.f32 %v2361_v0, %v2362_v46 }
 0x1cc   :  { %v910_v4 = vmax.f32 %v908_v1, %v909_v60  ;;  %3616 = vtanh.f32 %v620_v40  ;;  %v1172_v20 = vrot.slane %v1171_v18, 1  ;;  %v5000_v51 = vadd.f32 %v4836_v39, %v2329_v24  ;;  %v5846_v1 = vld [vmem:[#allocation29_spill] sm:$0xff]  ;;  %v5849_v60 = vld [vmem:[#allocation14_spill] sm:$0xff] }
 0x1cd   :  { %v1344_v61 = vadd.f32 %v1308_v14, %v1105_v52  ;;  %v5002_v34 = vmax.f32 %v664_v3, %v665_v23  ;;  %v1411_v11 = vrot.slane %v1410_v31, 1  ;;  %v5006_v49 = vsel %vm854_vm10, %v4986_v5, -inf  ;;  %v5848_v3 = vld [vmem:[#allocation28_spill] sm:$0xff] }
 0x1ce   :  { %5844 = vst [vmem:[#allocation49_spill] sm:$0xff] %v5000_v51  ;;  %v2377_v7 = vmax.f32 %v2375_v41, %v2376_v54  ;;  %v5009_v17 = vmax.f32 %v667_v47, %v668_v42  ;;  %v5012_v40 = vmax.f32 %v2672_v62, %v2673_v48  ;;  %v927_v14 = vmax.f32 %v925_v6, %v926_v37  ;;  %v5850_v37 = vld [vmem:[#allocation30_spill] sm:$0xff]  ;;  %v5852_v62 = vld [vmem:[#allocation17_spill] sm:$0xff] }
 0x1cf   :  { %5845 = vst [vmem:[#allocation46_spill] sm:$0xff] %v5002_v34  ;;  %2459 = vperm.xlu1 %3525, %v4885_v9   ;;  %v5847_v39 = vperm.slane %v5846_v1, 1  ;;  %v2364_v23 = vrot.slane %v2363_v8, 2  ;;  %v2328_v24 = vadd.f32 %v2285_v16, %v5848_v3  ;;  %v1188_v0 = vsel %vm1110_vm11, %v1105_v52, -inf }
 0x1d0   :  { %v5021_v9 = vsel %vm1005_vm6, %v910_v4, %v5849_v60  ;;  %v5023_v47 = vmax.f32 %v1171_v18, %v1172_v20  ;;  %v2623_v16 = vsel %vm1110_vm11, %v5000_v51, -inf  ;;  %v5033_v54 = vmax.f32 %v1410_v31, %v1411_v11 }
 0x1d1   :  { %549 = vperm.xlu0 %3528, %v5847_v39   ;;  %974 = vperm.xlu2 %3526, %v4758_v63   ;;  %v809_v26 = vpop.permute.xlu1 %808  ;;  %v5029_v55 = vpop.permute.xlu0 %816  ;;  %v2378_v63 = vrot.slane %v2377_v7, 2  ;;  %v932_v52 = vsel %vm854_vm10, %v849_v15, -inf  ;;  %v1427_v4 = vsel %vm1349_vm8, %v1344_v61, -inf  ;;  %v928_v18 = vrot.slane %v927_v14, 2  ;;  %v5851_v39 = vld [vmem:[#allocation33_spill] sm:$0xff] }
 0x1d2   :  { %v847_v41 = vadd.f32 %v809_v26, %v5850_v37  ;;  %v5027_v6 = vpop.permute.xlu2 %814  ;;  %v5037_v20 = vpop.eup %3616  ;;  %v1189_v42 = vrot.slane %v1188_v0, 4  ;;  %v5041_v60 = vmax.f32 %v2363_v8, %v2364_v23  ;;  %v5044_v46 = vadd.f32 %v5852_v62, %v2328_v24 }
 0x1d3   :  { %v2624_v31 = vrot.slane %v2623_v16, 4  ;;  %v933_v11 = vrot.slane %v932_v52, 4  ;;  %v1428_v3 = vrot.slane %v1427_v4, 4  ;;  %v5048_v34 = vmax.f32 %v2377_v7, %v2378_v63 }
 0x1d4   :  { %v918_v48 = vsel %vm854_vm10, %v847_v41, -inf  ;;  %v1103_v26 = vadd.f32 %v5851_v39, %v847_v41  ;;  %v5052_v37 = vadd.f32 %v4918_v19, %v5853_v27  ;;  %v5056_v23 = vmax.f32 %v927_v14, %v928_v18 }
 0x1d5   :  { %v919_v43 = vrot.slane %v918_v48, 4  ;;  %v2368_v62 = vsel %vm854_vm10, %v2328_v24, -inf  ;;  %v1190_v39 = vmax.f32 %v1188_v0, %v1189_v42  ;;  %v2616_v14 = vsel %vm1110_vm11, %v5044_v46, -inf }
 0x1d6   :  { %v1174_v15 = vsel %vm1110_vm11, %v1103_v26, -inf  ;;  %v1342_v61 = vadd.f32 %v4777_v13, %v1103_v26  ;;  %v5854_v13 = vperm.slane %v5846_v1, 4  ;;  %v934_v24 = vmax.f32 %v932_v52, %v933_v11 }
 0x1d7   :  { %v920_v41 = vmax.f32 %v918_v48, %v919_v43  ;;  %v1175_v8 = vrot.slane %v1174_v15, 4  ;;  %1492 = vrot.lane.b32.xlu1 %v4806_v22, %s3723_s7  ;;  %v1429_v0 = vmax.f32 %v1427_v4, %v1428_v3  ;;  %v2625_v48 = vmax.f32 %v2623_v16, %v2624_v31 }
 0x1d8   :  { %v1413_v51 = vsel %vm1349_vm8, %v1342_v61, -inf  ;;  %3529 = vset.pattern.permute.xlu1 %v5813_v38  ;;  %v2369_v26 = vrot.slane %v2368_v62, 4  ;;  %v2617_v52 = vrot.slane %v2616_v14, 4  ;;  %v5856_v12 = vperm.slane %v5846_v1, 7 }
 0x1d9   :  { %570 = vperm.xlu0 %3528, %v5854_v13   ;;  %v921_v19 = vrot.slane %v920_v41, 2  ;;  %v1176_v7 = vmax.f32 %v1174_v15, %v1175_v8  ;;  %v1414_v43 = vrot.slane %v1413_v51, 4  ;;  %1253 = vrot.lane.b32.xlu2 %v4794_v10, %s3724_s0  ;;  %v1067_v22 = vpop.permute.xlu1 %1066  ;;  %v5070_v42 = vpop.permute.xlu0 %2542  ;;  %v1191_v10 = vrot.slane %v1190_v39, 2 }
 0x1da   :  { %v1104_v63 = vadd.f32 %v1067_v22, %v4959_v36  ;;  %v5068_v18 = vpop.permute.xlu2 %2540  ;;  %5855 = vst [vmem:[#allocation50_spill] sm:$0xff] %v5070_v42  ;;  %3530 = vset.pattern.permute.xlu2 %v5813_v38  ;;  %v935_v22 = vrot.slane %v934_v24, 2  ;;  %v1430_v35 = vrot.slane %v1429_v0, 2  ;;  %v2626_v31 = vrot.slane %v2625_v48, 2 }
 0x1db   :  { %v922_v15 = vmax.f32 %v920_v41, %v921_v19  ;;  %v1177_v61 = vrot.slane %v1176_v7, 2  ;;  %v1415_v8 = vmax.f32 %v1413_v51, %v1414_v43  ;;  %v2370_v51 = vmax.f32 %v2368_v62, %v2369_v26 }
 0x1dc   :  { %v1181_v13 = vsel %vm1110_vm11, %v1104_v63, -inf  ;;  %v1343_v27 = vadd.f32 %v4920_v25, %v1104_v63  ;;  %v1192_v43 = vmax.f32 %v1190_v39, %v1191_v10  ;;  %v2618_v25 = vmax.f32 %v2616_v14, %v2617_v52 }
 0x1dd   :  { %v923_v3 = vrot.slane %v922_v15, 1  ;;  %v1178_v4 = vmax.f32 %v1176_v7, %v1177_v61  ;;  %v1416_v36 = vrot.slane %v1415_v8, 2  ;;  %v1182_v11 = vrot.slane %v1181_v13, 4 }
 0x1de   :  { %v1420_v16 = vsel %vm1349_vm8, %v1343_v27, -inf  ;;  %v930_v27 = vrot.slane %v5056_v23, 1  ;;  %v2627_v39 = vmax.f32 %v2625_v48, %v2626_v31  ;;  %v936_v26 = vmax.f32 %v934_v24, %v935_v22 }
 0x1df   :  { %v924_v38 = vmax.f32 %v922_v15, %v923_v3  ;;  %v1179_v58 = vrot.slane %v1178_v4, 1  ;;  %v1417_v41 = vmax.f32 %v1415_v8, %v1416_v36  ;;  %v1183_v19 = vmax.f32 %v1181_v13, %v1182_v11 }
 0x1e0   :  { %v1421_v45 = vrot.slane %v1420_v16, 4  ;;  %v1431_v15 = vmax.f32 %v1429_v0, %v1430_v35  ;;  %v2371_v14 = vrot.slane %v2370_v51, 2  ;;  %v1193_v10 = vrot.slane %v1192_v43, 1 }
 0x1e1   :  { %591 = vperm.xlu0 %3528, %v5856_v12   ;;  %v1007_v7 = vsel %vm993_vm12, %v924_v38, %v4997_v57  ;;  %v1180_v63 = vmax.f32 %v1178_v4, %v1179_v58  ;;  %v1418_v61 = vrot.slane %v1417_v41, 1  ;;  %v1184_v56 = vrot.slane %v1183_v19, 2  ;;  %v2289_v42 = vpop.permute.xlu1 %2288  ;;  %v5083_v62 = vpop.permute.xlu0 %2780 }
 0x1e2   :  { %v1422_v3 = vmax.f32 %v1420_v16, %v1421_v45  ;;  %v5081_v8 = vpop.permute.xlu2 %2778  ;;  %v5088_v57 = vadd.f32 %v2289_v42, %v4298_v59  ;;  %v2366_v58 = vrot.slane %v5041_v60, 1  ;;  %v2619_v52 = vrot.slane %v2618_v25, 2 }
 0x1e3   :  { %v1246_v12 = vsel %vm993_vm12, %v1180_v63, %v5023_v47  ;;  %v1185_v1 = vmax.f32 %v1183_v19, %v1184_v56  ;;  %v1419_v35 = vmax.f32 %v1417_v41, %v1418_v61  ;;  %v1432_v48 = vrot.slane %v1431_v15, 1 }
 0x1e4   :  { %v1423_v13 = vrot.slane %v1422_v3, 2  ;;  %v2382_v0 = vsel %vm854_vm10, %v5088_v57, -inf  ;;  %v2628_v36 = vrot.slane %v2627_v39, 1  ;;  %v931_v56 = vmax.f32 %v5056_v23, %v930_v27 }
 0x1e5   :  { %v1186_v45 = vrot.slane %v1185_v1, 1  ;;  %v2383_v4 = vrot.slane %v2382_v0, 4  ;;  %v937_v47 = vrot.slane %v936_v26, 1  ;;  %v2620_v11 = vmax.f32 %v2618_v25, %v2619_v52  ;;  %v5857_v52 = vld [vmem:[#allocation40_spill] sm:$0xff] }
 0x1e6   :  { %v1424_v24 = vmax.f32 %v1422_v3, %v1423_v13  ;;  %v2372_v22 = vmax.f32 %v2370_v51, %v2371_v14  ;;  %v1194_v16 = vmax.f32 %v1192_v43, %v1193_v10  ;;  %v1485_v61 = vsel %vm993_vm12, %v1419_v35, %v5033_v54 }
 0x1e7   :  { %v1187_v42 = vmax.f32 %v1185_v1, %v1186_v45  ;;  %v2384_v38 = vmax.f32 %v2382_v0, %v2383_v4  ;;  %v2621_v63 = vrot.slane %v2620_v11, 1  ;;  %v1008_v3 = vsel %vm995_vm13, %v931_v56, %v1007_v7 }
 0x1e8   :  { %v1425_v31 = vrot.slane %v1424_v24, 1  ;;  %v1433_v23 = vmax.f32 %v1431_v15, %v1432_v48  ;;  %v2629_v43 = vmax.f32 %v2627_v39, %v2628_v36  ;;  %v938_v13 = vmax.f32 %v936_v26, %v937_v47 }
 0x1e9   :  { %1014 = vrot.lane.b32.xlu0 %v5021_v9, %s3719_s12  ;;  %v1247_v41 = vsel %vm995_vm13, %v1187_v42, %v1246_v12  ;;  %v2291_v19 = vpop.permute.xlu1 %2290  ;;  %v2385_v1 = vrot.slane %v2384_v38, 2  ;;  %v2771_v51 = vpop.permute.xlu0 %2770  ;;  %v2622_v9 = vmax.f32 %v2620_v11, %v2621_v63  ;;  %v2373_v54 = vrot.slane %v2372_v22, 1 }
 0x1ea   :  { %v1426_v27 = vmax.f32 %v1424_v24, %v1425_v31  ;;  %v5100_v25 = vpop.permute.xlu2 %1311  ;;  %v5103_v14 = vadd.f32 %v2291_v19, %v4316_v21  ;;  %v2814_v12 = vadd.f32 %v2771_v51, %v5044_v46  ;;  %v5107_v10 = vsel %vm997_vm14, %v1194_v16, %v1247_v41  ;;  %v5870_v21 = vld [vmem:[#allocation13_spill] sm:$0xff] }
 0x1eb   :  { %v2386_v35 = vmax.f32 %v2384_v38, %v2385_v1  ;;  %v2719_v39 = vsel %vm999_vm15, %v2622_v9, %v4979_v44  ;;  %v2445_v46 = vsel %vm854_vm10, %v5052_v37, -inf  ;;  %v2332_v26 = vadd.f32 %v4988_v28, %v5857_v52  ;;  %v5861_v9 = vld [vmem:[#allocation44_spill] sm:$0xff] }
 0x1ec   :  { %v1486_v7 = vsel %vm995_vm13, %v1426_v27, %v1485_v61  ;;  %v2389_v15 = vsel %vm854_vm10, %v5103_v14, -inf  ;;  %v2854_v45 = vsel %vm1349_vm8, %v2814_v12, -inf  ;;  %v2367_v4 = vmax.f32 %v5041_v60, %v2366_v58 }
 0x1ed   :  { %v5116_v0 = vsel %vm997_vm14, %v1433_v23, %v1486_v7  ;;  %v2390_v48 = vrot.slane %v2389_v15, 4  ;;  %v2855_v24 = vrot.slane %v2854_v45, 4  ;;  %v2380_v36 = vrot.slane %v5048_v34, 1 }
 0x1ee   :  { %vm5858_vm0 = vcmask 1045509   ;;  %v5128_v44 = vsel %vm997_vm14, %v938_v13, %v1008_v3  ;;  %v2679_v47 = vsel %vm1110_vm11, %v4950_v50, -inf  ;;  %v2580_v42 = vadd.f32 %v5068_v18, %v2332_v26  ;;  %v5862_v13 = vld [vmem:[#allocation39_spill] sm:$0xff] }
 0x1ef   :  { %v5125_v56 = vsel %vm5858_vm0, %v2629_v43, %v2719_v39  ;;  %v2391_v11 = vmax.f32 %v2389_v15, %v2390_v48  ;;  %v2856_v16 = vmax.f32 %v2854_v45, %v2855_v24  ;;  %v5859_v28 = vrot.slane %v4994_v30, 2  ;;  %v5864_v24 = vld [vmem:[#allocation53_spill] sm:$0xff]  ;;  %vm5865_vm5 = vmmov %vm5858_vm0 }
 0x1f0   :  { %3618 = vtanh.f32 %v4963_v53  ;;  %v2374_v60 = vmax.f32 %v2372_v22, %v2373_v54  ;;  %v2387_v58 = vrot.slane %v2386_v35, 1  ;;  %v2396_v41 = vsel %vm854_vm10, %v2332_v26, -inf  ;;  %vm5874_vm9 = vmmov %vm5858_vm0 }
 0x1f1   :  { %v5136_v31 = vmax.f32 %v4994_v30, %v5859_v28  ;;  %v1071_v38 = vpop.permute.xlu1 %1070  ;;  %v2818_v19 = vadd.f32 %v5081_v8, %v2580_v42  ;;  %v2392_v63 = vrot.slane %v2391_v11, 2  ;;  %v2857_v61 = vrot.slane %v2856_v16, 2  ;;  %v2555_v3 = vpop.permute.xlu0 %2554 }
 0x1f2   :  { %v819_v18 = vpop.permute.xlu2 %818  ;;  %v2675_v23 = vrot.slane %v5012_v40, 2  ;;  %v5860_v27 = vrot.slane %v5006_v49, 4  ;;  %v2446_v1 = vrot.slane %v2445_v46, 4  ;;  %v2680_v51 = vrot.slane %v2679_v47, 4 }
 0x1f3   :  { %v2381_v53 = vmax.f32 %v5048_v34, %v2380_v36  ;;  %v2393_v22 = vmax.f32 %v2391_v11, %v2392_v63  ;;  %v2858_v43 = vmax.f32 %v2856_v16, %v2857_v61  ;;  %v2480_v12 = vsel %vm997_vm14, %v2367_v4, %v5861_v9 }
 0x1f4   :  { %v2440_v30 = vmax.f32 %v5006_v49, %v5860_v27  ;;  %v2397_v8 = vrot.slane %v2396_v41, 4  ;;  %v850_v54 = vadd.f32 %v5027_v6, %v5862_v13  ;;  %v2388_v7 = vmax.f32 %v2386_v35, %v2387_v58 }
 0x1f5   :  { %v2481_v15 = vsel %vm999_vm15, %v2374_v60, %v2480_v12  ;;  %v2644_v45 = vsel %vm1110_vm11, %v2580_v42, -inf  ;;  %v2882_v49 = vsel %vm1349_vm8, %v2818_v19, -inf  ;;  %v2394_v39 = vrot.slane %v2393_v22, 1 }
 0x1f6   :  { %v2859_v26 = vrot.slane %v2858_v43, 1  ;;  %v5153_v48 = vpop.eup %3618  ;;  %v2676_v34 = vmax.f32 %v5012_v40, %v2675_v23  ;;  %v603_v4 = vmul.f32 %v5864_v24, %v5836_v32  ;;  %v2447_v36 = vmax.f32 %v2445_v46, %v2446_v1 }
 0x1f7   :  { %5863 = vst [vmem:[#allocation32_spill] sm:$0xff] %v5153_v48  ;;  %v2681_v11 = vmax.f32 %v2679_v47, %v2680_v51  ;;  %v1106_v6 = vadd.f32 %v1071_v38, %v850_v54  ;;  %v2395_v35 = vmax.f32 %v2393_v22, %v2394_v39  ;;  %v2482_v28 = vsel %vm5865_vm5, %v2381_v53, %v2481_v15  ;;  %v5168_v38 = vld [vmem:[%s5770_s25] ss:$0 sm:$0xff]  ;;  %vm5886_vm5 = vmmov %vm5858_vm0 }
 0x1f8   :  { %v2860_v16 = vmax.f32 %v2858_v43, %v2859_v26  ;;  %v2398_v60 = vmax.f32 %v2396_v41, %v2397_v8  ;;  %v2645_v42 = vrot.slane %v2644_v45, 4  ;;  %v2883_v58 = vrot.slane %v2882_v49, 4 }
 0x1f9   :  { %v1310_v19 = vpop.permute.xlu1 %1309  ;;  %vm5866_vm3 = vcmask 1046534   ;;  %v670_v61 = vrot.slane %v5009_v17, 2  ;;  %v2436_v40 = vrot.slane %v5136_v31, 1  ;;  %v2441_v23 = vrot.slane %v2440_v30, 2  ;;  %v5162_v27 = vpop.permute.xlu0 %2774 }
 0x1fa   :  { %v2483_v63 = vsel %vm5866_vm3, %v2388_v7, %v2482_v28  ;;  %v1075_v32 = vpop.permute.xlu2 %1074  ;;  %v2677_v47 = vrot.slane %v2676_v34, 1  ;;  %v623_v41 = vadd.f32 %v5168_v38, %v603_v4  ;;  %v5172_v1 = vadd.f32 %v2555_v3, %v5052_v37  ;;  %vm5876_vm1 = vmmov %vm5866_vm3 }
 0x1fb   :  { %v2484_v46 = vsel %vm1005_vm6, %v2395_v35, %v2483_v63  ;;  %v5177_v51 = vsel %vm999_vm15, %v2860_v16, %v4992_v2  ;;  %v2448_v53 = vrot.slane %v2447_v36, 2  ;;  %v2682_v22 = vrot.slane %v2681_v11, 2  ;;  %vm5880_vm4 = vmmov %vm5876_vm1 }
 0x1fc   :  { %2492 = vrot.lane.b32.xlu2 %v2484_v46, %s3719_s12  ;;  %v1195_v43 = vsel %vm1110_vm11, %v1106_v6, -inf  ;;  %v1345_v9 = vadd.f32 %v1310_v19, %v1106_v6  ;;  %v2399_v12 = vrot.slane %v2398_v60, 2  ;;  %v2646_v8 = vmax.f32 %v2644_v45, %v2645_v42  ;;  %vm5881_vm2 = vmmov %vm5876_vm1 }
 0x1fd   :  { %v2884_v7 = vmax.f32 %v2882_v49, %v2883_v58  ;;  %v5181_v15 = vadd.f32 %v819_v18, %v5834_v29  ;;  %v5184_v37 = vmax.f32 %v5009_v17, %v670_v61  ;;  %v5188_v3 = vsel %vm645_vm7, %v5037_v20, -inf  ;;  %v5867_v17 = vld [vmem:[#allocation41_spill] sm:$0xff]  ;;  %vm5887_vm3 = vmmov %vm5876_vm1 }
 0x1fe   :  { %v5191_v2 = vmax.f32 %v5136_v31, %v2436_v40  ;;  %v2442_v39 = vmax.f32 %v2440_v30, %v2441_v23  ;;  %3620 = vtanh.f32 %v623_v41  ;;  %v1196_v26 = vrot.slane %v1195_v43, 4 }
 0x1ff   :  { %v2693_v45 = vsel %vm1110_vm11, %v5172_v1, -inf  ;;  %v5196_v49 = vadd.f32 %v1075_v32, %v5181_v15  ;;  %v2449_v29 = vmax.f32 %v2447_v36, %v2448_v53  ;;  %v2683_v18 = vmax.f32 %v2681_v11, %v2682_v22 }
 0x200   :  { %v851_v24 = vadd.f32 %v5029_v55, %v5867_v17  ;;  %v1434_v20 = vsel %vm1349_vm8, %v1345_v9, -inf  ;;  %v5201_v4 = vmax.f32 %v2676_v34, %v2677_v47  ;;  %v2400_v31 = vmax.f32 %v2398_v60, %v2399_v12 }
 0x201   :  { %v2647_v16 = vrot.slane %v2646_v8, 2  ;;  %v2885_v30 = vrot.slane %v2884_v7, 2  ;;  %v1073_v6 = vpop.permute.xlu1 %1072  ;;  %v2443_v35 = vrot.slane %v2442_v39, 1  ;;  %v939_v28 = vsel %vm854_vm10, %v850_v54, -inf  ;;  %v2793_v54 = vpop.permute.xlu0 %2792 }
 0x202   :  { %v2694_v42 = vrot.slane %v2693_v45, 4  ;;  %v1107_v58 = vadd.f32 %v1073_v6, %v851_v24  ;;  %v2553_v19 = vpop.permute.xlu2 %2552  ;;  %v1197_v63 = vmax.f32 %v1195_v43, %v1196_v26  ;;  %v1435_v36 = vrot.slane %v1434_v20, 4 }
 0x203   :  { %v1209_v11 = vsel %vm1110_vm11, %v5196_v49, -inf  ;;  %v5207_v55 = vadd.f32 %v2553_v19, %v4986_v5  ;;  %v5211_v34 = vmul.f32 %v4828_v33, %v5867_v17  ;;  %v2450_v60 = vrot.slane %v2449_v29, 1 }
 0x204   :  { %v2684_v61 = vrot.slane %v2683_v18, 1  ;;  %v1346_v40 = vadd.f32 %v5100_v25, %v1107_v58  ;;  %v5214_v23 = vpop.eup %3620  ;;  %v2401_v32 = vrot.slane %v2400_v31, 1  ;;  %v2648_v46 = vmax.f32 %v2646_v8, %v2647_v16 }
 0x205   :  { %v2886_v47 = vmax.f32 %v2884_v7, %v2885_v30  ;;  %v1202_v41 = vsel %vm1110_vm11, %v1107_v58, -inf  ;;  %v5217_v53 = vmax.f32 %v2442_v39, %v2443_v35  ;;  %v940_v5 = vrot.slane %v939_v28, 4 }
 0x206   :  { %v1210_v22 = vrot.slane %v1209_v11, 4  ;;  %v2686_v33 = vsel %vm1110_vm11, %v5207_v55, -inf  ;;  %v1198_v43 = vrot.slane %v1197_v63, 2  ;;  %v2695_v9 = vmax.f32 %v2693_v45, %v2694_v42  ;;  %v5868_v42 = vld [vmem:[#allocation43_spill] sm:$0xff] }
 0x207   :  { %v1436_v12 = vmax.f32 %v1434_v20, %v1435_v36  ;;  %v1441_v25 = vsel %vm1349_vm8, %v1346_v40, -inf  ;;  %v5222_v26 = vmax.f32 %v2683_v18, %v2684_v61  ;;  %v5225_v17 = vsel %vm854_vm10, %v851_v24, -inf }
 0x208   :  { %v1203_v8 = vrot.slane %v1202_v41, 4  ;;  %v5227_v7 = vmax.f32 %v2449_v29, %v2450_v60  ;;  %v5229_v39 = vmax.f32 %v2400_v31, %v2401_v32  ;;  %v2649_v16 = vrot.slane %v2648_v46, 1  ;;  %v5869_v60 = vld [vmem:[#allocation50_spill] sm:$0xff] }
 0x209   :  { %v2887_v30 = vrot.slane %v2886_v47, 1  ;;  %v2687_v6 = vrot.slane %v2686_v33, 4  ;;  %v2295_v35 = vpop.permute.xlu1 %2294  ;;  %v5231_v58 = vmax.f32 %v939_v28, %v940_v5  ;;  %v1211_v45 = vmax.f32 %v1209_v11, %v1210_v22 }
 0x20a   :  { %v1442_v20 = vrot.slane %v1441_v25, 4  ;;  %v2333_v19 = vadd.f32 %v2295_v35, %v5868_v42  ;;  %v821_v18 = vpop.permute.xlu2 %820  ;;  %v1199_v24 = vmax.f32 %v1197_v63, %v1198_v43  ;;  %v2696_v61 = vrot.slane %v2695_v9, 2 }
 0x20b   :  { %v1437_v40 = vrot.slane %v1436_v12, 2  ;;  %v1204_v29 = vmax.f32 %v1202_v41, %v1203_v8  ;;  %v5238_v59 = vadd.f32 %v821_v18, %v5870_v21  ;;  %v5240_v28 = vmax.f32 %v2648_v46, %v2649_v16  ;;  %v1077_v41 = vpop.permute.xlu0 %1076 }
 0x20c   :  { %v2403_v31 = vsel %vm854_vm10, %v2333_v19, -inf  ;;  %v2581_v32 = vadd.f32 %v5869_v60, %v2333_v19  ;;  %v5242_v11 = vmax.f32 %v2886_v47, %v2887_v30  ;;  %v2688_v5 = vmax.f32 %v2686_v33, %v2687_v6 }
 0x20d   :  { %v2404_v22 = vrot.slane %v2403_v31, 4  ;;  %v1212_v35 = vrot.slane %v1211_v45, 2  ;;  %v1443_v52 = vmax.f32 %v1441_v25, %v1442_v20  ;;  %v2697_v8 = vmax.f32 %v2695_v9, %v2696_v61 }
 0x20e   :  { %v2651_v63 = vsel %vm1110_vm11, %v2581_v32, -inf  ;;  %v2819_v43 = vadd.f32 %v5083_v62, %v2581_v32  ;;  %v1438_v36 = vmax.f32 %v1436_v12, %v1437_v40  ;;  %v1200_v60 = vrot.slane %v1199_v24, 1 }
 0x20f   :  { %v2405_v42 = vmax.f32 %v2403_v31, %v2404_v22  ;;  %v2652_v19 = vrot.slane %v2651_v63, 4  ;;  %v1205_v18 = vrot.slane %v1204_v29, 2  ;;  %v5248_v47 = vadd.f32 %v1077_v41, %v5238_v59 }
 0x210   :  { %v2889_v46 = vsel %vm1349_vm8, %v2819_v43, -inf  ;;  %v2825_v33 = vadd.f32 %v2793_v54, %v5172_v1  ;;  %v2689_v16 = vrot.slane %v2688_v5, 2  ;;  %v1213_v20 = vmax.f32 %v1211_v45, %v1212_v35 }
 0x211   :  { %v2653_v25 = vmax.f32 %v2651_v63, %v2652_v19  ;;  %v2890_v30 = vrot.slane %v2889_v46, 4  ;;  %v1314_v6 = vpop.permute.xlu1 %1313  ;;  %v1444_v62 = vrot.slane %v1443_v52, 2  ;;  %v2406_v32 = vrot.slane %v2405_v42, 2 }
 0x212   :  { %v1216_v9 = vsel %vm1110_vm11, %v5248_v47, -inf  ;;  %v1439_v12 = vrot.slane %v1438_v36, 1  ;;  %v2539_v22 = vpop.permute.xlu2 %2538  ;;  %v1201_v43 = vmax.f32 %v1199_v24, %v1200_v60  ;;  %v2698_v41 = vrot.slane %v2697_v8, 1 }
 0x213   :  { %v2654_v61 = vrot.slane %v2653_v25, 2  ;;  %v2891_v40 = vmax.f32 %v2889_v46, %v2890_v30  ;;  %v1217_v31 = vrot.slane %v1216_v9, 4  ;;  %v1206_v21 = vmax.f32 %v1204_v29, %v1205_v18 }
 0x214   :  { %v5254_v1 = vadd.f32 %v2539_v22, %v5103_v14  ;;  %v5258_v54 = vsel %vm854_vm10, %v5181_v15, -inf  ;;  %v2690_v45 = vmax.f32 %v2688_v5, %v2689_v16  ;;  %v1445_v19 = vmax.f32 %v1443_v52, %v1444_v62  ;;  %v1316_v22 = vpop.permute.xlu0 %1315 }
 0x215   :  { %v2655_v35 = vmax.f32 %v2653_v25, %v2654_v61  ;;  %v2892_v63 = vrot.slane %v2891_v40, 2  ;;  %v5261_v13 = vsel %vm1349_vm8, %v2825_v33, -inf  ;;  %v2407_v46 = vmax.f32 %v2405_v42, %v2406_v32 }
 0x216   :  { %v2637_v24 = vsel %vm1110_vm11, %v5254_v1, -inf  ;;  %v1440_v60 = vmax.f32 %v1438_v36, %v1439_v12  ;;  %v1214_v29 = vrot.slane %v1213_v20, 1  ;;  %v1218_v14 = vmax.f32 %v1216_v9, %v1217_v31 }
 0x217   :  { %v2656_v18 = vrot.slane %v2655_v35, 1  ;;  %v1207_v30 = vrot.slane %v1206_v21, 1  ;;  %v2638_v48 = vrot.slane %v2637_v24, 4  ;;  %v2699_v15 = vmax.f32 %v2697_v8, %v2698_v41 }
 0x218   :  { %v1249_v5 = vsel %vm999_vm15, %v1201_v43, %v5107_v10  ;;  %v2932_v52 = vrot.slane %v5261_v13, 4  ;;  %v2691_v16 = vrot.slane %v2690_v45, 1  ;;  %v2893_v25 = vmax.f32 %v2891_v40, %v2892_v63 }
 0x219   :  { %v2657_v33 = vmax.f32 %v2655_v35, %v2656_v18  ;;  %v2537_v42 = vpop.permute.xlu1 %2536  ;;  %v1446_v62 = vrot.slane %v1445_v19, 1  ;;  %v2408_v32 = vrot.slane %v2407_v46, 1  ;;  %v2639_v61 = vmax.f32 %v2637_v24, %v2638_v48 }
 0x21a   :  { %v2578_v36 = vadd.f32 %v2537_v42, %v5088_v57  ;;  %v5269_v12 = vmax.f32 %v1213_v20, %v1214_v29  ;;  %v1219_v8 = vrot.slane %v1218_v14, 2  ;;  %v5275_v10 = vsel %vm999_vm15, %v1440_v60, %v5116_v0  ;;  %v5871_v20 = vld [vmem:[#allocation58_spill] sm:$0xff] }
 0x21b   :  { %v2723_v9 = vsel %vm993_vm12, %v2657_v33, %v5240_v28  ;;  %v2789_v31 = vpop.permute.xlu2 %2788  ;;  %v1208_v43 = vmax.f32 %v1206_v21, %v1207_v30  ;;  %v2640_v41 = vrot.slane %v2639_v61, 2  ;;  %v2894_v48 = vrot.slane %v2893_v25, 1  ;;  %v5872_v33 = vld [vmem:[#allocation55_spill] sm:$0xff] }
 0x21c   :  { %v2630_v40 = vsel %vm1110_vm11, %v2578_v36, -inf  ;;  %v2816_v35 = vadd.f32 %v5162_v27, %v2578_v36  ;;  %v2823_v57 = vadd.f32 %v2789_v31, %v4950_v50  ;;  %v2724_v24 = vsel %vm995_vm13, %v5871_v20, %v2723_v9  ;;  %vm5873_vm11 = vmmov %vm5858_vm0  ;;  %v5875_v31 = vld [vmem:[#allocation52_spill] sm:$0xff] }
 0x21d   :  { %v2631_v63 = vrot.slane %v2630_v40, 4  ;;  %v5282_v28 = vmax.f32 %v1445_v19, %v1446_v62  ;;  %v2692_v29 = vmax.f32 %v2690_v45, %v2691_v16  ;;  %v2409_v18 = vmax.f32 %v2407_v46, %v2408_v32  ;;  %v5294_v32 = vpop.permute.xlu0 %2454 }
 0x21e   :  { %v2725_v0 = vsel %vm997_vm14, %v5872_v33, %v2724_v24  ;;  %v1220_v21 = vmax.f32 %v1218_v14, %v1219_v8  ;;  %v2868_v30 = vsel %vm1349_vm8, %v2816_v35, -inf  ;;  %v2917_v27 = vsel %vm1349_vm8, %v2823_v57, -inf }
 0x21f   :  { %v2632_v60 = vmax.f32 %v2630_v40, %v2631_v63  ;;  %v1347_v42 = vadd.f32 %v1314_v6, %v5196_v49  ;;  %v2641_v36 = vmax.f32 %v2639_v61, %v2640_v41  ;;  %v2918_v50 = vrot.slane %v2917_v27, 4 }
 0x220   :  { %v2726_v9 = vsel %vm999_vm15, %v5201_v4, %v2725_v0  ;;  %v2895_v19 = vmax.f32 %v2893_v25, %v2894_v48  ;;  %v1250_v14 = vsel %vm5874_vm9, %v1208_v43, %v1249_v5  ;;  %v2869_v16 = vrot.slane %v2868_v30, 4  ;;  %vm5898_vm9 = vmmov %vm5876_vm1 }
 0x221   :  { %v2633_v62 = vrot.slane %v2632_v60, 2  ;;  %v2787_v45 = vpop.permute.xlu1 %2786  ;;  %v2727_v46 = vsel %vm5873_vm11, %v5222_v26, %v2726_v9  ;;  %v2919_v8 = vmax.f32 %v2917_v27, %v2918_v50  ;;  %v2485_v6 = vsel %vm993_vm12, %v2409_v18, %v5229_v39  ;;  %vm5894_vm11 = vmmov %vm5876_vm1 }
 0x222   :  { %v2822_v40 = vadd.f32 %v2787_v45, %v5875_v31  ;;  %v2728_v49 = vsel %vm5876_vm1, %v2692_v29, %v2727_v46  ;;  %v1221_v41 = vrot.slane %v1220_v21, 1  ;;  %v2642_v35 = vrot.slane %v2641_v36, 1  ;;  %v5877_v29 = vld [vmem:[#allocation57_spill] sm:$0xff] }
 0x223   :  { %v2634_v4 = vmax.f32 %v2632_v60, %v2633_v62  ;;  %v2777_v25 = vpop.permute.xlu2 %2776  ;;  %v2729_v61 = vsel %vm1005_vm6, %v2699_v15, %v2728_v49  ;;  %v2920_v26 = vrot.slane %v2919_v8, 2  ;;  %v1448_v48 = vsel %vm1349_vm8, %v1347_v42, -inf  ;;  %v5878_v42 = vld [vmem:[#allocation36_spill] sm:$0xff]  ;;  %v5883_v31 = vld [vmem:[#allocation45_spill] sm:$0xff] }
 0x224   :  { %v2910_v5 = vsel %vm1349_vm8, %v2822_v40, -inf  ;;  %v2817_v43 = vadd.f32 %v2777_v25, %v5254_v1  ;;  %2732 = vrot.lane.b32.xlu0 %v2729_v61, %s3724_s0  ;;  %v1348_v63 = vadd.f32 %v1316_v22, %v5248_v47  ;;  %v2870_v39 = vmax.f32 %v2868_v30, %v2869_v16  ;;  %v5879_v22 = vld [vmem:[#allocation16_spill] sm:$0xff]  ;;  %v5882_v16 = vld [vmem:[#allocation49_spill] sm:$0xff] }
 0x225   :  { %v2635_v57 = vrot.slane %v2634_v4, 1  ;;  %v2911_v20 = vrot.slane %v2910_v5, 4  ;;  %v2961_v15 = vsel %vm993_vm12, %v2895_v19, %v5242_v11  ;;  %v2486_v18 = vsel %vm995_vm13, %v5877_v29, %v2485_v6  ;;  %v5884_v6 = vld [vmem:[#allocation9_spill] sm:$0xff] }
 0x226   :  { %v2875_v24 = vsel %vm1349_vm8, %v2817_v43, -inf  ;;  %v1222_v60 = vmax.f32 %v1220_v21, %v1221_v41  ;;  %v2921_v27 = vmax.f32 %v2919_v8, %v2920_v26  ;;  %v2643_v50 = vmax.f32 %v2641_v36, %v2642_v35 }
 0x227   :  { %v2636_v33 = vmax.f32 %v2634_v4, %v2635_v57  ;;  %v2912_v0 = vmax.f32 %v2910_v5, %v2911_v20  ;;  %v2876_v1 = vrot.slane %v2875_v24, 4  ;;  %v2962_v47 = vsel %vm995_vm13, %v5878_v42, %v2961_v15 }
 0x228   :  { %v2487_v30 = vsel %vm997_vm14, %v5879_v22, %v2486_v18  ;;  %v1251_v11 = vsel %vm5880_vm4, %v5269_v12, %v1250_v14  ;;  %v2871_v46 = vrot.slane %v2870_v39, 2  ;;  %v2963_v40 = vsel %vm997_vm14, %v5883_v31, %v2962_v47  ;;  %v5885_v12 = vld [vmem:[#allocation51_spill] sm:$0xff]  ;;  %vm5904_vm4 = vmmov %vm5858_vm0 }
 0x229   :  { %v2913_v9 = vrot.slane %v2912_v0, 2  ;;  %v2877_v62 = vmax.f32 %v2875_v24, %v2876_v1  ;;  %v2773_v45 = vpop.permute.xlu1 %2772  ;;  %v2721_v19 = vsel %vm5881_vm2, %v2636_v33, %v5125_v56  ;;  %v1252_v25 = vsel %vm1005_vm6, %v1222_v60, %v1251_v11  ;;  %vm5905_vm2 = vmmov %vm5876_vm1 }
 0x22a   :  { %v2815_v21 = vadd.f32 %v2773_v45, %v5882_v16  ;;  %v487_v8 = vpop.permute.xlu0 %486  ;;  %v2722_v36 = vsel %vm1005_vm6, %v2643_v50, %v2721_v19  ;;  %v2488_v14 = vsel %vm999_vm15, %v5885_v12, %v2487_v30  ;;  %v2922_v56 = vrot.slane %v2921_v27, 1 }
 0x22b   :  { %v2914_v49 = vmax.f32 %v2912_v0, %v2913_v9  ;;  %v593_v4 = vmul.f32 %v487_v8, %v5884_v6  ;;  %2730 = vrot.lane.b32.xlu2 %v2722_v36, %s3724_s0  ;;  %v2489_v41 = vsel %vm5858_vm0, %v5191_v2, %v2488_v14  ;;  %v5335_v35 = vsel %vm5886_vm5, %v5282_v28, %v5275_v10  ;;  %vm5913_vm5 = vmmov %vm5876_vm1 }
 0x22c   :  { %v2861_v61 = vsel %vm1349_vm8, %v2815_v21, -inf  ;;  %1255 = vrot.lane.b32.xlu0 %v1252_v25, %s3724_s0  ;;  %v2878_v5 = vrot.slane %v2877_v62, 2  ;;  %v954_v20 = vrot.slane %v5258_v54, 4  ;;  %v960_v24 = vsel %vm854_vm10, %v5238_v59, -inf  ;;  %vm5888_vm10 = vmmov %vm5858_vm0 }
 0x22d   :  { %v2915_v26 = vrot.slane %v2914_v49, 1  ;;  %v2862_v43 = vrot.slane %v2861_v61, 4  ;;  %v613_v57 = vadd.f32 %v5168_v38, %v593_v4  ;;  %v1449_v15 = vrot.slane %v1448_v48, 4 }
 0x22e   :  { %v2490_v29 = vsel %vm5887_vm3, %v5217_v53, %v2489_v41  ;;  %v1455_v2 = vsel %vm1349_vm8, %v1348_v63, -inf  ;;  %v2933_v10 = vmax.f32 %v5261_v13, %v2932_v52  ;;  %v2872_v28 = vmax.f32 %v2870_v39, %v2871_v46  ;;  %vm5915_vm3 = vmmov %vm5858_vm0 }
 0x22f   :  { %v2916_v18 = vmax.f32 %v2914_v49, %v2915_v26  ;;  %v2863_v33 = vmax.f32 %v2861_v61, %v2862_v43  ;;  %3622 = vtanh.f32 %v613_v57  ;;  %v2923_v0 = vmax.f32 %v2921_v27, %v2922_v56  ;;  %v5890_v27 = vld [vmem:[#allocation10_spill] sm:$0xff] }
 0x230   :  { %v5349_v1 = vsel %vm1005_vm6, %v5227_v7, %v2490_v29  ;;  %v961_v59 = vrot.slane %v960_v24, 4  ;;  %v2879_v60 = vmax.f32 %v2877_v62, %v2878_v5  ;;  %v1450_v63 = vmax.f32 %v1448_v48, %v1449_v15 }
 0x231   :  { %v2864_v50 = vrot.slane %v2863_v33, 2  ;;  %v2791_v42 = vpop.permute.xlu1 %2790  ;;  %v2964_v53 = vsel %vm999_vm15, %v2916_v18, %v2963_v40  ;;  %v1456_v47 = vrot.slane %v1455_v2, 4  ;;  %v942_v13 = vrot.slane %v5231_v58, 2 }
 0x232   :  { %v2824_v22 = vadd.f32 %v2791_v42, %v5207_v55  ;;  %v494_v30 = vpop.permute.xlu0 %493  ;;  %v5354_v9 = vsel %vm5888_vm10, %v2923_v0, %v2964_v53  ;;  %v5889_v52 = vrot.slane %v5225_v17, 4  ;;  %v955_v45 = vmax.f32 %v5258_v54, %v954_v20  ;;  %v5891_v55 = vld [vmem:[#allocation11_spill] sm:$0xff]  ;;  %vm5916_vm10 = vmmov %vm5876_vm1 }
 0x233   :  { %v2865_v39 = vmax.f32 %v2863_v33, %v2864_v50  ;;  %v594_v62 = vmul.f32 %v494_v30, %v5890_v27  ;;  %v2934_v11 = vrot.slane %v2933_v10, 2  ;;  %v2873_v48 = vrot.slane %v2872_v28, 1  ;;  %v5895_v33 = vld [vmem:[#allocation23_spill] sm:$0xff] }
 0x234   :  { %v948_v7 = vmax.f32 %v5225_v17, %v5889_v52  ;;  %v2924_v19 = vsel %vm1349_vm8, %v2824_v22, -inf  ;;  %v5892_v46 = vperm.slane %v5891_v55, 0  ;;  %v2880_v21 = vrot.slane %v2879_v60, 1  ;;  %vm5893_vm8 = vmmov %vm5858_vm0 }
 0x235   :  { %v3623_v16 = vpop.eup %3622  ;;  %v2866_v8 = vrot.slane %v2865_v39, 1  ;;  %v2925_v36 = vrot.slane %v2924_v19, 4  ;;  %v614_v31 = vadd.f32 %v5168_v38, %v594_v62  ;;  %v962_v40 = vmax.f32 %v960_v24, %v961_v59 }
 0x236   :  { %1973 = vperm.xlu0 %3528, %v5892_v46   ;;  %v1451_v17 = vrot.slane %v1450_v63, 2  ;;  %v1457_v49 = vmax.f32 %v1455_v2, %v1456_v47  ;;  %v646_v6 = vsel %vm645_vm7, %v3623_v16, -inf  ;;  %v943_v12 = vmax.f32 %v5231_v58, %v942_v13 }
 0x237   :  { %v2867_v4 = vmax.f32 %v2865_v39, %v2866_v8  ;;  %v647_v54 = vrot.slane %v646_v6, 4  ;;  %v2926_v25 = vmax.f32 %v2924_v19, %v2925_v36  ;;  %3624 = vtanh.f32 %v614_v31 }
 0x238   :  { %v949_v14 = vrot.slane %v948_v7, 2  ;;  %v2935_v56 = vmax.f32 %v2933_v10, %v2934_v11  ;;  %v2874_v61 = vmax.f32 %v2872_v28, %v2873_v48  ;;  %v2881_v5 = vmax.f32 %v2879_v60, %v2880_v21 }
 0x239   :  { %v648_v41 = vmax.f32 %v646_v6, %v647_v54  ;;  %v2927_v26 = vrot.slane %v2926_v25, 2  ;;  %v2958_v43 = vsel %vm5893_vm8, %v2867_v4, %v5177_v51  ;;  %v956_v57 = vrot.slane %v955_v45, 2  ;;  %v5896_v51 = vld [vmem:[#allocation54_spill] sm:$0xff] }
 0x23a   :  { %v963_v20 = vrot.slane %v962_v40, 2  ;;  %v1458_v24 = vrot.slane %v1457_v49, 2  ;;  %v529_v15 = vpop.permute.xlu0 %528  ;;  %v2959_v29 = vsel %vm5894_vm11, %v2874_v61, %v2958_v43  ;;  %v1452_v2 = vmax.f32 %v1450_v63, %v1451_v17  ;;  %v5899_v6 = vld [vmem:[#allocation30_spill] sm:$0xff] }
 0x23b   :  { %v2928_v18 = vmax.f32 %v2926_v25, %v2927_v26  ;;  %v599_v0 = vmul.f32 %v529_v15, %v5895_v33  ;;  %v2960_v58 = vsel %vm1005_vm6, %v2881_v5, %v2959_v29  ;;  %v696_v10 = vrot.slane %v5188_v3, 4 }
 0x23c   :  { %v626_v28 = vadd.f32 %v5168_v38, %v5211_v34  ;;  %v950_v59 = vmax.f32 %v948_v7, %v949_v14  ;;  %v2936_v60 = vrot.slane %v2935_v56, 1  ;;  %v5897_v50 = vperm.slane %v5896_v51, 2  ;;  %2968 = vrot.lane.b32.xlu1 %v2960_v58, %s3723_s7 }
 0x23d   :  { %v3625_v42 = vpop.eup %3624  ;;  %v944_v53 = vrot.slane %v943_v12, 1  ;;  %v649_v63 = vrot.slane %v648_v41, 2  ;;  %v2929_v47 = vrot.slane %v2928_v18, 1  ;;  %v619_v22 = vadd.f32 %v5168_v38, %v599_v0 }
 0x23e   :  { %2043 = vperm.xlu0 %3528, %v5897_v50   ;;  %v957_v30 = vmax.f32 %v955_v45, %v956_v57  ;;  %v964_v13 = vmax.f32 %v962_v40, %v963_v20  ;;  %v1459_v52 = vmax.f32 %v1457_v49, %v1458_v24  ;;  %v653_v39 = vsel %vm645_vm7, %v3625_v42, -inf }
 0x23f   :  { %v1453_v27 = vrot.slane %v1452_v2, 1  ;;  %v2930_v34 = vmax.f32 %v2928_v18, %v2929_v47  ;;  %v654_v7 = vrot.slane %v653_v39, 4  ;;  %3626 = vtanh.f32 %v619_v22  ;;  %v5901_v18 = vld [vmem:[#allocation48_spill] sm:$0xff] }
 0x240   :  { %v697_v62 = vmax.f32 %v5188_v3, %v696_v10  ;;  %v716_v11 = vsel %vm645_vm7, %v5214_v23, -inf  ;;  %v951_v48 = vrot.slane %v950_v59, 1  ;;  %v2937_v19 = vmax.f32 %v2935_v56, %v2936_v60 }
 0x241   :  { %3628 = vtanh.f32 %v626_v28  ;;  %v650_v46 = vmax.f32 %v648_v41, %v649_v63  ;;  %v655_v16 = vmax.f32 %v653_v39, %v654_v7  ;;  %v2966_v45 = vsel %vm5898_vm9, %v2930_v34, %v5354_v9  ;;  %v5907_v39 = vld [vmem:[#allocation24_spill] sm:$0xff]  ;;  %vm5935_vm9 = vmmov %vm5858_vm0 }
 0x242   :  { %v958_v21 = vrot.slane %v957_v30, 1  ;;  %v965_v8 = vrot.slane %v964_v13, 1  ;;  %v1460_v36 = vrot.slane %v1459_v52, 1  ;;  %v2967_v40 = vsel %vm1005_vm6, %v2937_v19, %v2966_v45 }
 0x243   :  { %v550_v31 = vpop.permute.xlu0 %549  ;;  %v945_v17 = vmax.f32 %v943_v12, %v944_v53  ;;  %v1454_v49 = vmax.f32 %v1452_v2, %v1453_v27  ;;  %v656_v3 = vrot.slane %v655_v16, 2  ;;  %2970 = vrot.lane.b32.xlu2 %v2967_v40, %s3723_s7  ;;  %v672_v23 = vrot.slane %v5184_v37, 1  ;;  %v5910_v40 = vld [vmem:[#allocation12_spill] sm:$0xff] }
 0x244   :  { %v602_v4 = vmul.f32 %v550_v31, %v5899_v6  ;;  %v698_v54 = vrot.slane %v697_v62, 2  ;;  %v717_v25 = vrot.slane %v716_v11, 4  ;;  %v952_v14 = vmax.f32 %v950_v59, %v951_v48  ;;  %2494 = vrot.lane.b32.xlu1 %v5349_v1, %s3719_s12  ;;  %v5911_v6 = vld [vmem:[#allocation56_spill] sm:$0xff] }
 0x245   :  { %v5900_v9 = vperm.slane %v5891_v55, 4  ;;  %v3627_v56 = vpop.eup %3626  ;;  %v651_v61 = vrot.slane %v650_v46, 1  ;;  %v657_v12 = vmax.f32 %v655_v16, %v656_v3  ;;  %v1010_v26 = vsel %vm999_vm15, %v945_v17, %v5128_v44  ;;  %v5903_v44 = vld [vmem:[#allocation32_spill] sm:$0xff] }
 0x246   :  { %v622_v41 = vadd.f32 %v5168_v38, %v602_v4  ;;  %v959_v5 = vmax.f32 %v957_v30, %v958_v21  ;;  %v688_v43 = vsel %vm645_vm7, %v3627_v56, -inf  ;;  %v1461_v57 = vmax.f32 %v1459_v52, %v1460_v36  ;;  %v5906_v30 = vld [vmem:[#allocation39_spill] sm:$0xff] }
 0x247   :  { %2001 = vperm.xlu0 %3528, %v5900_v9   ;;  %v966_v20 = vmax.f32 %v964_v13, %v965_v8  ;;  %v3629_v24 = vpop.eup %3628  ;;  %v658_v15 = vrot.slane %v657_v12, 1  ;;  %v689_v29 = vrot.slane %v688_v43, 4  ;;  %v1490_v1 = vsel %vm5876_vm1, %v1454_v49, %v5335_v35  ;;  %vm5936_vm1 = vmmov %vm5858_vm0 }
 0x248   :  { %3630 = vtanh.f32 %v622_v41  ;;  %v673_v2 = vmax.f32 %v5184_v37, %v672_v23  ;;  %v5902_v33 = vrot.slane %v5901_v18, 4  ;;  %v699_v58 = vmax.f32 %v697_v62, %v698_v54 }
 0x249   :  { %v744_v10 = vsel %vm645_vm7, %v5903_v44, -inf  ;;  %v652_v28 = vmax.f32 %v650_v46, %v651_v61  ;;  %v659_v59 = vmax.f32 %v657_v12, %v658_v15  ;;  %v690_v60 = vmax.f32 %v688_v43, %v689_v29 }
 0x24a   :  { %v725_v0 = vmax.f32 %v5901_v18, %v5902_v33  ;;  %v1011_v50 = vsel %vm5904_vm4, %v952_v14, %v1010_v26  ;;  %v718_v42 = vmax.f32 %v716_v11, %v717_v25  ;;  %v737_v53 = vsel %vm645_vm7, %v3629_v24, -inf  ;;  %v5909_v11 = vld [vmem:[#allocation46_spill] sm:$0xff]  ;;  %vm5938_vm4 = vmmov %vm5905_vm2 }
 0x24b   :  { %v571_v63 = vpop.permute.xlu0 %570  ;;  %v1491_v35 = vsel %vm1005_vm6, %v1461_v57, %v1490_v1  ;;  %v1012_v37 = vsel %vm5905_vm2, %v959_v5, %v1011_v50  ;;  %v1524_v47 = vsel %vm993_vm12, %v659_v59, %v652_v28  ;;  %v691_v22 = vrot.slane %v690_v60, 2 }
 0x24c   :  { %v605_v13 = vmul.f32 %v571_v63, %v5906_v30  ;;  %1494 = vrot.lane.b32.xlu2 %v1491_v35, %s3723_s7  ;;  %v1013_v52 = vsel %vm1005_vm6, %v966_v20, %v1012_v37  ;;  %v705_v27 = vrot.slane %v5907_v39, 2  ;;  %v726_v34 = vrot.slane %v725_v0, 2  ;;  %v5912_v20 = vld [vmem:[#allocation13_spill] sm:$0xff] }
 0x24d   :  { %v745_v7 = vrot.slane %v744_v10, 4  ;;  %v5908_v62 = vperm.slane %v5896_v51, 5  ;;  %1016 = vrot.lane.b32.xlu1 %v1013_v52, %s3719_s12  ;;  %v1525_v48 = vsel %vm995_vm13, %v5909_v11, %v1524_v47  ;;  %v692_v46 = vmax.f32 %v690_v60, %v691_v22 }
 0x24e   :  { %v3631_v19 = vpop.eup %3630  ;;  %v625_v16 = vadd.f32 %v5168_v38, %v605_v13  ;;  %v700_v45 = vrot.slane %v699_v58, 1  ;;  %v1526_v21 = vsel %vm997_vm14, %v673_v2, %v1525_v48  ;;  %v719_v8 = vrot.slane %v718_v42, 2 }
 0x24f   :  { %2064 = vperm.xlu0 %3528, %v5908_v62   ;;  %v738_v36 = vrot.slane %v737_v53, 4  ;;  %v709_v31 = vsel %vm645_vm7, %v3631_v19, -inf  ;;  %v1527_v17 = vsel %vm999_vm15, %v5910_v40, %v1526_v21  ;;  %v693_v49 = vrot.slane %v692_v46, 1 }
 0x250   :  { %v710_v3 = vrot.slane %v709_v31, 4  ;;  %3632 = vtanh.f32 %v625_v16  ;;  %v1528_v4 = vsel %vm5858_vm0, %v5911_v6, %v1527_v17  ;;  %v2017_v23 = vperm.slane %v5891_v55, 7 }
 0x251   :  { %v1975_v54 = vperm.slane %v5891_v55, 1  ;;  %v706_v25 = vmax.f32 %v5907_v39, %v705_v27  ;;  %v694_v14 = vmax.f32 %v692_v46, %v693_v49  ;;  %v2024_v56 = vperm.slane %v5896_v51, 0 }
 0x252   :  { %v711_v9 = vmax.f32 %v709_v31, %v710_v3  ;;  %v727_v61 = vmax.f32 %v725_v0, %v726_v34  ;;  %v720_v12 = vmax.f32 %v718_v42, %v719_v8  ;;  %v739_v41 = vmax.f32 %v737_v53, %v738_v36 }
 0x253   :  { %v592_v26 = vpop.permute.xlu0 %591  ;;  %v701_v5 = vmax.f32 %v699_v58, %v700_v45  ;;  %v746_v43 = vmax.f32 %v744_v10, %v745_v7  ;;  %v1529_v15 = vsel %vm5913_vm5, %v694_v14, %v1528_v4  ;;  %v707_v2 = vrot.slane %v706_v25, 1 }
 0x254   :  { %v712_v57 = vrot.slane %v711_v9, 2  ;;  %v608_v24 = vmul.f32 %v592_v26, %v5912_v20  ;;  %2029 = vperm.xlu2 %3530, %v2024_v56   ;;  %v728_v0 = vrot.slane %v727_v61, 1  ;;  %v721_v44 = vrot.slane %v720_v12, 1  ;;  %v970_v26 = vpop.permute.xlu1 %969 }
 0x255   :  { %1980 = vperm.xlu1 %3529, %v1975_v54   ;;  %v5434_v29 = vsel %vm1005_vm6, %v701_v5, %v1529_v15  ;;  %v740_v58 = vrot.slane %v739_v41, 2  ;;  %v747_v60 = vrot.slane %v746_v43, 2  ;;  %v708_v50 = vmax.f32 %v706_v25, %v707_v2 }
 0x256   :  { %v3633_v1 = vpop.eup %3632  ;;  %v713_v18 = vmax.f32 %v711_v9, %v712_v57  ;;  %v628_v33 = vadd.f32 %v5168_v38, %v608_v24  ;;  %v1982_v63 = vperm.slane %v5891_v55, 2  ;;  %v722_v35 = vmax.f32 %v720_v12, %v721_v44  ;;  %v5458_v12 = vpop.permute.xlu2 %974 }
 0x257   :  { %2022 = vperm.xlu0 %3528, %v2017_v23   ;;  %v730_v10 = vsel %vm645_vm7, %v3633_v1, -inf  ;;  %v741_v37 = vmax.f32 %v739_v41, %v740_v58  ;;  %v2031_v47 = vperm.slane %v5896_v51, 1  ;;  %v729_v22 = vmax.f32 %v727_v61, %v728_v0  ;;  %v3563_v0 = vld [vmem:[%s5609_s11] ss:$0 sm:$0xff]  ;;  %s3730_s11 = smov 8  }
 0x258   :  { %v714_v28 = vrot.slane %v713_v18, 1  ;;  %v731_v59 = vrot.slane %v730_v10, 4  ;;  %3634 = vtanh.f32 %v628_v33  ;;  %v748_v13 = vmax.f32 %v746_v43, %v747_v60 }
 0x259   :  { %v5914_v39 = vmov 8   ;;  %v742_v62 = vrot.slane %v741_v37, 1  ;;  %v2045_v21 = vperm.slane %v5896_v51, 3  ;;  %v1989_v36 = vperm.slane %v5891_v55, 3 }
 0x25a   :  { %v715_v42 = vmax.f32 %v713_v18, %v714_v28  ;;  %v732_v53 = vmax.f32 %v730_v10, %v731_v59  ;;  %v749_v46 = vrot.slane %v748_v13, 1  ;;  %v2003_v23 = vperm.slane %v5891_v55, 5  ;;  %v3566_v28 = vld [vmem:[%s5616_s18] ss:$0 sm:$0xff]  ;;  %s3725_s18 = smov 24  }
 0x25b   :  { %v743_v8 = vmax.f32 %v741_v37, %v742_v62  ;;  %v2052_v25 = vperm.slane %v5896_v51, 4  ;;  %v2066_v9 = vperm.slane %v5896_v51, 6  ;;  %v2010_v56 = vperm.slane %v5891_v55, 6  ;;  %v1015_v43 = vpop.permute.xlu0 %1014  ;;  %v3567_v55 = vld [vmem:[%s5608_s10] ss:$0 sm:$0xff]  ;;  %s3729_s10 = smov 128  }
 0x25c   :  { %v1531_v38 = vsel %vm993_vm12, %v715_v42, %v708_v50  ;;  %v733_v30 = vrot.slane %v732_v53, 2  ;;  %1987 = vperm.xlu2 %3530, %v1982_v63   ;;  %v750_v40 = vmax.f32 %v748_v13, %v749_v46  ;;  %v2073_v61 = vperm.slane %v5896_v51, 7  ;;  %v2460_v57 = vpop.permute.xlu1 %2459 }
 0x25d   :  { %2036 = vperm.xlu1 %3529, %v2031_v47   ;;  %v1532_v52 = vsel %vm995_vm13, %v722_v35, %v1531_v38  ;;  %v3568_v38 = vld [vmem:[%s5617_s19] ss:$0 sm:$0xff]  ;;  %vm3079_vm8 = vcmask 1043456  }
 0x25e   :  { %v3635_v27 = vpop.eup %3634  ;;  %v734_v34 = vmax.f32 %v732_v53, %v733_v30  ;;  %v1533_v7 = vsel %vm997_vm14, %v729_v22, %v1532_v52  ;;  %v1254_v41 = vpop.permute.xlu2 %1253 }
 0x25f   :  { %3561 = vset.pattern.permute.xlu0 %v5914_v39  ;;  %v751_v11 = vsel %vm645_vm7, %v3635_v27, -inf  ;;  %v1259_v15 = vmul.f32 %v1254_v41, %v970_v26 }
 0x260   :  { %v735_v48 = vrot.slane %v734_v34, 1  ;;  %v752_v19 = vrot.slane %v751_v11, 4 }
 0x261   :  { %v1265_v51 = vadd.f32 %v3567_v55, %v1259_v15 }
 0x262   :  { %v736_v16 = vmax.f32 %v734_v34, %v735_v48  ;;  %v753_v45 = vmax.f32 %v751_v11, %v752_v19 }
 0x263   :  { %3636 = vtanh.f32 %v1265_v51 }
 0x264   :  { %v754_v31 = vrot.slane %v753_v45, 2  ;;  %2050 = vperm.xlu2 %3530, %v2045_v21   ;;  %v1534_v17 = vsel %vm999_vm15, %v736_v16, %v1533_v7  ;;  %v1493_v1 = vpop.permute.xlu1 %1492  ;;  %v3565_v21 = vld [vmem:[%s5607_s9] ss:$0 sm:$0xff]  ;;  %s3727_s9 = smov 16  }
 0x265   :  { %1994 = vperm.xlu1 %3529, %v1989_v36   ;;  %v1535_v49 = vsel %vm5915_vm3, %v743_v8, %v1534_v17  ;;  %v1498_v44 = vmul.f32 %v1493_v1, %v970_v26  ;;  %v1020_v8 = vmul.f32 %v1015_v43, %v970_v26 }
 0x266   :  { %v755_v3 = vmax.f32 %v753_v45, %v754_v31  ;;  %v1536_v6 = vsel %vm5916_vm10, %v750_v40, %v1535_v49  ;;  %v5460_v5 = vpop.permute.xlu2 %2492 }
 0x267   :  { %v1504_v60 = vadd.f32 %v3563_v0, %v1498_v44  ;;  %v1026_v40 = vadd.f32 %v3565_v21, %v1020_v8  ;;  %v5496_v44 = vld [vmem:[%s5614_s16] ss:$0 sm:$0xff] }
 0x268   :  { %v756_v4 = vrot.slane %v755_v3, 1 }
 0x269   :  { %v3637_v35 = vpop.eup %3636 }
 0x26a   :  { %v757_v54 = vmax.f32 %v755_v3, %v756_v4  ;;  %v2498_v4 = vmul.f32 %v5460_v5, %v5294_v32 }
 0x26c   :  { %2008 = vperm.xlu2 %3530, %v2003_v23   ;;  %v5453_v14 = vsel %vm1005_vm6, %v757_v54, %v1536_v6  ;;  %v3564_v6 = vld [vmem:[%s5615_s17] ss:$0 sm:$0xff] }
 0x26d   :  { %2057 = vperm.xlu1 %3529, %v2052_v25   ;;  %v2504_v54 = vadd.f32 %v3564_v6, %v2498_v4 }
 0x274   :  { %2071 = vperm.xlu2 %3530, %v2066_v9  }
 0x275   :  { %2015 = vperm.xlu1 %3529, %v2010_v56  }
 0x27d   :  { %2078 = vperm.xlu1 %3529, %v2073_v61  }
 0x285   :  { %v2731_v20 = vpop.permute.xlu2 %2730 }
 0x286   :  { %v2736_v59 = vmul.f32 %v2731_v20, %v5294_v32 }
 0x288   :  { %v2742_v63 = vadd.f32 %v3566_v28, %v2736_v59  ;;  %v5918_v59 = vld [vmem:[#allocation19_spill] sm:$0xff] }
 0x296   :  { %v2733_v24 = vpop.permute.xlu0 %2732 }
 0x297   :  { %v2737_v58 = vmul.f32 %v2733_v24, %v2460_v57 }
 0x299   :  { %v2743_v50 = vadd.f32 %v3566_v28, %v2737_v58  ;;  %v5917_v58 = vld [vmem:[#allocation15_spill] sm:$0xff] }
 0x29d   :  { %v2971_v2 = vpop.permute.xlu2 %2970 }
 0x29e   :  { %v1256_v18 = vpop.permute.xlu0 %1255  ;;  %v2975_v30 = vmul.f32 %v2971_v2, %v2460_v57 }
 0x29f   :  { %v1260_v33 = vmul.f32 %v1256_v18, %v5458_v12  ;;  %v3506_v18 = vld [vmem:[%s5618_s20 + $0x8] sm:$0xff] }
 0x2a0   :  { %v2981_v27 = vadd.f32 %v3568_v38, %v2975_v30  ;;  %v5922_v30 = vld [vmem:[#allocation26_spill] sm:$0xff] }
 0x2a1   :  { %v1266_v10 = vadd.f32 %v3567_v55, %v1260_v33 }
 0x2a3   :  { %3638 = vtanh.f32 %v1266_v10 }
 0x2a4   :  { %3640 = vtanh.f32 %v1504_v60 }
 0x2a5   :  { %3642 = vtanh.f32 %v2743_v50  ;;  %v5919_v50 = vld [vmem:[#allocation43_spill] sm:$0xff] }
 0x2a6   :  { %v1495_v42 = vpop.permute.xlu2 %1494 }
 0x2a7   :  { %v1499_v53 = vmul.f32 %v1495_v42, %v5458_v12 }
 0x2a9   :  { %v1505_v37 = vadd.f32 %v3563_v0, %v1499_v53  ;;  %v3639_v47 = vpop.eup %3638  ;;  %v5920_v53 = vld [vmem:[#allocation40_spill] sm:$0xff] }
 0x2aa   :  { %v3536_v22 = vpack.i.bf16 %v3639_v47, %v3637_v35  ;;  %v3641_v13 = vpop.eup %3640 }
 0x2ab   :  { %3644 = vtanh.f32 %v1505_v37  ;;  %v3643_v39 = vpop.eup %3642  ;;  %v5921_v37 = vld [vmem:[#allocation22_spill] sm:$0xff] }
 0x2ac   :  { %3646 = vtanh.f32 %v2742_v63  ;;  %3537 = vrot.lane.b32.xlu0 %v3536_v22, %s3725_s18 }
 0x2ad   :  { %3648 = vtanh.f32 %v2981_v27 }
 0x2ae   :  { %v2969_v52 = vpop.permute.xlu1 %2968  ;;  %v2030_v43 = vpop.permute.xlu2 %2029 }
 0x2af   :  { %v2974_v34 = vmul.f32 %v2969_v52, %v5294_v32  ;;  %v3052_v32 = vld [vmem:[%s5618_s20 + $0x10] sm:$0xf]  ;;  %v2088_v63 = vmul.f32 %v2030_v43, %v5920_v53 }
 0x2b0   :  { %v3066_v24 = vunpack.c.l.b16 %v3052_v32 }
 0x2b1   :  { %v3645_v7 = vpop.eup %3644  ;;  %v2980_v11 = vadd.f32 %v3568_v38, %v2974_v34 }
 0x2b2   :  { %v3647_v62 = vpop.eup %3646  ;;  %v3541_v48 = vpack.i.bf16 %v3645_v7, %v3641_v13  ;;  %v3069_v15 = vpack.c.b16 %v3066_v24, %v3066_v24  ;;  %v2108_v7 = vadd.f32 %v5496_v44, %v2088_v63 }
 0x2b3   :  { %v3551_v19 = vpack.i.bf16 %v3643_v39, %v3647_v62  ;;  %3650 = vtanh.f32 %v2980_v11  ;;  %v3649_v16 = vpop.eup %3648  ;;  %v5923_v39 = vld [vmem:[#allocation18_spill] sm:$0xff]  ;;  %v5924_v62 = vld [vmem:[#allocation28_spill] sm:$0xff] }
 0x2b4   :  { %3542 = vrot.lane.b32.xlu1 %v3541_v48, %s3726_s30  ;;  %3652 = vtanh.f32 %v1026_v40  ;;  %v3081_v2 = vsel %vm3079_vm8, %v3069_v15, 0 }
 0x2b5   :  { %3552 = vrot.lane.b32.xlu0 %v3551_v19, %s3725_s18  ;;  %3088 = vmatpush.bf16.msra.mxu3 %v3081_v2  ;;  %v5925_v19 = vld [vmem:[#allocation20_spill] sm:$0xff] }
 0x2b6   :  { %v2495_v46 = vpop.permute.xlu1 %2494  ;;  %v1988_v5 = vpop.permute.xlu2 %1987 }
 0x2b7   :  { %v2499_v3 = vmul.f32 %v2495_v46, %v2460_v57  ;;  %v1974_v57 = vpop.permute.xlu0 %1973  ;;  %v2082_v47 = vmul.f32 %v1988_v5, %v5921_v37  ;;  %v5931_v5 = vld [vmem:[#allocation37_spill] sm:$0xff] }
 0x2b8   :  { %v2080_v10 = vmul.f32 %v1974_v57, %v5917_v58 }
 0x2b9   :  { %v3651_v45 = vpop.eup %3650  ;;  %v2505_v23 = vadd.f32 %v3564_v6, %v2499_v3  ;;  %3089 = vmatpush.bf16.msra.mxu3 %v3506_v18  ;;  %v2102_v48 = vadd.f32 %v5496_v44, %v2082_v47  ;;  %v5928_v6 = vld [vmem:[#allocation31_spill] sm:$0xff]  ;;  %v5932_v18 = vld [vmem:[#allocation42_spill] sm:$0xff] }
 0x2ba   :  { %v3556_v36 = vpack.i.bf16 %v3649_v16, %v3651_v45  ;;  %v3653_v25 = vpop.eup %3652  ;;  %v2100_v35 = vadd.f32 %v5496_v44, %v2080_v10 }
 0x2bc   :  { %3557 = vrot.lane.b32.xlu1 %v3556_v36, %s3726_s30  ;;  %v3505_v36 = vld [vmem:[%s5618_s20] sm:$0xff] }
 0x2bd   :  { %3090 = vmatpush.bf16.msra.mxu3 %v3505_v36 }
 0x2be   :  { %v2051_v51 = vpop.permute.xlu2 %2050 }
 0x2bf   :  { %v1017_v31 = vpop.permute.xlu1 %1016  ;;  %v2044_v55 = vpop.permute.xlu0 %2043  ;;  %v2091_v46 = vmul.f32 %v2051_v51, %v5925_v19 }
 0x2c0   :  { %v1021_v17 = vmul.f32 %v1017_v31, %v5458_v12  ;;  %v2090_v27 = vmul.f32 %v2044_v55, %v5923_v39 }
 0x2c1   :  { %v2111_v3 = vadd.f32 %v5496_v44, %v2091_v46 }
 0x2c2   :  { %v1027_v49 = vadd.f32 %v3565_v21, %v1021_v17  ;;  %v2110_v45 = vadd.f32 %v5496_v44, %v2090_v27  ;;  %v5926_v21 = vld [vmem:[#allocation25_spill] sm:$0xff]  ;;  %v5927_v17 = vld [vmem:[#allocation27_spill] sm:$0xff] }
 0x2c4   :  { %3654 = vtanh.f32 %v1027_v49 }
 0x2c5   :  { %3656 = vtanh.f32 %v2505_v23 }
 0x2c6   :  { %3658 = vtanh.f32 %v2504_v54  ;;  %v2009_v28 = vpop.permute.xlu2 %2008 }
 0x2c7   :  { %v1981_v41 = vpop.permute.xlu1 %1980  ;;  %v2002_v33 = vpop.permute.xlu0 %2001  ;;  %3660 = vtanh.f32 %v2100_v35  ;;  %v2085_v4 = vmul.f32 %v2009_v28, %v5928_v6 }
 0x2c8   :  { %v2081_v60 = vmul.f32 %v1981_v41, %v5918_v59  ;;  %v2084_v11 = vmul.f32 %v2002_v33, %v5924_v62 }
 0x2c9   :  { %v2105_v15 = vadd.f32 %v5496_v44, %v2085_v4 }
 0x2ca   :  { %v3655_v9 = vpop.eup %3654  ;;  %v2101_v38 = vadd.f32 %v5496_v44, %v2081_v60  ;;  %v2104_v31 = vadd.f32 %v5496_v44, %v2084_v11 }
 0x2cb   :  { %v3531_v56 = vpack.i.bf16 %v3655_v9, %v3653_v25  ;;  %v3657_v61 = vpop.eup %3656  ;;  %v5929_v25 = vld [vmem:[#allocation38_spill] sm:$0xff] }
 0x2cc   :  { %v3659_v12 = vpop.eup %3658  ;;  %3662 = vtanh.f32 %v2101_v38 }
 0x2cd   :  { %3532 = vrot.lane.b32.xlu2 %v3531_v56, %s3727_s9  ;;  %v3546_v26 = vpack.i.bf16 %v3657_v61, %v3659_v12  ;;  %v3661_v23 = vpop.eup %3660  ;;  %v5930_v12 = vld [vmem:[#allocation34_spill] sm:$0xff] }
 0x2ce   :  { %v2072_v40 = vpop.permute.xlu2 %2071  ;;  %v2132_v32 = vsel %vm645_vm7, %v3661_v23, -inf }
 0x2cf   :  { %v2037_v20 = vpop.permute.xlu1 %2036  ;;  %v2065_v22 = vpop.permute.xlu0 %2064  ;;  %v2094_v9 = vmul.f32 %v2072_v40, %v5929_v25  ;;  %v2133_v28 = vrot.slane %v2132_v32, 4 }
 0x2d0   :  { %v2089_v42 = vmul.f32 %v2037_v20, %v5919_v50  ;;  %v2093_v49 = vmul.f32 %v2065_v22, %v5927_v17 }
 0x2d1   :  { %v2114_v2 = vadd.f32 %v5496_v44, %v2094_v9 }
 0x2d2   :  { %v2109_v34 = vadd.f32 %v5496_v44, %v2089_v42  ;;  %v3663_v61 = vpop.eup %3662  ;;  %v2113_v57 = vadd.f32 %v5496_v44, %v2093_v49 }
 0x2d4   :  { %3664 = vtanh.f32 %v2109_v34 }
 0x2d5   :  { %3547 = vrot.lane.b32.xlu2 %v3546_v26, %s3727_s9  ;;  %3666 = vtanh.f32 %v2108_v7 }
 0x2d6   :  { %3668 = vtanh.f32 %v2102_v48 }
 0x2d7   :  { %v1995_v1 = vpop.permute.xlu1 %1994  ;;  %v2023_v54 = vpop.permute.xlu0 %2022 }
 0x2d8   :  { %v2083_v13 = vmul.f32 %v1995_v1, %v5922_v30  ;;  %v2087_v24 = vmul.f32 %v2023_v54, %v5931_v5  ;;  %v2139_v1 = vsel %vm645_vm7, %v3663_v61, -inf  ;;  %v2134_v30 = vmax.f32 %v2132_v32, %v2133_v28 }
 0x2d9   :  { %v2140_v53 = vrot.slane %v2139_v1, 4 }
 0x2da   :  { %v2103_v16 = vadd.f32 %v5496_v44, %v2083_v13  ;;  %v3665_v43 = vpop.eup %3664  ;;  %v2107_v42 = vadd.f32 %v5496_v44, %v2087_v24 }
 0x2db   :  { %v3667_v20 = vpop.eup %3666  ;;  %v2141_v34 = vmax.f32 %v2139_v1, %v2140_v53 }
 0x2dc   :  { %3670 = vtanh.f32 %v2103_v16  ;;  %v3669_v55 = vpop.eup %3668  ;;  %v2188_v59 = vsel %vm645_vm7, %v3667_v20, -inf }
 0x2dd   :  { %3672 = vtanh.f32 %v2110_v45  ;;  %v2146_v50 = vsel %vm645_vm7, %v3669_v55, -inf  ;;  %v2189_v22 = vrot.slane %v2188_v59, 4  ;;  %v2142_v17 = vrot.slane %v2141_v34, 2 }
 0x2de   :  { %3674 = vtanh.f32 %v2104_v31  ;;  %v2147_v39 = vrot.slane %v2146_v50, 4  ;;  %v2135_v31 = vrot.slane %v2134_v30, 2 }
 0x2df   :  { %v2058_v0 = vpop.permute.xlu1 %2057  ;;  %3676 = vtanh.f32 %v2111_v3  ;;  %v2143_v32 = vmax.f32 %v2141_v34, %v2142_v17 }
 0x2e0   :  { %v2092_v8 = vmul.f32 %v2058_v0, %v5926_v21  ;;  %v2195_v0 = vsel %vm645_vm7, %v3665_v43, -inf  ;;  %v2148_v21 = vmax.f32 %v2146_v50, %v2147_v39 }
 0x2e1   :  { %v2196_v35 = vrot.slane %v2195_v0, 4  ;;  %v2144_v50 = vrot.slane %v2143_v32, 1 }
 0x2e2   :  { %v2112_v56 = vadd.f32 %v5496_v44, %v2092_v8  ;;  %v3671_v33 = vpop.eup %3670 }
 0x2e3   :  { %v3673_v10 = vpop.eup %3672  ;;  %v2153_v37 = vsel %vm645_vm7, %v3671_v33, -inf  ;;  %v2197_v11 = vmax.f32 %v2195_v0, %v2196_v35 }
 0x2e4   :  { %3678 = vtanh.f32 %v2112_v56  ;;  %v3675_v60 = vpop.eup %3674  ;;  %v2202_v13 = vsel %vm645_vm7, %v3673_v10, -inf  ;;  %v2154_v7 = vrot.slane %v2153_v37, 4 }
 0x2e5   :  { %3680 = vtanh.f32 %v2113_v57  ;;  %v3677_v63 = vpop.eup %3676  ;;  %v2203_v19 = vrot.slane %v2202_v13, 4  ;;  %v2198_v6 = vrot.slane %v2197_v11, 2  ;;  %v2136_v57 = vmax.f32 %v2134_v30, %v2135_v31 }
 0x2e6   :  { %3682 = vtanh.f32 %v2105_v15  ;;  %v2209_v27 = vsel %vm645_vm7, %v3677_v63, -inf  ;;  %v2155_v49 = vmax.f32 %v2153_v37, %v2154_v7 }
 0x2e7   :  { %v2016_v52 = vpop.permute.xlu1 %2015  ;;  %3684 = vtanh.f32 %v2114_v2  ;;  %v2210_v8 = vrot.slane %v2209_v27, 4  ;;  %v2204_v54 = vmax.f32 %v2202_v13, %v2203_v19  ;;  %v2199_v55 = vmax.f32 %v2197_v11, %v2198_v6 }
 0x2e8   :  { %v2086_v41 = vmul.f32 %v2016_v52, %v5930_v12  ;;  %v2160_v52 = vsel %vm645_vm7, %v3675_v60, -inf  ;;  %v2149_v12 = vrot.slane %v2148_v21, 2  ;;  %v2156_v5 = vrot.slane %v2155_v49, 2 }
 0x2e9   :  { %v2161_v46 = vrot.slane %v2160_v52, 4  ;;  %v2205_v2 = vrot.slane %v2204_v54, 2  ;;  %v2200_v63 = vrot.slane %v2199_v55, 1 }
 0x2ea   :  { %v2106_v58 = vadd.f32 %v5496_v44, %v2086_v41  ;;  %v3679_v38 = vpop.eup %3678 }
 0x2eb   :  { %v3681_v62 = vpop.eup %3680  ;;  %v2216_v16 = vsel %vm645_vm7, %v3679_v38, -inf  ;;  %v2162_v9 = vmax.f32 %v2160_v52, %v2161_v46  ;;  %v2201_v19 = vmax.f32 %v2199_v55, %v2200_v63 }
 0x2ec   :  { %3686 = vtanh.f32 %v2106_v58  ;;  %v3683_v48 = vpop.eup %3682  ;;  %v2223_v40 = vsel %vm645_vm7, %v3681_v62, -inf  ;;  %v2217_v4 = vrot.slane %v2216_v16, 4  ;;  %v2150_v58 = vmax.f32 %v2148_v21, %v2149_v12 }
 0x2ed   :  { %3688 = vtanh.f32 %v2107_v42  ;;  %v3685_v45 = vpop.eup %3684  ;;  %v2167_v3 = vsel %vm645_vm7, %v3683_v48, -inf  ;;  %v2224_v41 = vrot.slane %v2223_v40, 4  ;;  %v2163_v0 = vrot.slane %v2162_v9, 2 }
 0x2ee   :  { %v2230_v56 = vsel %vm645_vm7, %v3685_v45, -inf  ;;  %v2168_v20 = vrot.slane %v2167_v3, 4  ;;  %v2218_v1 = vmax.f32 %v2216_v16, %v2217_v4  ;;  %v2157_v42 = vmax.f32 %v2155_v49, %v2156_v5  ;;  %v3508_v16 = vld [vmem:[%s5620_s22 + $0x8] sm:$0xff] }
 0x2ef   :  { %v2079_v26 = vpop.permute.xlu1 %2078  ;;  %v2231_v15 = vrot.slane %v2230_v56, 4  ;;  %v2225_v10 = vmax.f32 %v2223_v40, %v2224_v41  ;;  %v2164_v13 = vmax.f32 %v2162_v9, %v2163_v0  ;;  %v2151_v52 = vrot.slane %v2150_v58, 1  ;;  %3140 = vmatpush.bf16.msra.mxu0 %v3508_v16 }
 0x2f0   :  { %v2095_v51 = vmul.f32 %v2079_v26, %v5932_v18  ;;  %v2211_v26 = vmax.f32 %v2209_v27, %v2210_v8  ;;  %v2169_v60 = vmax.f32 %v2167_v3, %v2168_v20  ;;  %v2219_v35 = vrot.slane %v2218_v1, 2 }
 0x2f1   :  { %v2232_v53 = vmax.f32 %v2230_v56, %v2231_v15  ;;  %v2226_v39 = vrot.slane %v2225_v10, 2  ;;  %v2145_v62 = vmax.f32 %v2143_v32, %v2144_v50  ;;  %v2158_v11 = vrot.slane %v2157_v42, 1 }
 0x2f2   :  { %v2115_v47 = vadd.f32 %v5496_v44, %v2095_v51  ;;  %v2190_v44 = vmax.f32 %v2188_v59, %v2189_v22  ;;  %v3687_v36 = vpop.eup %3686  ;;  %v2212_v28 = vrot.slane %v2211_v26, 2  ;;  %v2206_v22 = vmax.f32 %v2204_v54, %v2205_v2 }
 0x2f3   :  { %v3689_v23 = vpop.eup %3688  ;;  %v2174_v43 = vsel %vm645_vm7, %v3687_v36, -inf  ;;  %v2170_v7 = vrot.slane %v2169_v60, 2  ;;  %v2233_v48 = vrot.slane %v2232_v53, 2  ;;  %v2165_v31 = vrot.slane %v2164_v13, 1 }
 0x2f4   :  { %3690 = vtanh.f32 %v2115_v47  ;;  %v2191_v25 = vrot.slane %v2190_v44, 2  ;;  %v2181_v24 = vsel %vm645_vm7, %v3689_v23, -inf  ;;  %v2175_v51 = vrot.slane %v2174_v43, 4 }
 0x2f5   :  { %v2182_v59 = vrot.slane %v2181_v24, 4  ;;  %v2137_v47 = vrot.slane %v2136_v57, 1  ;;  %v2213_v27 = vmax.f32 %v2211_v26, %v2212_v28  ;;  %v2207_v21 = vrot.slane %v2206_v22, 1 }
 0x2f6   :  { %v2192_v18 = vmax.f32 %v2190_v44, %v2191_v25  ;;  %v2176_v30 = vmax.f32 %v2174_v43, %v2175_v51  ;;  %v2220_v44 = vmax.f32 %v2218_v1, %v2219_v35  ;;  %v2152_v40 = vmax.f32 %v2150_v58, %v2151_v52 }
 0x2f7   :  { %v2183_v34 = vmax.f32 %v2181_v24, %v2182_v59  ;;  %v2138_v45 = vmax.f32 %v2136_v57, %v2137_v47  ;;  %v2227_v17 = vmax.f32 %v2225_v10, %v2226_v39  ;;  %v2214_v49 = vrot.slane %v2213_v27, 1 }
 0x2f8   :  { %v2193_v38 = vrot.slane %v2192_v18, 1  ;;  %v2177_v36 = vrot.slane %v2176_v30, 2  ;;  %v2171_v6 = vmax.f32 %v2169_v60, %v2170_v7  ;;  %v2159_v23 = vmax.f32 %v2157_v42, %v2158_v11 }
 0x2f9   :  { %v2184_v3 = vrot.slane %v2183_v34, 2  ;;  %v3000_v4 = vsel %vm993_vm12, %v2145_v62, %v2138_v45  ;;  %v2234_v54 = vmax.f32 %v2232_v53, %v2233_v48  ;;  %v2221_v9 = vrot.slane %v2220_v44, 1 }
 0x2fa   :  { %v3691_v61 = vpop.eup %3690  ;;  %v2194_v8 = vmax.f32 %v2192_v18, %v2193_v38  ;;  %v2178_v12 = vmax.f32 %v2176_v30, %v2177_v36  ;;  %v2166_v41 = vmax.f32 %v2164_v13, %v2165_v31  ;;  %v2228_v26 = vrot.slane %v2227_v17, 1 }
 0x2fb   :  { %v2237_v33 = vsel %vm645_vm7, %v3691_v61, -inf  ;;  %v2208_v61 = vmax.f32 %v2206_v22, %v2207_v21  ;;  %v3001_v43 = vsel %vm995_vm13, %v2152_v40, %v3000_v4  ;;  %v2215_v57 = vmax.f32 %v2213_v27, %v2214_v49 }
 0x2fc   :  { %v2238_v37 = vrot.slane %v2237_v33, 4  ;;  %v3007_v25 = vsel %vm993_vm12, %v2201_v19, %v2194_v8  ;;  %v2185_v20 = vmax.f32 %v2183_v34, %v2184_v3  ;;  %v3002_v5 = vsel %vm997_vm14, %v2159_v23, %v3001_v43 }
 0x2fd   :  { %v3008_v24 = vsel %vm995_vm13, %v2208_v61, %v3007_v25  ;;  %v2172_v15 = vrot.slane %v2171_v6, 1  ;;  %v2235_v55 = vrot.slane %v2234_v54, 1  ;;  %v2222_v1 = vmax.f32 %v2220_v44, %v2221_v9 }
 0x2fe   :  { %v2239_v46 = vmax.f32 %v2237_v33, %v2238_v37  ;;  %v2179_v33 = vrot.slane %v2178_v12, 1  ;;  %vm1566_vm12 = vcmask 195584   ;;  %v3003_v59 = vsel %vm999_vm15, %v2166_v41, %v3002_v5 }
 0x2ff   :  { %v3009_v60 = vsel %vm997_vm14, %v2215_v57, %v3008_v24  ;;  %vm5933_vm13 = vcmask 261120   ;;  %vm3072_vm14 = vcmask 326656   ;;  %v2229_v52 = vmax.f32 %v2227_v17, %v2228_v26 }
 0x300   :  { %v2240_v56 = vrot.slane %v2239_v46, 2  ;;  %v3010_v22 = vsel %vm999_vm15, %v2222_v1, %v3009_v60  ;;  %v2180_v38 = vmax.f32 %v2178_v12, %v2179_v33  ;;  %vm5934_vm11 = vmmov %vm5933_vm13  ;;  %v2173_v39 = vmax.f32 %v2171_v6, %v2172_v15  ;;  %v3570_v12 = vld [vmem:[%s5619_s21] ss:$0 sm:$0xff] }
 0x301   :  { %v3011_v7 = vsel %vm5936_vm1, %v2229_v52, %v3010_v22  ;;  %v2236_v11 = vmax.f32 %v2234_v54, %v2235_v55  ;;  %vm5937_vm15 = vmmov %vm5905_vm2 }
 0x302   :  { %v2241_v2 = vmax.f32 %v2239_v46, %v2240_v56  ;;  %vm5939_vm2 = vmmov %vm5934_vm11  ;;  %v3507_v56 = vld [vmem:[%s5620_s22] sm:$0xff] }
 0x303   :  { %v3012_v45 = vsel %vm5938_vm4, %v2236_v11, %v3011_v7  ;;  %vm5940_vm0 = vmmov %vm5939_vm2  ;;  %3141 = vmatpush.bf16.msra.mxu0 %v3507_v56 }
 0x304   :  { %v2242_v47 = vrot.slane %v2241_v2, 1  ;;  %vm5942_vm5 = vmmov %vm5940_vm0 }
 0x306   :  { %v2243_v34 = vmax.f32 %v2241_v2, %v2242_v47 }
 0x308   :  { %v3013_v8 = vsel %vm1005_vm6, %v2243_v34, %v3012_v45 }
 0x31e   :  { %v3538_v32 = vpop.permute.xlu0 %3537 }
 0x31f   :  { %v3540_v10 = vunpack.i.h.bf16 %v3538_v32  ;;  %v3539_v28 = vunpack.i.l.bf16 %v3538_v32 }
 0x326   :  { %v3543_v18 = vpop.permute.xlu1 %3542 }
 0x327   :  { %v3533_v51 = vpop.permute.xlu2 %3532  ;;  %v3545_v50 = vunpack.i.h.bf16 %v3543_v18  ;;  %v3544_v42 = vunpack.i.l.bf16 %v3543_v18  ;;  %v3553_v16 = vpop.permute.xlu0 %3552 }
 0x328   :  { %v3535_v0 = vunpack.i.h.bf16 %v3533_v51  ;;  %v3534_v58 = vunpack.i.l.bf16 %v3533_v51  ;;  %v3555_v40 = vunpack.i.h.bf16 %v3553_v16  ;;  %v3554_v17 = vunpack.i.l.bf16 %v3553_v16 }
 0x32a   :  { %v1565_v53 = vsel %vm645_vm7, %v5453_v14, %v3535_v0  ;;  %v1564_v63 = vsel %vm645_vm7, %v5434_v29, %v3534_v58  ;;  %v2186_v14 = vrot.slane %v2185_v20, 1  ;;  %v3004_v29 = vsel %vm5935_vm9, %v2173_v39, %v3003_v59  ;;  %v3571_v0 = vld [vmem:[%s5621_s23] ss:$0 sm:$0xff] }
 0x32b   :  { %v1568_v35 = vsel %vm1566_vm12, %v1565_v53, %v3540_v10  ;;  %v1567_v37 = vsel %vm1566_vm12, %v1564_v63, %v3539_v28  ;;  %v3005_v48 = vsel %vm5937_vm15, %v2180_v38, %v3004_v29 }
 0x32c   :  { %v1570_v30 = vsel %vm5933_vm13, %v1568_v35, %v3545_v50  ;;  %v1569_v13 = vsel %vm5934_vm11, %v1567_v37, %v3544_v42  ;;  %v2187_v46 = vmax.f32 %v2185_v20, %v2186_v14 }
 0x32d   :  { %v3046_v27 = vpack.c.bf16 %v1570_v30, %v1569_v13 }
 0x32e   :  { %v3006_v21 = vsel %vm1005_vm6, %v2187_v46, %v3005_v48  ;;  %v3558_v49 = vpop.permute.xlu1 %3557  ;;  %vm5941_vm6 = vmmov %vm5940_vm0 }
 0x32f   :  { %v3548_v62 = vpop.permute.xlu2 %3547  ;;  %3437 = vmatmul.msk.bf16.vlgmr.msra.gmra.mxu3 %vm3072_vm14, %v3046_v27  ;;  %v3560_v4 = vunpack.i.h.bf16 %v3558_v49  ;;  %v3559_v23 = vunpack.i.l.bf16 %v3558_v49 }
 0x330   :  { %v3550_v19 = vunpack.i.h.bf16 %v3548_v62  ;;  %v3549_v44 = vunpack.i.l.bf16 %v3548_v62 }
 0x332   :  { %v3041_v36 = vsel %vm645_vm7, %v3013_v8, %v3550_v19  ;;  %v3040_v31 = vsel %vm645_vm7, %v3006_v21, %v3549_v44 }
 0x333   :  { %v3042_v3 = vsel %vm1566_vm12, %v3040_v31, %v3554_v17  ;;  %v3043_v6 = vsel %vm1566_vm12, %v3041_v36, %v3555_v40 }
 0x334   :  { %v3044_v54 = vsel %vm5939_vm2, %v3042_v3, %v3559_v23  ;;  %v3045_v25 = vsel %vm5940_vm0, %v3043_v6, %v3560_v4 }
 0x335   :  { %v3047_v9 = vpack.c.bf16 %v3045_v25, %v3044_v54 }
 0x33f   :  { %3438 = vmatmul.msk.bf16.gmra.mxu3 %vm3072_vm14, %v3047_v9 }
 0x3b2   :  { %v3092_v61 = vpop.f32.mrf.mxu3 }
 0x3b3   :  { %v3093_v41 = vadd.f32 %v3570_v12, %v3092_v61 }
 0x3b5   :  { %v3102_v57 = vmax.f32 %v3093_v41, 0.0 }
 0x3ba   :  { %v3094_v26 = vpop.f32.mrf.mxu3 }
 0x3bb   :  { %v3095_v43 = vadd.f32 %v3570_v12, %v3094_v26 }
 0x3bd   :  { %v3103_v20 = vmax.f32 %v3095_v43, 0.0 }
 0x3bf   :  { %v3106_v32 = vpack.c.bf16 %v3103_v20, %v3102_v57 }
 0x3c1   :  { %3447 = vmatmul.msk.bf16.vlgmr.msra.gmra.mxu0 %vm5941_vm6, %v3106_v32 }
 0x3c2   :  { %v3097_v5 = vpop.f32.mrf.mxu3 }
 0x3c3   :  { %v3098_v24 = vadd.f32 %v3570_v12, %v3097_v5 }
 0x3c5   :  { %v3104_v1 = vmax.f32 %v3098_v24, 0.0 }
 0x3ca   :  { %v3099_v15 = vpop.f32.mrf.mxu3 }
 0x3cb   :  { %v3100_v55 = vadd.f32 %v3570_v12, %v3099_v15 }
 0x3cd   :  { %v3105_v2 = vmax.f32 %v3100_v55, 0.0 }
 0x3cf   :  { %v3107_v18 = vpack.c.bf16 %v3105_v2, %v3104_v1 }
 0x3d1   :  { %3448 = vmatmul.msk.bf16.gmra.mxu0 %vm5942_vm5, %v3107_v18 }
 0x43e   :  { %v3143_v51 = vpop.f32.mrf.mxu0 }
 0x43f   :  { %v3144_v10 = vadd.f32 %v3571_v0, %v3143_v51 }
 0x446   :  { %v3145_v33 = vpop.f32.mrf.mxu0 }
 0x447   :  { %v3146_v42 = vadd.f32 %v3571_v0, %v3145_v33 }
 0x44e   :  { %v3148_v58 = vpop.f32.mrf.mxu0 }
 0x44f   :  { %v3149_v28 = vadd.f32 %v3571_v0, %v3148_v58 }
 0x451   :  { %v3153_v59 = vmul.f32 %v3149_v28, %v3144_v10 }
 0x453   :  { %v3155_v60 = vsel %vm645_vm7, %v3153_v59, 0.0 }
 0x454   :  { %3156 = vadd.xlane.f32.xlu2 %v3155_v60 }
 0x456   :  { %v3150_v50 = vpop.f32.mrf.mxu0 }
 0x457   :  { %v3151_v53 = vadd.f32 %v3571_v0, %v3150_v50 }
 0x459   :  { %v3154_v63 = vmul.f32 %v3151_v53, %v3146_v42 }
 0x45b   :  { %v3158_v35 = vsel %vm645_vm7, %v3154_v63, 0.0 }
 0x45c   :  { %3159 = vadd.xlane.f32.xlu0 %v3158_v35 }
 0x4c7   :  { %v3157_v37 = vpop.xlane.xlu2 %3156 }
 0x4c8   :  { %3161 = vst [vmem:[#allocation6] sm:$0xff] %v3157_v37 }
 0x4cf   :  { %v3160_v47 = vpop.xlane.xlu0 %3159 }
 0x4d0   :  { %3162 = vst [vmem:[#allocation6 + $0x8] sm:$0xff] %v3160_v47 }
 0x4d1   :  { %3175 = dma.vmem_to_hbm [thread:$0]  %s3168_s27, 256, %s3170_s5, [#allocation7], %s3729_s10, %s3729_s10, %s3730_s11  }
 0x4d2   :  { %3717 = dma.done.wait [#allocation7], 256  }
 0x4d3   :  { %3718 = vsyncadd [#allocation7], 4294967040 }
 0x4d4   :  { %3180 = vsyncpa [#allocation7], 1 }

</bundles_post_ra>
